<compile_context>
chip_gen: v7x
topology: tpu7x:2x2x1
jax: 0.10.0
libtpu: 0.0.40
codegen_flags: <defaults>
</compile_context>

<pallas_src>
import math

import jax
import jax.numpy as jnp
import numpy as np
from jax import lax
from jax.experimental import pallas as pl
from jax.experimental.pallas import tpu as pltpu


def _choose_h_tile(H, W, C, budget_bytes=16 << 20):
    """Largest divisor of H whose (TH, W, C) f32 slabs (~4 live copies) fit budget."""
    per_row = 4 * W * C * 4
    max_rows = max(1, budget_bytes // per_row)
    if max_rows >= H:
        return H
    divisors = [d for d in range(1, H + 1) if H % d == 0 and d <= max_rows]
    pref = [d for d in divisors if d % 8 == 0]
    return max(pref) if pref else max(divisors)


def _make_pos_embed_kernel(normalize, scale, H, W, C, TH, eps=1e-6):
    single_tile = TH == H

    def kernel(nm_ref, params_ref, out_ref):
        t = pl.program_id(1)
        row_off = pl.multiple_of(t * TH, TH)

        nm_f32 = nm_ref[0]                                   # (H, W), 1.0 = not masked
        nm_bf = nm_f32.astype(jnp.bfloat16)

        # Triangular "ones" matrices generated in-kernel (no HBM traffic).
        r = lax.broadcasted_iota(jnp.int32, (TH, H), 0) + row_off
        c = lax.broadcasted_iota(jnp.int32, (TH, H), 1)
        tril_t = (r >= c).astype(jnp.float32).astype(jnp.bfloat16)   # (TH, H)

        rw = lax.broadcasted_iota(jnp.int32, (W, W), 0)
        cw = lax.broadcasted_iota(jnp.int32, (W, W), 1)
        triu_w = (rw <= cw).astype(jnp.float32).astype(jnp.bfloat16)  # (W, W)

        # cumsum over H for this row-tile (MXU, bf16 0/1 operands, f32 accum -> exact)
        y_tile = jnp.dot(tril_t, nm_bf, preferred_element_type=jnp.float32)  # (TH, W)

        if single_tile:
            nm_t_f32 = nm_f32
        else:
            nm_t_f32 = nm_ref[0, pl.ds(row_off, TH), :]
        nm_t_bf = nm_t_f32.astype(jnp.bfloat16)
        # cumsum over W for this row-tile
        x_tile = jnp.dot(nm_t_bf, triu_w, preferred_element_type=jnp.float32)  # (TH, W)

        if normalize:
            y_tot = jnp.sum(nm_f32, axis=0, keepdims=True)     # (1, W)  == last-row cumsum
            x_tot = jnp.sum(nm_t_f32, axis=1, keepdims=True)   # (TH, 1) == last-col cumsum
            y_tile = y_tile / (y_tot + eps) * scale
            x_tile = x_tile / (x_tot + eps) * scale

        coef = params_ref[0][None, None, :]    # (1, 1, C): [1/dim_t, 1/dim_t]
        half = params_ref[1][None, None, :]    # (1, 1, C): 1.0 on y-half, 0.0 on x-half
        phase = params_ref[2][None, None, :]   # (1, 1, C): pi/2 on odd channels

        # 1 select + 1 mul + 1 add + 1 sin per output element (cos folded into phase).
        arg = jnp.where(half > 0.5, y_tile[:, :, None], x_tile[:, :, None]) * coef + phase
        out_ref[0] = jnp.sin(arg)

    return kernel


def position_embedding_sine(x, mask, num_pos_feats=64, temperature=10000,
                            normalize=False, scale=None, *, channels_last=False):
    """Pallas implementation of PositionEmbeddingSine.forward(x, mask)."""
    if scale is not None and normalize is False:
        raise ValueError("normalize should be True if scale is passed")
    if scale is None:
        scale = 2 * math.pi

    assert mask is not None
    B, H, W = mask.shape
    F = num_pos_feats
    C = 2 * F

    not_mask = (~mask).astype(jnp.float32)  # (B, H, W)

    # Per-channel parameters, merged into one (3, 2F) array (single tiny DMA).
    i = jnp.arange(F, dtype=jnp.float32)
    dim_t = jnp.asarray(temperature, jnp.float32) ** (2.0 * jnp.floor(i / 2.0) / F)
    inv_dim_t = (1.0 / dim_t).astype(jnp.float32)
    coef = jnp.concatenate([inv_dim_t, inv_dim_t])                              # (2F,)
    half = jnp.concatenate([jnp.ones((F,), jnp.float32),
                            jnp.zeros((F,), jnp.float32)])                      # (2F,)
    phase_half = (i % 2.0) * (math.pi / 2.0)       # even -> sin, odd -> cos == sin(+pi/2)
    phase = jnp.concatenate([phase_half, phase_half])                           # (2F,)
    params = jnp.stack([coef, half, phase], axis=0)                             # (3, 2F)

    TH = _choose_h_tile(H, W, C)
    n_h = H // TH

    out_nhwc = pl.pallas_call(
        _make_pos_embed_kernel(normalize, float(scale), H, W, C, TH),
        out_shape=jax.ShapeDtypeStruct((B, H, W, C), jnp.float32),
        grid_spec=pltpu.PrefetchScalarGridSpec(
            num_scalar_prefetch=0,
            grid=(B, n_h),
            in_specs=[
                pl.BlockSpec((1, H, W), lambda b, t: (b, 0, 0)),   # full nm, resident per b
                pl.BlockSpec((3, C), lambda b, t: (0, 0)),          # merged channel params
            ],
            out_specs=pl.BlockSpec((1, TH, W, C), lambda b, t: (b, t, 0, 0)),
        ),
        compiler_params=pltpu.CompilerParams(
            dimension_semantics=("parallel", "parallel"),
            vmem_limit_bytes=32 * 1024 * 1024,
        ),
    )(not_mask, params)

    if channels_last:
        return out_nhwc
    # TODO(synk): downstream consumers should prefer channels_last=True to avoid
    # this extra NHWC->NCHW HBM round trip (kept here to match torch's permute).
    return jnp.transpose(out_nhwc, (0, 3, 1, 2))


def _reference_jax(x, mask, num_pos_feats=64, temperature=10000,
                   normalize=False, scale=None):
    """Pure-JAX transcription of the PyTorch forward for verification."""
    if scale is None:
        scale = 2 * math.pi
    not_mask = (~mask).astype(jnp.float32)
    y_embed = jnp.cumsum(not_mask, axis=1, dtype=jnp.float32)
    x_embed = jnp.cumsum(not_mask, axis=2, dtype=jnp.float32)
    if normalize:
        eps = 1e-6
        y_embed = y_embed / (y_embed[:, -1:, :] + eps) * scale
        x_embed = x_embed / (x_embed[:, :, -1:] + eps) * scale
    dim_t = jnp.arange(num_pos_feats, dtype=jnp.float32)
    dim_t = jnp.asarray(temperature, jnp.float32) ** (2 * jnp.floor(dim_t / 2) / num_pos_feats)
    pos_x = x_embed[:, :, :, None] / dim_t
    pos_y = y_embed[:, :, :, None] / dim_t
    pos_x = jnp.stack((jnp.sin(pos_x[:, :, :, 0::2]),
                       jnp.cos(pos_x[:, :, :, 1::2])), axis=4).reshape(*pos_x.shape[:3], -1)
    pos_y = jnp.stack((jnp.sin(pos_y[:, :, :, 0::2]),
                       jnp.cos(pos_y[:, :, :, 1::2])), axis=4).reshape(*pos_y.shape[:3], -1)
    pos = jnp.concatenate((pos_y, pos_x), axis=3).transpose(0, 3, 1, 2)
    return pos


if __name__ == "__main__":
    key = jax.random.PRNGKey(0)
    kx, km = jax.random.split(key)

    B, Cin, H, W = 2, 4, 16, 16
    num_pos_feats = 64

    # x only supplies shape/device context in the original module.
    x = jax.random.normal(kx, (B, Cin, H, W), dtype=jnp.float32)
    # Padding-style mask: random fraction of positions masked out.
    mask = jax.random.bernoulli(km, 0.2, (B, H, W))

    # Default path (normalize=False), NCHW output to match torch.
    pos = position_embedding_sine(x, mask, num_pos_feats=num_pos_feats,
                                  temperature=10000, normalize=False, scale=None)
    pos = jax.block_until_ready(pos)
    ref = _reference_jax(x, mask, num_pos_feats=num_pos_feats,
                         temperature=10000, normalize=False, scale=None)
    assert pos.shape == (B, 2 * num_pos_feats, H, W), pos.shape
    np.testing.assert_allclose(np.asarray(pos), np.asarray(ref), atol=1e-4, rtol=1e-4)

    # normalize=True branch (exercises in-kernel normalization reductions).
    pos_n = position_embedding_sine(x, mask, num_pos_feats=num_pos_feats,
                                    temperature=10000, normalize=True, scale=None)
    pos_n = jax.block_until_ready(pos_n)
    ref_n = _reference_jax(x, mask, num_pos_feats=num_pos_feats,
                           temperature=10000, normalize=True, scale=None)
    np.testing.assert_allclose(np.asarray(pos_n), np.asarray(ref_n), atol=1e-4, rtol=1e-4)

    print("KERNEL_OK")
</pallas_src>

<mosaic_0001>
module attributes {stable_mosaic.version = 11 : i64} {
  func.func @kernel(%arg0: i32, %arg1: i32, %arg2: memref<1x16x16xf32, #tpu.memory_space<vmem>>, %arg3: memref<3x128xf32, #tpu.memory_space<vmem>>, %arg4: memref<1x16x16x128xf32, #tpu.memory_space<vmem>>) attributes {dimension_semantics = [#tpu.dimension_semantics<parallel>, #tpu.dimension_semantics<parallel>], iteration_bounds = array<i64: 2, 1>, scalar_prefetch = 0 : i64, scratch_operands = 0 : i64, tpu.core_type = #tpu.core_type<tc>, window_params = [{transform_indices = @transform_0, window_bounds = array<i64: 1, 16, 16>}, {pipeline_mode = #tpu.pipeline_mode<synchronous>, transform_indices = @transform_1, window_bounds = array<i64: 3, 128>}, {transform_indices = @transform_2, window_bounds = array<i64: 1, 16, 16, 128>}]} {
    %c16_i32 = arith.constant 16 : i32
    %0 = arith.muli %arg1, %c16_i32 : i32
    %1 = tpu.assume_multiple %0, 16 : i32
    %c0 = arith.constant 0 : index
    %c0_0 = arith.constant 0 : index
    %c0_1 = arith.constant 0 : index
    %2 = vector.load %arg2[%c0, %c0_0, %c0_1] : memref<1x16x16xf32, #tpu.memory_space<vmem>>, vector<1x16x16xf32>
    %3 = vector.shape_cast %2 : vector<1x16x16xf32> to vector<16x16xf32>
    %4 = arith.truncf %3 : vector<16x16xf32> to vector<16x16xbf16>
    %5 = tpu.iota {dimensions = array<i32: 0>} : vector<16x16xi32>
    %6 = vector.broadcast %1 : i32 to vector<16x16xi32>
    %7 = arith.addi %5, %6 : vector<16x16xi32>
    %8 = tpu.iota {dimensions = array<i32: 1>} : vector<16x16xi32>
    %9 = arith.cmpi sge, %7, %8 : vector<16x16xi32>
    %10 = arith.extui %9 : vector<16x16xi1> to vector<16x16xi32>
    %11 = arith.sitofp %10 : vector<16x16xi32> to vector<16x16xf32>
    %12 = arith.truncf %11 : vector<16x16xf32> to vector<16x16xbf16>
    %13 = tpu.iota {dimensions = array<i32: 0>} : vector<16x16xi32>
    %14 = tpu.iota {dimensions = array<i32: 1>} : vector<16x16xi32>
    %15 = arith.cmpi sle, %13, %14 : vector<16x16xi32>
    %16 = arith.extui %15 : vector<16x16xi1> to vector<16x16xi32>
    %17 = arith.sitofp %16 : vector<16x16xi32> to vector<16x16xf32>
    %18 = arith.truncf %17 : vector<16x16xf32> to vector<16x16xbf16>
    %cst = arith.constant dense<0.000000e+00> : vector<16x16xf32>
    %19 = tpu.matmul %12, %4, %cst {dimension_numbers = #tpu.dot_dimension_numbers<[1], [0], [0], [1], [0, 0, 1, 1], [], []>} : vector<16x16xbf16>, vector<16x16xbf16>, vector<16x16xf32> -> vector<16x16xf32>
    %20 = arith.truncf %3 : vector<16x16xf32> to vector<16x16xbf16>
    %cst_2 = arith.constant dense<0.000000e+00> : vector<16x16xf32>
    %21 = tpu.matmul %20, %18, %cst_2 {dimension_numbers = #tpu.dot_dimension_numbers<[1], [0], [0], [1], [0, 0, 1, 1], [], []>} : vector<16x16xbf16>, vector<16x16xbf16>, vector<16x16xf32> -> vector<16x16xf32>
    %c0_3 = arith.constant 0 : index
    %c0_4 = arith.constant 0 : index
    %22 = vector.load %arg3[%c0_3, %c0_4] : memref<3x128xf32, #tpu.memory_space<vmem>>, vector<1x128xf32>
    %23 = vector.shape_cast %22 : vector<1x128xf32> to vector<128xf32>
    %24 = vector.shape_cast %23 : vector<128xf32> to vector<1x1x128xf32>
    %c1 = arith.constant 1 : index
    %c0_5 = arith.constant 0 : index
    %25 = vector.load %arg3[%c1, %c0_5] : memref<3x128xf32, #tpu.memory_space<vmem>>, vector<1x128xf32>
    %26 = vector.shape_cast %25 : vector<1x128xf32> to vector<128xf32>
    %27 = vector.shape_cast %26 : vector<128xf32> to vector<1x1x128xf32>
    %c2 = arith.constant 2 : index
    %c0_6 = arith.constant 0 : index
    %28 = vector.load %arg3[%c2, %c0_6] : memref<3x128xf32, #tpu.memory_space<vmem>>, vector<1x128xf32>
    %29 = vector.shape_cast %28 : vector<1x128xf32> to vector<128xf32>
    %30 = vector.shape_cast %29 : vector<128xf32> to vector<1x1x128xf32>
    %cst_7 = arith.constant 5.000000e-01 : f32
    %31 = vector.broadcast %cst_7 : f32 to vector<1x1x128xf32>
    %32 = arith.cmpf ogt, %27, %31 : vector<1x1x128xf32>
    %33 = vector.shape_cast %19 : vector<16x16xf32> to vector<16x16x1xf32>
    %34 = vector.shape_cast %21 : vector<16x16xf32> to vector<16x16x1xf32>
    %35 = vector.shape_cast %32 : vector<1x1x128xi1> to vector<1x1x128xi1>
    %36 = vector.broadcast %35 : vector<1x1x128xi1> to vector<16x16x128xi1>
    %37 = vector.shape_cast %33 : vector<16x16x1xf32> to vector<16x16x1xf32>
    %38 = vector.broadcast %37 : vector<16x16x1xf32> to vector<16x16x128xf32>
    %39 = vector.shape_cast %34 : vector<16x16x1xf32> to vector<16x16x1xf32>
    %40 = vector.broadcast %39 : vector<16x16x1xf32> to vector<16x16x128xf32>
    %41 = arith.select %36, %38, %40 : vector<16x16x128xi1>, vector<16x16x128xf32>
    %42 = vector.broadcast %24 : vector<1x1x128xf32> to vector<16x16x128xf32>
    %43 = arith.mulf %41, %42 : vector<16x16x128xf32>
    %44 = vector.broadcast %30 : vector<1x1x128xf32> to vector<16x16x128xf32>
    %45 = arith.addf %43, %44 : vector<16x16x128xf32>
    %46 = math.sin %45 : vector<16x16x128xf32>
    %c0_8 = arith.constant 0 : index
    %c0_9 = arith.constant 0 : index
    %c0_10 = arith.constant 0 : index
    %c0_11 = arith.constant 0 : index
    %47 = vector.load %arg4[%c0_8, %c0_9, %c0_10, %c0_11] : memref<1x16x16x128xf32, #tpu.memory_space<vmem>>, vector<1x16x16x128xf32>
    %48 = vector.shape_cast %47 : vector<1x16x16x128xf32> to vector<16x16x128xf32>
    %49 = vector.shape_cast %46 : vector<16x16x128xf32> to vector<1x16x16x128xf32>
    tpu.vector_store %arg4[%c0_8, %c0_9, %c0_10, %c0_11], %49 {strides = array<i32>} : memref<1x16x16x128xf32, #tpu.memory_space<vmem>>, vector<1x16x16x128xf32>,
    return
  }
  func.func @transform_0(%arg0: i32, %arg1: i32) -> (i32, i32, i32) {
    %c0_i32 = arith.constant 0 : i32
    %c0_i32_0 = arith.constant 0 : i32
    %c0_i32_1 = arith.constant 0 : i32
    return %arg0, %c0_i32, %c0_i32_0 : i32, i32, i32
  }
  func.func @transform_1(%arg0: i32, %arg1: i32) -> (i32, i32) {
    %c0_i32 = arith.constant 0 : i32
    %c0_i32_0 = arith.constant 0 : i32
    %c0_i32_1 = arith.constant 0 : i32
    return %c0_i32, %c0_i32_0 : i32, i32
  }
  func.func @transform_2(%arg0: i32, %arg1: i32) -> (i32, i32, i32, i32) {
    %c0_i32 = arith.constant 0 : i32
    %c0_i32_0 = arith.constant 0 : i32
    %c0_i32_1 = arith.constant 0 : i32
    return %arg0, %arg1, %c0_i32, %c0_i32_0 : i32, i32, i32, i32
  }
}

</mosaic_0001>

<bundles_post_ra>
// kernel: tpu_custom_call.1
= control target key start
LH: loop header
LB: loop body
LE: loop exit
PB: predicated region body
PF: predicated region fallthrough
CT: control target
= control target key end

     0   :  { %7 = vsyncpa [#allocation3], 0  ;;  %s8080_s0 = inlined_call_operand.hbm [shape: f32[2,16,16], index: 0, kind: input, shape index: {}]   ;;  %s8081_s1 = inlined_call_operand.hbm [shape: f32[3,128], index: 1, kind: input, shape index: {}]   ;;  %s8082_s2 = inlined_call_operand.hbm [shape: f32[2,16,16,128], index: 2, kind: output, shape index: {}]  }
   0x1   :  { %9 = vsyncpa [#allocation3 + $0x1], 0 }
   0x2   :  { %10 = vsyncpa [#allocation6], 0 }
   0x3   :  { %11 = vsyncpa [#allocation4], 0 }
   0x4   :  { %13 = vsyncpa [#allocation4 + $0x1], 0  ;;  %s4947_s9 = smov 0   ;;  %s4949_s10 = smov 0  }
   0x5   :  { %s4951_s11 = smov 0   ;;  %s4953_s12 = smov 0  }
   0x6   :  { %s4955_s13 = smov 0   ;;  %s4957_s14 = smov 0  }
   0x7 LB: > { %s4243_s15 = sadd.s32 4294967295, %s4913_s14   ;;  %s4244_s16 = sadd.s32 4294967294, %s4913_s14   ;;  %s4913_s14 = sphi %s4957_s14, %s19_s14   ;;  %s4909_s13 = sphi %s4955_s13, %s8172_s13   ;;  %s4905_s12 = sphi %s4953_s12, %s8171_s12   ;;  %s4901_s11 = sphi %s4951_s11, %s8170_s11   ;;  %s4897_s10 = sphi %s4949_s10, %s8169_s10   ;;  %s4893_s9 = sphi %s4947_s9, %s8168_s9  }
   0x8   : > { %s38_s17 = sadd.s32 1, %s4901_s11  ;;  %p45_p0 = scmp.ne.s32.totalorder %s4901_s11, %s4897_s10 }
   0x9   : > { %p46_p1 = scmp.eq.s32.totalorder %s4913_s14, 0  ;;  %p51_p2 = scmp.ne.s32.totalorder %s4897_s10, %s4893_s9 }
   0xa   : > { %p4985_p3 = scmp.eq.s32.totalorder %s4243_s15, 0  ;;  %p98_p4 = scmp.eq.s32.totalorder %s4243_s15, 1 }
   0xb   : > { %p4989_p5 = por %p46_p1, %p45_p0  ;;  %p104_p6 = scmp.eq.s32.totalorder %s4244_s16, 1 }
   0xc   : > { %s8089_s18 = scalar_select %p4985_p3, 1, 0 }
   0xd   : > { %p4995_p7 = por %p4985_p3, %p51_p2  ;;  %p4999_p8 = por %p98_p4, %p45_p0 }
   0xe   : > { %p5003_p9 = por %p104_p6, %p51_p2  ;;  %p4245_p10 = scmp.ge.s32.totalorder %s4913_s14, 1 }
   0xf   : > { %s8091_s20 = scalar_select %p4995_p7, 1, 0 }
  0x10   : > { %s8092_s21 = scalar_select %p4999_p8, 1, 0 }
  0x11   : > { %s8093_s22 = scalar_select %p5003_p9, 1, 0 }
  0x12   : > { %p111_p11 = scmp.lt.s32.totalorder %s4913_s14, 3  ;;  %s4915_s24 = smov [#allocation5]  }
  0x13   : > { %s124_s25 = sshll.u32 %s4915_s24, 4  ;;  %p4565_p1 = scmp.lt.s32.totalorder %s4913_s14, 2  ;;  %s125_s25 = int_to_ptr.vmem [resolvable:$true] %s124_s25 }
  0x14   : > { %p5010_p13 = pnand %p4245_p10, %p111_p11  ;;  %s31_s28 = sadd.s32 1, %s4909_s13 }
  0x15   : > { %p5019_p4 = pnand %p4565_p1, %p4989_p5  ;;  %p5030_p6 = scmp.ge.s32.totalorder %s31_s28, 2 }
  0x16   : > { %s8094_s23 = scalar_select %p5010_p13, 1, 0 }
  0x17   : > { %p4552_p0 = pneg %p5010_p13  ;;  %s135_s30 = sand.u32 1, %s4901_s11  }
  0x18   : > { %s8095_s26 = scalar_select %p5019_p4, 1, 0 }
  0x19   : > { %p5025_p2 = pnand %p4552_p0, %p4985_p3  ;;  %s4769_s5 = scalar_lea.hbm %s8081_s1, 64 }
  0x1a   : > { %s8097_s29 = scalar_select %p5030_p6, 1, 0 }
  0x1b   : > { %p4770_p5 = scmp.ne.s32.totalorder %s8081_s1, %s4769_s5  ;;  %p4771_p10 = pneg %p5025_p2 }
  0x1c   : > { %p4776_p0 = scmp.lt.u32.totalorder %s4769_s5, %s8081_s1 }
  0x1d   : > { %p4772_p11 = pnand %p4771_p10, %p4770_p5 }
  0x1f   : > { %p4773_p1 = pneg %p4772_p11 }
  0x21   : > { %p4778_p12 = pnand %p4776_p0, %p4773_p1 }
  0x23   : > { %4781 = shalt.err (!%p4778_p12)
}
  0x24   : > { %s4782_s16 = scalar_lea.vmem %s125_s25, 64  ;;  %p4790_p7 = scmp.lt.s32.totalorder %s125_s25, %s125_s25 }
  0x25   : > { %p4783_p9 = scmp.ne.s32.totalorder %s125_s25, %s4782_s16  ;;  %p4791_p13 = scmp.lt.s32.totalorder %s4782_s16, %s4782_s16 }
  0x27   : > { %p4785_p8 = pnand %p4783_p9, %p4771_p10  ;;  %p4792_p4 = por %p4791_p13, %p4790_p7 }
  0x29   : > { %p4786_p3 = pneg %p4785_p8 }
  0x2b   : > { %p4793_p6 = pnand %p4792_p4, %p4786_p3 }
  0x2d   : > { %4796 = shalt.err (!%p4793_p6)
}
  0x2e   : > { %4555 = dma.hbm_to_vmem [thread:$0]  (!%p5025_p2), %s8081_s1, 64, %s125_s25, [#allocation6]  }
  0x2f   : > { %p8098_p9 = scmp.ne.s32.totalorder %s8097_s29, 0  ;;  %s4248_s3 = sshll.u32 %s135_s30, 4 }
  0x30   : > { %s4398_s5 = sshll.u32 %s4909_s13, 8  ;;  %s139_s8 = scalar_lea.vmem [#allocation2], %s4248_s3 }
  0x31   : > { %s8174_s28 = smov (%p8098_p9, %s31_s28), 0  ;;  %s5061_s7 = scalar_lea.hbm %s8080_s0, %s4398_s5 }
  0x32   : > { %s35_s4 = ssub.s32 %s4909_s13, %s8174_s28  ;;  %s146_s15 = sshll.u32 %s139_s8, 4  ;;  %s5068_s15 = int_to_ptr.vmem [resolvable:$true] %s146_s15 }
  0x33   : > { %p36_p3 = scmp.eq.s32.totalorder %s35_s4, 0  ;;  %s5070_s29 = scalar_lea.sflag [#allocation3], %s135_s30 }
  0x34   : > { %s4797_s16 = scalar_lea.hbm %s5061_s7, 256  ;;  %p8099_p8 = scmp.ne.s32.totalorder %s8095_s26, 0 }
  0x35   : > { %s5066_s25 = scalar_select %p36_p3, %s4901_s11, %s38_s17  }
  0x36   : > { %p4798_p7 = scmp.ne.s32.totalorder %s5061_s7, %s4797_s16  ;;  %p4799_p12 = pneg %p8099_p8 }
  0x37   : > { %s4802_s3 = scalar_lea.hbm %s8080_s0, 512  ;;  %p4803_p2 = scmp.lt.u32.totalorder %s5061_s7, %s8080_s0 }
  0x38   : > { %p4800_p13 = pnand %p4799_p12, %p4798_p7  ;;  %p4804_p6 = scmp.lt.u32.totalorder %s4802_s3, %s4797_s16 }
  0x39   : > { %p4806_p10 = scmp.lt.u32.totalorder %s4797_s16, %s5061_s7 }
  0x3a   : > { %p4801_p4 = pneg %p4800_p13  ;;  %p4805_p5 = por %p4804_p6, %p4803_p2 }
  0x3c   : > { %p4807_p11 = por %p4806_p10, %p4805_p5 }
  0x3e   : > { %p4808_p1 = pnand %p4807_p11, %p4801_p4 }
  0x40   : > { %4811 = shalt.err (!%p4808_p1)
}
  0x41   : > { %s4812_s17 = scalar_lea.vmem %s5068_s15, 256  ;;  %s4916_s30 = smov [#allocation2]  }
  0x42   : > { %p4813_p0 = scmp.ne.s32.totalorder %s5068_s15, %s4812_s17  ;;  %s4817_s27 = sshll.u32 %s4916_s30, 4  ;;  %s4818_s27 = int_to_ptr.vmem [resolvable:$false] %s4817_s27 }
  0x43   : > { %s4819_s6 = scalar_lea.vmem %s4818_s27, 512  ;;  %p4820_p7 = scmp.lt.s32.totalorder %s5068_s15, %s4818_s27 }
  0x44   : > { %p4815_p9 = pnand %p4813_p0, %p4799_p12  ;;  %p4821_p13 = scmp.lt.s32.totalorder %s4819_s6, %s4812_s17 }
  0x46   : > { %p4816_p3 = pneg %p4815_p9  ;;  %p4822_p2 = por %p4821_p13, %p4820_p7 }
  0x48   : > { %p4823_p6 = pnand %p4822_p2, %p4816_p3 }
  0x4a   : > { %4826 = shalt.err (!%p4823_p6)
}
  0x4b   : > { %s4917_s8 = smov 128   ;;  %s4918_s16 = smov 8  }
  0x4c   : > { %4559 = dma.hbm_to_vmem [thread:$0]  (!%p8099_p8), %s5061_s7, 256, %s5068_s15, %s5070_s29, %s4917_s8, %s4917_s8, %s4918_s16  }
  0x4d   : > { %p8100_p12 = scmp.ne.s32.totalorder %s8094_s23, 0 }
  0x4e   : > { %s5101_s19 = sand.u32 (!%p8100_p12), 1, %s4897_s10   ;;  %p8101_p4 = scmp.ne.s32.totalorder (!%p8100_p12), %s8091_s20, 0 }
  0x4f   : > { %158 = sbr.rel (%p8100_p12) target bundleno = 1324 (0x52c), region = 28  ;;  %s4252_s24 = sshll.u32 (!%p8100_p12), %s5101_s19, 4 }
  0x50   : > { %s161_s3 = scalar_lea.sflag (!%p8100_p12), [#allocation3], %s5101_s19  ;;  %s164_s4 = scalar_lea.vmem (!%p8100_p12), [#allocation2], %s4252_s24 }
  0x56   : > { %4880 = dma.done.wait (%p8101_p4), %s161_s3, 256  }
  0x57   : > { %4882 = vsyncadd (%p8101_p4), %s161_s3, 4294967040  ;;  %p8102_p5 = scmp.ne.s32.totalorder %s8089_s18, 0 }
  0x59   : > { %4884 = dma.done.wait (%p8102_p5), [#allocation6], 64  }
  0x5a   : > { %4886 = vsyncadd (%p8102_p5), [#allocation6], 4294967232  ;;  %v195_v0 = vlaneseq  ;;  %v4919_v1 = vmov 0.0   ;;  %vm4920_vm0 = vmmov 0   ;;  %v192_v7 = vld [vmem:[%s164_s4] sm:$0xff]  ;;  %v193_v8 = vld [vmem:[%s164_s4 + $0x8] sm:$0xff] }
  0x5b   : > { %4410 = vmatprep.subr.bf16.mxu1 %v4919_v1  ;;  %4412 = vmatprep.mubr.msk.bf16.mxu1 %vm4920_vm0, %v4919_v1  ;;  %v4921_v9 = vmov 1.0|1.0   ;;  %v194_v10 = vpack.c.bf16 %v193_v8, %v192_v7  ;;  %vm217_vm6 = vcmask 130048   ;;  %s4254_s18 = sshll.u32 %s5101_s19, 8  ;;  %s4399_s23 = sshll.u32 %s4905_s12, 12 }
  0x5c   : > { %v196_v2 = vshrl.u32 %v195_v0, 7  ;;  %v202_v3 = vand.u32 127, %v195_v0  ;;  %4404 = vmatprep.subr.bf16.mxu0 %v4919_v1  ;;  %4406 = vmatprep.mubr.msk.bf16.mxu0 %vm4920_vm0, %v4919_v1  ;;  %s5525_s20 = scalar_lea.vmem [#allocation7], %s4254_s18  ;;  %s8027_s29 = scalar_lea.hbm %s8082_s2, %s4399_s23 }
  0x5d   : > { %4405 = vmatpush3.bf16.msra.mxu0 %v194_v10  ;;  %s4149_s26 = sshll.u32 %s5525_s20, 4  ;;  %s4133_s12 = scalar_lea.sflag [#allocation4], %s5101_s19  ;;  %s8029_s26 = int_to_ptr.vmem [resolvable:$true] %s4149_s26 }
  0x5e   : > { %v197_v4 = vadd.s32 8, %v196_v2  ;;  %vm210_vm1 = vcmp.le.s32.totalorder %v196_v2, %v202_v3  ;;  %vm203_vm2 = vcmp.ge.s32.totalorder %v196_v2, %v202_v3  ;;  %v5113_v12 = vsub.s32 0, %v196_v2  ;;  %s4827_s5 = scalar_lea.vmem %s8029_s26, 4096  ;;  %p8165_p10 = scmp.ne.s32.totalorder %s8092_s21, 0 }
  0x5f   : > { %v4255_v5 = vsel %vm203_vm2, 1.0, %v4919_v1  ;;  %v323_v16 = vsub.s32 1, %v196_v2  ;;  %v334_v20 = vsub.s32 2, %v196_v2  ;;  %v345_v22 = vsub.s32 3, %v196_v2  ;;  %p4828_p8 = scmp.ne.s32.totalorder %s8029_s26, %s4827_s5  ;;  %s4929_s17 = smov [#allocation7]  }
  0x60   : > { %vm204_vm3 = vcmp.ge.s32.totalorder %v197_v4, %v202_v3  ;;  %vm211_vm4 = vcmp.le.s32.totalorder %v197_v4, %v202_v3  ;;  %v356_v23 = vsub.s32 4, %v196_v2  ;;  %v367_v24 = vsub.s32 5, %v196_v2  ;;  %s4831_s30 = sshll.u32 %s4929_s17, 4  ;;  %s4832_s30 = int_to_ptr.vmem [resolvable:$false] %s4831_s30 }
  0x61   : > { %v4256_v6 = vsel %vm204_vm3, 1.0, %v4919_v1  ;;  %vm4260_vm5 = vmpackc.low %vm211_vm4, %vm210_vm1  ;;  %v378_v25 = vsub.s32 6, %v196_v2  ;;  %v389_v35 = vsub.s32 7, %v196_v2  ;;  %p4829_p11 = pnand %p4828_p8, %p8165_p10  ;;  %s4833_s27 = scalar_lea.vmem %s4832_s30, 8192 }
  0x62   : > { %4411 = vmatpush3.bf16.msk.msra.mxu1 %vm4260_vm5, %v4921_v9  ;;  %v209_v11 = vpack.c.bf16 %v4256_v6, %v4255_v5  ;;  %v307_v6 = vld [vmem:[#allocation5 + $0x1] sm:$0x1]  ;;  %v4922_v9 = vmov 0   ;;  %p4834_p0 = scmp.lt.s32.totalorder %s8029_s26, %s4832_s30  ;;  %p4835_p9 = scmp.lt.s32.totalorder %s4833_s27, %s4827_s5 }
  0x63   : > { %vm309_vm7 = vcmp.gt.f32.partialorder %v307_v6, 0.5  ;;  %p4830_p1 = pneg %p4829_p11 }
  0x64   : > { %4407 = vmatmul.mubr.msk.bf16.vlgmr.msra.gmra.mrb[0].mxu0 %vm217_vm6, %v209_v11  ;;  %p4836_p3 = por %p4835_p9, %p4834_p0 }
  0x65   : > { %4413 = vmatmul.mubr.msk.bf16.vlgmr.msra.gmra.mrb[0].mxu1 %vm217_vm6, %v194_v10  ;;  %v662_v10 = vsel %vm309_vm7, 1, %v4922_v9  ;;  %v4925_v9 = vmov 2131351028  }
  0x66   : > { %p4837_p7 = pnand %p4836_p3, %p4830_p1 }
 0x137   : > { %v5118_v18 = vpop.f32.mrb[0].mxu0 }
 0x138   : > { %v299_v13 = vpop.f32.mrb[0].mxu1  ;;  %v4408_v21 = vpop.f32.mrb[1].mxu0  ;;  %v324_v50 = vrot.slane %v5118_v18, %v323_v16  ;;  %v313_v51 = vrot.slane %v5118_v18, %v5113_v12  ;;  %v335_v52 = vrot.slane %v5118_v18, %v334_v20  ;;  %v346_v53 = vrot.slane %v5118_v18, %v345_v22 }
 0x139   : > { %v4414_v14 = vpop.f32.mrb[1].mxu1  ;;  %v489_v15 = vrot.slane %v299_v13, %v5113_v12  ;;  %v5120_v26 = vpop.f32.mrb[2].mxu0  ;;  %v500_v27 = vrot.slane %v299_v13, %v323_v16  ;;  %v511_v42 = vrot.slane %v299_v13, %v334_v20  ;;  %v522_v45 = vrot.slane %v299_v13, %v345_v22  ;;  %v5234_v21 = vld [vmem:[#allocation5 + $0x2] ss:$0 sm:$0xff] }
 0x13a   : > { %v5116_v17 = vpop.f32.mrb[2].mxu1  ;;  %v4409_v28 = vpop.f32.mrb[3].mxu0  ;;  %v5139_v36 = vrot.slane %v5120_v26, %v323_v16  ;;  %v5142_v37 = vrot.slane %v5120_v26, %v334_v20  ;;  %v5145_v38 = vrot.slane %v5120_v26, %v345_v22  ;;  %v5148_v39 = vrot.slane %v5120_v26, %v356_v23 }
 0x13b   : > { %495 = vbcast.lane.b32.xlu1 %v489_v15, 264  ;;  %491 = vbcast.lane.b32.xlu0 %v489_v15, 256  ;;  %v4415_v19 = vpop.f32.mrb[3].mxu1  ;;  %v588_v29 = vrot.slane %v5116_v17, %v323_v16  ;;  %v5124_v30 = vrot.slane %v5116_v17, %v334_v20  ;;  %v5127_v31 = vrot.slane %v5116_v17, %v345_v22 }
 0x13c   : > { %v5130_v32 = vrot.slane %v5116_v17, %v356_v23  ;;  %v5133_v33 = vrot.slane %v5116_v17, %v367_v24  ;;  %v5136_v34 = vrot.slane %v5116_v17, %v378_v25  ;;  %v5151_v40 = vrot.slane %v5120_v26, %v367_v24 }
 0x13d   : > { %v5154_v41 = vrot.slane %v5120_v26, %v378_v25  ;;  %v5157_v43 = vrot.slane %v5120_v26, %v389_v35  ;;  %v5160_v44 = vrot.slane %v5116_v17, %v389_v35  ;;  %v533_v46 = vrot.slane %v299_v13, %v356_v23 }
 0x13e   : > { %v544_v47 = vrot.slane %v299_v13, %v367_v24  ;;  %v555_v48 = vrot.slane %v299_v13, %v378_v25  ;;  %v566_v49 = vrot.slane %v299_v13, %v389_v35  ;;  %v357_v54 = vrot.slane %v5118_v18, %v356_v23 }
 0x13f   : > { %506 = vbcast.lane.b32.xlu1 %v500_v27, 264  ;;  %502 = vbcast.lane.b32.xlu0 %v500_v27, 256  ;;  %v368_v55 = vrot.slane %v5118_v18, %v367_v24  ;;  %v379_v56 = vrot.slane %v5118_v18, %v378_v25  ;;  %v390_v57 = vrot.slane %v5118_v18, %v389_v35  ;;  %v5232_v18 = vld [vmem:[#allocation5] ss:$0 sm:$0xff] }
 0x140   : > { %v577_v58 = vrot.slane %v5116_v17, %v5113_v12  ;;  %v401_v59 = vrot.slane %v5120_v26, %v5113_v12  ;;  %v666_v14 = vrot.slane %v662_v10, %v5113_v12 }
 0x142   : > { %vm5228_vm8 = vcmp.eq.s32.totalorder %v666_v14, 1  ;;  %v4926_v14 = vmov 2102212464  }
 0x143   : > { %517 = vbcast.lane.b32.xlu1 %v511_v42, 264  ;;  %513 = vbcast.lane.b32.xlu0 %v511_v42, 256 }
 0x147   : > { %528 = vbcast.lane.b32.xlu1 %v522_v45, 264  ;;  %524 = vbcast.lane.b32.xlu0 %v522_v45, 256 }
 0x14b   : > { %539 = vbcast.lane.b32.xlu1 %v533_v46, 264  ;;  %535 = vbcast.lane.b32.xlu0 %v533_v46, 256 }
 0x14f   : > { %550 = vbcast.lane.b32.xlu1 %v544_v47, 264  ;;  %546 = vbcast.lane.b32.xlu0 %v544_v47, 256 }
 0x153   : > { %561 = vbcast.lane.b32.xlu1 %v555_v48, 264  ;;  %557 = vbcast.lane.b32.xlu0 %v555_v48, 256 }
 0x157   : > { %572 = vbcast.lane.b32.xlu1 %v566_v49, 264  ;;  %568 = vbcast.lane.b32.xlu0 %v566_v49, 256 }
 0x15b   : > { %326 = vbcast.lane.b32.xlu1 %v324_v50, 256  ;;  %315 = vbcast.lane.b32.xlu0 %v313_v51, 256 }
 0x15f   : > { %330 = vbcast.lane.b32.xlu1 %v324_v50, 264  ;;  %319 = vbcast.lane.b32.xlu0 %v313_v51, 264 }
 0x163   : > { %341 = vbcast.lane.b32.xlu1 %v335_v52, 264  ;;  %337 = vbcast.lane.b32.xlu0 %v335_v52, 256 }
 0x167   : > { %352 = vbcast.lane.b32.xlu1 %v346_v53, 264  ;;  %348 = vbcast.lane.b32.xlu0 %v346_v53, 256 }
 0x16b   : > { %363 = vbcast.lane.b32.xlu1 %v357_v54, 264  ;;  %359 = vbcast.lane.b32.xlu0 %v357_v54, 256 }
 0x16f   : > { %374 = vbcast.lane.b32.xlu1 %v368_v55, 264  ;;  %370 = vbcast.lane.b32.xlu0 %v368_v55, 256 }
 0x173   : > { %385 = vbcast.lane.b32.xlu1 %v379_v56, 264  ;;  %381 = vbcast.lane.b32.xlu0 %v379_v56, 256 }
 0x177   : > { %396 = vbcast.lane.b32.xlu1 %v390_v57, 264  ;;  %392 = vbcast.lane.b32.xlu0 %v390_v57, 256 }
 0x17b   : > { %583 = vbcast.lane.b32.xlu1 %v577_v58, 264  ;;  %579 = vbcast.lane.b32.xlu0 %v577_v58, 256 }
 0x17f   : > { %594 = vbcast.lane.b32.xlu1 %v588_v29, 264  ;;  %590 = vbcast.lane.b32.xlu0 %v588_v29, 256 }
 0x183   : > { %605 = vbcast.lane.b32.xlu1 %v5124_v30, 264  ;;  %601 = vbcast.lane.b32.xlu0 %v5124_v30, 256 }
 0x187   : > { %616 = vbcast.lane.b32.xlu1 %v5127_v31, 264  ;;  %612 = vbcast.lane.b32.xlu0 %v5127_v31, 256 }
 0x18b   : > { %627 = vbcast.lane.b32.xlu1 %v5130_v32, 264  ;;  %623 = vbcast.lane.b32.xlu0 %v5130_v32, 256 }
 0x18f   : > { %638 = vbcast.lane.b32.xlu1 %v5133_v33, 264  ;;  %634 = vbcast.lane.b32.xlu0 %v5133_v33, 256 }
 0x193   : > { %649 = vbcast.lane.b32.xlu1 %v5136_v34, 264  ;;  %645 = vbcast.lane.b32.xlu0 %v5136_v34, 256 }
 0x197   : > { %407 = vbcast.lane.b32.xlu1 %v401_v59, 264  ;;  %403 = vbcast.lane.b32.xlu0 %v401_v59, 256  ;;  %v4923_v59 = vmov 683565275  }
 0x19b   : > { %418 = vbcast.lane.b32.xlu1 %v5139_v36, 264  ;;  %414 = vbcast.lane.b32.xlu0 %v5139_v36, 256 }
 0x19f   : > { %429 = vbcast.lane.b32.xlu1 %v5142_v37, 264  ;;  %425 = vbcast.lane.b32.xlu0 %v5142_v37, 256 }
 0x1a3   : > { %440 = vbcast.lane.b32.xlu1 %v5145_v38, 264  ;;  %436 = vbcast.lane.b32.xlu0 %v5145_v38, 256 }
 0x1a7   : > { %451 = vbcast.lane.b32.xlu1 %v5148_v39, 264  ;;  %447 = vbcast.lane.b32.xlu0 %v5148_v39, 256 }
 0x1ab   : > { %462 = vbcast.lane.b32.xlu1 %v5151_v40, 264  ;;  %458 = vbcast.lane.b32.xlu0 %v5151_v40, 256 }
 0x1ad   : > { %v5195_v60 = vpop.permute.xlu1 %495  ;;  %v492_v61 = vpop.permute.xlu0 %491 }
 0x1af   : > { %473 = vbcast.lane.b32.xlu1 %v5154_v41, 264  ;;  %469 = vbcast.lane.b32.xlu0 %v5154_v41, 256 }
 0x1b1   : > { %v507_v62 = vpop.permute.xlu1 %506  ;;  %v503_v63 = vpop.permute.xlu0 %502 }
 0x1b3   : > { %484 = vbcast.lane.b32.xlu1 %v5157_v43, 264  ;;  %480 = vbcast.lane.b32.xlu0 %v5157_v43, 256 }
 0x1b5   : > { %v5201_v0 = vpop.permute.xlu1 %517  ;;  %v5203_v1 = vpop.permute.xlu0 %513 }
 0x1b7   : > { %660 = vbcast.lane.b32.xlu1 %v5160_v44, 264  ;;  %656 = vbcast.lane.b32.xlu0 %v5160_v44, 256 }
 0x1b9   : > { %v5207_v2 = vpop.permute.xlu1 %528  ;;  %v5209_v3 = vpop.permute.xlu0 %524 }
 0x1bd   : > { %v5211_v4 = vpop.permute.xlu1 %539  ;;  %v5213_v5 = vpop.permute.xlu0 %535 }
 0x1c1   : > { %v5215_v7 = vpop.permute.xlu1 %550  ;;  %v5217_v8 = vpop.permute.xlu0 %546 }
 0x1c5   : > { %v5219_v11 = vpop.permute.xlu1 %561  ;;  %v5221_v13 = vpop.permute.xlu0 %557 }
 0x1c9   : > { %v5224_v15 = vpop.permute.xlu1 %572  ;;  %v5226_v16 = vpop.permute.xlu0 %568 }
 0x1cd   : > { %v327_v19 = vpop.permute.xlu1 %326  ;;  %v316_v20 = vpop.permute.xlu0 %315 }
 0x1ce   : > { %v670_v22 = vsel %vm5228_vm8, %v327_v19, %v503_v63  ;;  %v668_v12 = vsel %vm5228_vm8, %v316_v20, %v492_v61  ;;  %v4924_v63 = vmov 2475754826   ;;  %v4927_v20 = vmov 920167782  }
 0x1cf   : > { %v706_v23 = vmul.f32 %v5232_v18, %v670_v22  ;;  %v704_v24 = vmul.f32 %v5232_v18, %v668_v12 }
 0x1d1   : > { %v5243_v25 = vadd.f32 %v5234_v21, %v706_v23  ;;  %v5246_v26 = vadd.f32 %v5234_v21, %v704_v24  ;;  %v331_v27 = vpop.permute.xlu1 %330  ;;  %v320_v38 = vpop.permute.xlu0 %319 }
 0x1d2   : > { %v671_v28 = vsel %vm5228_vm8, %v331_v27, %v507_v62  ;;  %v669_v43 = vsel %vm5228_vm8, %v320_v38, %v5195_v60 }
 0x1d3   : > { %v980_v29 = vand.u32 2147483647, %v5243_v25  ;;  %v983_v30 = vand.u32 2139095040, %v5243_v25  ;;  %v772_v31 = vand.u32 2147483647, %v5246_v26  ;;  %v775_v32 = vand.u32 2139095040, %v5246_v26 }
 0x1d4   : > { %v707_v34 = vmul.f32 %v5232_v18, %v671_v28  ;;  %v5267_v53 = vmul.f32 %v5232_v18, %v669_v43  ;;  %vm982_vm6 = vcmp.lt.s32.totalorder %v5243_v25, 0  ;;  %vm774_vm7 = vcmp.lt.s32.totalorder %v5246_v26, 0 }
 0x1d5   : > { %v984_v33 = vshrl.u32 %v983_v30, 23  ;;  %v987_v35 = vand.u32 8388607, %v980_v29  ;;  %v776_v36 = vshrl.u32 %v775_v32, 23  ;;  %v779_v37 = vand.u32 8388607, %v772_v31 }
 0x1d6   : > { %v5260_v40 = vadd.f32 %v5234_v21, %v707_v34  ;;  %v4928_v30 = vmov 1326507024  }
 0x1d7   : > { %v4273_v39 = vadd.s32 4294967169, %v984_v33  ;;  %v4265_v41 = vadd.s32 4294967169, %v776_v36  ;;  %v988_v44 = vor.u32 8388608, %v987_v35  ;;  %v780_v45 = vor.u32 8388608, %v779_v37 }
 0x1d8   : > { %v1087_v47 = vand.u32 2139095040, %v5260_v40  ;;  %v1084_v57 = vand.u32 2147483647, %v5260_v40 }
 0x1d9   : > { %v990_v42 = vadd.s32 1, %v4273_v39  ;;  %v782_v46 = vadd.s32 1, %v4265_v41  ;;  %v5269_v54 = vshll.u32 %v988_v44, 8  ;;  %v5273_v56 = vshll.u32 %v780_v45, 8 }
 0x1da   : > { %v1088_v49 = vshrl.u32 %v1087_v47, 23 }
 0x1db   : > { %vm991_vm9 = vcmp.gt.s32.totalorder %v990_v42, 0  ;;  %vm783_vm10 = vcmp.gt.s32.totalorder %v782_v46, 0 }
 0x1dc   : > { %v992_v48 = vsel %vm991_vm9, %v990_v42, 0  ;;  %v784_v52 = vsel %vm783_vm10, %v782_v46, 0  ;;  %v5277_v62 = vadd.s32 4294967169, %v1088_v49 }
 0x1dd   : > { %v993_v50 = vshrl.u32 %v992_v48, 5  ;;  %v994_v51 = vand.u32 31, %v992_v48  ;;  %v5271_v55 = vshrl.u32 %v784_v52, 5  ;;  %v786_v61 = vand.u32 31, %v784_v52 }
 0x1df   : > { %v995_v58 = vsub.s32 32, %v994_v51  ;;  %v997_v60 = vshll.u32 %v4923_v59, %v994_v51  ;;  %v1000_v6 = vshll.u32 %v4924_v63, %v994_v51  ;;  %v1003_v10 = vshll.u32 %v4925_v9, %v994_v51 }
 0x1e0   : > { %v1006_v19 = vshll.u32 %v4926_v14, %v994_v51  ;;  %v1009_v22 = vshll.u32 %v4927_v20, %v994_v51  ;;  %vm1012_vm11 = vcmp.lt.s32.totalorder %v993_v50, 1  ;;  %vm1013_vm12 = vcmp.lt.s32.totalorder %v993_v50, 2 }
 0x1e1   : > { %v998_v12 = vshrl.u32 %v4924_v63, %v995_v58  ;;  %v1001_v23 = vshrl.u32 %v4925_v9, %v995_v58  ;;  %v1004_v24 = vshrl.u32 %v4926_v14, %v995_v58  ;;  %v996_v27 = vshrl.u32 %v4923_v59, %v995_v58 }
 0x1e2   : > { %v1007_v28 = vshrl.u32 %v4927_v20, %v995_v58  ;;  %v1010_v32 = vshrl.u32 %v4928_v30, %v995_v58  ;;  %v787_v36 = vsub.s32 32, %v786_v61  ;;  %vm1014_vm13 = vcmp.lt.s32.totalorder %v993_v50, 3 }
 0x1e3   : > { %v999_v33 = vor.u32 %v998_v12, %v997_v60  ;;  %v1002_v34 = vor.u32 %v1001_v23, %v1000_v6  ;;  %v1005_v35 = vor.u32 %v1004_v24, %v1003_v10  ;;  %vm1015_vm14 = vcmp.lt.s32.totalorder %v993_v50, 4 }
 0x1e4   : > { %v1008_v37 = vor.u32 %v1007_v28, %v1006_v19  ;;  %v1011_v38 = vor.u32 %v1010_v32, %v1009_v22  ;;  %v789_v47 = vshll.u32 %v4923_v59, %v786_v61  ;;  %v790_v51 = vshrl.u32 %v4924_v63, %v787_v36 }
 0x1e5   : > { %v1016_v39 = vsel %vm1012_vm11, %v996_v27, %v999_v33  ;;  %v1017_v41 = vsel %vm1015_vm14, %v1005_v35, 2102212464  ;;  %v1020_v42 = vsel %vm1012_vm11, %v999_v33, %v1002_v34  ;;  %v1024_v43 = vsel %vm1012_vm11, %v1002_v34, %v1005_v35 }
 0x1e6   : > { %v1018_v44 = vsel %vm1014_vm13, %v1002_v34, %v1017_v41  ;;  %v1021_v45 = vsel %vm1015_vm14, %v1008_v37, 920167782  ;;  %v1025_v46 = vsel %vm1015_vm14, %v1011_v38, 1326507024  ;;  %v792_v52 = vshll.u32 %v4924_v63, %v786_v61 }
 0x1e7   : > { %v1022_v48 = vsel %vm1014_vm13, %v1005_v35, %v1021_v45  ;;  %v1026_v49 = vsel %vm1014_vm13, %v1008_v37, %v1025_v46  ;;  %v1019_v58 = vsel %vm1013_vm12, %v1016_v39, %v1018_v44  ;;  %v793_v10 = vshrl.u32 %v4925_v9, %v787_v36 }
 0x1e8   : > { %v1023_v60 = vsel %vm1013_vm12, %v1020_v42, %v1022_v48  ;;  %v1027_v6 = vsel %vm1013_vm12, %v1024_v43, %v1026_v49  ;;  %v791_v24 = vor.u32 %v790_v51, %v789_v47  ;;  %v795_v28 = vshll.u32 %v4925_v9, %v786_v61 }
 0x1e9   : > { %v5300_v19 = vmul.u32.u64.low %v5269_v54, %v1027_v6  ;;  %v5301_v22 = vmul.u32.u64.high %v5269_v54, %v1027_v6, %v5300_v19  ;;  %v5304_v12 = vmul.u32.u64.low %v5269_v54, %v1023_v60  ;;  %v5305_v23 = vmul.u32.u64.high %v5269_v54, %v1023_v60, %v5304_v12 }
 0x1ea   : > { %v794_v27 = vor.u32 %v793_v10, %v792_v52  ;;  %v796_v32 = vshrl.u32 %v4926_v14, %v787_v36  ;;  %v788_v33 = vshrl.u32 %v4923_v59, %v787_v36  ;;  %v798_v50 = vshll.u32 %v4926_v14, %v786_v61 }
 0x1eb   : > { %v799_v34 = vshrl.u32 %v4927_v20, %v787_v36  ;;  %v802_v35 = vshrl.u32 %v4928_v30, %v787_v36  ;;  %v1035_v37 = vmul.u32 %v5269_v54, %v1019_v58  ;;  %v801_v39 = vshll.u32 %v4927_v20, %v786_v61 }
 0x1ec   : > { %v797_v38 = vor.u32 %v796_v32, %v795_v28  ;;  %vm804_vm15 = vcmp.lt.s32.totalorder %v5271_v55, 1  ;;  %vm1037_vm0 = vc.u32 %v5301_v22, %v5304_v12  ;;  %v1038_v41 = vadd.s32 1, %v5305_v23  ;;  %v342_v32 = vpop.permute.xlu1 %341 }
 0x1ed   : > { %v800_v42 = vor.u32 %v799_v34, %v798_v50  ;;  %vm805_vm1 = vcmp.lt.s32.totalorder %v5271_v55, 2  ;;  %v803_v43 = vor.u32 %v802_v35, %v801_v39  ;;  %vm806_vm2 = vcmp.lt.s32.totalorder %v5271_v55, 3 }
 0x1ee   : > { %vm807_vm3 = vcmp.lt.s32.totalorder %v5271_v55, 4  ;;  %v812_v36 = vsel %vm804_vm15, %v791_v24, %v794_v27  ;;  %v1039_v54 = vsel %vm1037_vm0, %v1038_v41, %v5305_v23  ;;  %v816_v61 = vsel %vm804_vm15, %v794_v27, %v797_v38 }
 0x1ef   : > { %v809_v44 = vsel %vm807_vm3, %v797_v38, 2102212464  ;;  %v813_v45 = vsel %vm807_vm3, %v800_v42, 920167782  ;;  %v1040_v46 = vadd.s32 %v1039_v54, %v1035_v37  ;;  %v808_v47 = vsel %vm804_vm15, %v788_v33, %v791_v24 }
 0x1f0   : > { %v814_v48 = vsel %vm806_vm2, %v797_v38, %v813_v45  ;;  %v817_v49 = vsel %vm807_vm3, %v803_v43, 1326507024  ;;  %v810_v51 = vsel %vm806_vm2, %v794_v27, %v809_v44  ;;  %v1094_v60 = vadd.s32 1, %v5277_v62 }
 0x1f1   : > { %v815_v52 = vsel %vm805_vm1, %v812_v36, %v814_v48  ;;  %v818_v58 = vsel %vm806_vm2, %v800_v42, %v817_v49  ;;  %v1041_v6 = vadd.s32 536870912, %v1040_v46  ;;  %v1091_v27 = vand.u32 8388607, %v1084_v57 }
 0x1f2   : > { %v819_v10 = vsel %vm805_vm1, %v816_v61, %v818_v58  ;;  %v5328_v19 = vmul.u32.u64.low %v5273_v56, %v815_v52  ;;  %v5329_v23 = vmul.u32.u64.high %v5273_v56, %v815_v52, %v5328_v19  ;;  %vm1095_vm4 = vcmp.gt.s32.totalorder %v1094_v60, 0 }
 0x1f3   : > { %v5333_v24 = vmul.u32.u64.low %v5273_v56, %v819_v10  ;;  %v5334_v28 = vmul.u32.u64.high %v5273_v56, %v819_v10, %v5333_v24  ;;  %v1042_v33 = vshrl.u32 %v1041_v6, 30  ;;  %v811_v62 = vsel %vm805_vm1, %v808_v47, %v810_v51 }
 0x1f4   : > { %v1096_v50 = vsel %vm1095_vm4, %v1094_v60, 0  ;;  %v830_v37 = vadd.s32 1, %v5329_v23  ;;  %v5343_v38 = vadd.f32 %v5234_v21, %v5267_v53  ;;  %v673_v39 = vsel %vm5228_vm8, %v342_v32, %v5201_v0 }
 0x1f5   : > { %v1098_v34 = vand.u32 31, %v1096_v50  ;;  %v1043_v35 = vshll.u32 %v1042_v33, 30  ;;  %v827_v41 = vmul.u32 %v5273_v56, %v811_v62  ;;  %vm829_vm5 = vc.u32 %v5334_v28, %v5328_v19 }
 0x1f6   : > { %v1092_v55 = vor.u32 8388608, %v1091_v27  ;;  %v831_v36 = vsel %vm829_vm5, %v830_v37, %v5329_v23  ;;  %v1036_v53 = vadd.s32 %v5304_v12, %v5301_v22  ;;  %v876_v0 = vand.u32 2147483647, %v5343_v38 }
 0x1f7   : > { %v1099_v42 = vsub.s32 32, %v1098_v34  ;;  %v5351_v43 = vsub.s32 %v1040_v46, %v1043_v35  ;;  %v832_v54 = vadd.s32 %v831_v36, %v827_v41  ;;  %v5359_v56 = vmul.f32 %v5232_v18, %v673_v39 }
 0x1f8   : > { %v5362_v47 = vshll.u32 %v1092_v55, 8  ;;  %v879_v46 = vand.u32 2139095040, %v5343_v38  ;;  %v5366_v49 = vshrl.u32 %v1096_v50, 5  ;;  %v1066_v51 = vsub.s32 4, %v1042_v33 }
 0x1f9   : > { %v1046_v44 = vsub.s32 0, %v5351_v43  ;;  %v833_v45 = vadd.s32 536870912, %v832_v54  ;;  %v1102_v61 = vshrl.u32 %v4924_v63, %v1099_v42  ;;  %v1105_v22 = vshrl.u32 %v4925_v9, %v1099_v42 }
 0x1fa   : > { %v1108_v12 = vshrl.u32 %v4926_v14, %v1099_v42  ;;  %v1101_v58 = vshll.u32 %v4923_v59, %v1098_v34  ;;  %v1111_v60 = vshrl.u32 %v4927_v20, %v1099_v42  ;;  %v1104_v10 = vshll.u32 %v4924_v63, %v1098_v34 }
 0x1fb   : > { %v4274_v48 = vmin.u32 %v1046_v44, %v5351_v43  ;;  %v834_v52 = vshrl.u32 %v833_v45, 30  ;;  %v1107_v23 = vshll.u32 %v4925_v9, %v1098_v34  ;;  %v1114_v24 = vshrl.u32 %v4928_v30, %v1099_v42 }
 0x1fc   : > { %v1103_v32 = vor.u32 %v1102_v61, %v1101_v58  ;;  %v1110_v62 = vshll.u32 %v4926_v14, %v1098_v34  ;;  %v880_v50 = vshrl.u32 %v879_v46, 23  ;;  %v1106_v37 = vor.u32 %v1105_v22, %v1104_v10 }
 0x1fd   : > { %v1048_v6 = vclz %v4274_v48  ;;  %v835_v27 = vshll.u32 %v834_v52, 30  ;;  %v1109_v39 = vor.u32 %v1108_v12, %v1107_v23  ;;  %v1113_v41 = vshll.u32 %v4927_v20, %v1098_v34 }
 0x1fe   : > { %v5379_v55 = vsel %vm982_vm6, %v1066_v51, %v1042_v33  ;;  %v1100_v44 = vshrl.u32 %v4923_v59, %v1099_v42  ;;  %v1112_v45 = vor.u32 %v1111_v60, %v1110_v62  ;;  %v858_v61 = vsub.s32 4, %v834_v52 }
 0x1ff   : > { %v4275_v35 = vadd.s32 4294967294, %v1048_v6  ;;  %v5382_v36 = vsub.s32 %v832_v54, %v835_v27  ;;  %v1115_v48 = vor.u32 %v1114_v24, %v1113_v41  ;;  %vm1116_vm10 = vcmp.lt.s32.totalorder %v5366_v49, 1 }
 0x200   : > { %vm5388_vm11 = vcmp.le.f32.partialorder %v980_v29, 0.7853982  ;;  %vm1118_vm12 = vcmp.lt.s32.totalorder %v5366_v49, 3  ;;  %vm1119_vm13 = vcmp.lt.s32.totalorder %v5366_v49, 4  ;;  %vm5397_vm14 = vcmp.le.f32.partialorder %v772_v31, 0.7853982 }
 0x201   : > { %vm4276_vm9 = vcmp.lt.s32.totalorder %v4275_v35, 0  ;;  %v838_v46 = vsub.s32 0, %v5382_v36  ;;  %v1121_v12 = vsel %vm1119_vm13, %v1109_v39, 2102212464  ;;  %v1124_v29 = vsel %vm1116_vm10, %v1103_v32, %v1106_v37 }
 0x202   : > { %v1051_v33 = vsel %vm4276_vm9, 0, %v4275_v35  ;;  %v1125_v60 = vsel %vm1119_vm13, %v1112_v45, 920167782  ;;  %v1128_v6 = vsel %vm1116_vm10, %v1106_v37, %v1109_v39  ;;  %v1129_v24 = vsel %vm1119_vm13, %v1115_v48, 1326507024 }
 0x203   : > { %v1052_v42 = vsub.s32 32, %v1051_v33  ;;  %v1056_v54 = vsub.s32 4294967266, %v1051_v33  ;;  %v1053_v51 = vshll.u32 %v5351_v43, %v1051_v33  ;;  %v4266_v58 = vmin.u32 %v838_v46, %v5382_v36 }
 0x204   : > { %v1126_v31 = vsel %vm1118_vm12, %v1109_v39, %v1125_v60  ;;  %vm1117_vm15 = vcmp.lt.s32.totalorder %v5366_v49, 2  ;;  %v1120_v62 = vsel %vm1116_vm10, %v1100_v44, %v1103_v32  ;;  %v1122_v43 = vsel %vm1118_vm12, %v1106_v37, %v1121_v12 }
 0x205   : > { %v1054_v10 = vshrl.u32 %v1036_v53, %v1052_v42  ;;  %v1057_v23 = vadd.s32 127, %v1056_v54  ;;  %v840_v27 = vclz %v4266_v58  ;;  %v1127_v33 = vsel %vm1117_vm15, %v1124_v29, %v1126_v31 }
 0x206   : > { %v1130_v53 = vsel %vm1118_vm12, %v1112_v45, %v1129_v24  ;;  %v5417_v39 = vmul.u32.u64.low %v5362_v47, %v1127_v33  ;;  %v5418_v48 = vmul.u32.u64.high %v5362_v47, %v1127_v33, %v5417_v39  ;;  %v859_v58 = vsel %vm774_vm7, %v858_v61, %v834_v52 }
 0x207   : > { %v1055_v35 = vor.u32 %v1054_v10, %v1053_v51  ;;  %v1058_v41 = vshll.u32 %v1057_v23, 23  ;;  %v4267_v46 = vadd.s32 4294967294, %v840_v27  ;;  %v1131_v42 = vsel %vm1117_vm15, %v1128_v6, %v1130_v53 }
 0x208   : > { %v5423_v32 = vmul.u32.u64.low %v5362_v47, %v1131_v42  ;;  %v5424_v44 = vmul.u32.u64.high %v5362_v47, %v1131_v42, %v5423_v32  ;;  %v828_v37 = vadd.s32 %v5328_v19, %v5334_v28  ;;  %v1123_v49 = vsel %vm1117_vm15, %v1120_v62, %v1122_v43 }
 0x209   : > { %v1059_v54 = vor.u32 4788187, %v1058_v41  ;;  %vm4268_vm0 = vcmp.lt.s32.totalorder %v4267_v46, 0  ;;  %v4269_v45 = vadd.s32 4294967169, %v880_v50  ;;  %v1062_v29 = vcvt.s32.f32 %v1055_v35 }
 0x20a   : > { %v1069_v51 = vsel %vm5388_vm11, 0, %v5379_v55  ;;  %v843_v60 = vsel %vm4268_vm0, 0, %v4267_v46  ;;  %v861_v52 = vsel %vm5397_vm14, 0, %v859_v58  ;;  %v1142_v61 = vadd.s32 1, %v5418_v48 }
 0x20b   : > { %v1060_v12 = vand.u32 2147483647, %v1059_v54  ;;  %v844_v6 = vsub.s32 32, %v843_v60  ;;  %v848_v10 = vsub.s32 4294967266, %v843_v60  ;;  %v1139_v19 = vmul.u32 %v5362_v47, %v1123_v49 }
 0x20c   : > { %vm1141_vm1 = vc.u32 %v5424_v44, %v5417_v39  ;;  %v886_v28 = vadd.s32 1, %v4269_v45  ;;  %v845_v50 = vshll.u32 %v5382_v36, %v843_v60  ;;  %v1073_v62 = vadd.s32 3, %v1069_v51 }
 0x20d   : > { %v1063_v23 = vmul.f32 %v1062_v29, %v1060_v12  ;;  %v846_v31 = vshrl.u32 %v828_v37, %v844_v6  ;;  %v849_v24 = vadd.s32 127, %v848_v10  ;;  %v1143_v55 = vsel %vm1141_vm1, %v1142_v61, %v5418_v48 }
 0x20e   : > { %v1144_v43 = vadd.s32 %v1143_v55, %v1139_v19  ;;  %vm887_vm2 = vcmp.gt.s32.totalorder %v886_v28, 0  ;;  %v865_v33 = vadd.s32 3, %v861_v52  ;;  %v883_v42 = vand.u32 8388607, %v876_v0 }
 0x20f   : > { %v1064_v27 = vxor.u32 2147483648, %v1063_v23  ;;  %v847_v35 = vor.u32 %v846_v31, %v845_v50  ;;  %v850_v41 = vshll.u32 %v849_v24, 23  ;;  %v888_v53 = vsel %vm887_vm2, %v886_v28, 0 }
 0x210   : > { %v1145_v46 = vadd.s32 536870912, %v1144_v43  ;;  %v890_v36 = vand.u32 31, %v888_v53  ;;  %v5445_v58 = vand.u32 3, %v1073_v62  ;;  %vm1086_vm3 = vcmp.lt.s32.totalorder %v5260_v40, 0 }
 0x211   : > { %v1065_v47 = vsel %vm982_vm6, %v1064_v27, %v1063_v23  ;;  %v851_v54 = vor.u32 4788187, %v850_v41  ;;  %v854_v45 = vcvt.s32.f32 %v847_v35  ;;  %v5448_v12 = vand.u32 3, %v865_v33 }
 0x212   : > { %v1068_v48 = vsel %vm5388_vm11, %v5243_v25, %v1065_v47  ;;  %v1146_v32 = vshrl.u32 %v1145_v46, 30  ;;  %v891_v37 = vsub.s32 32, %v890_v36  ;;  %v884_v51 = vor.u32 8388608, %v883_v42 }
 0x213   : > { %4631 = vcosq.f32 %v1068_v48  ;;  %v852_v49 = vand.u32 2147483647, %v851_v54  ;;  %v5453_v34 = vadd.f32 %v5234_v21, %v5359_v56  ;;  %v5456_v10 = vadd.s32 %v5417_v39, %v5424_v44 }
 0x214   : > { %4633 = vsinq.f32 %v1068_v48  ;;  %v1147_v29 = vshll.u32 %v1146_v32, 30  ;;  %v894_v60 = vshrl.u32 %v4924_v63, %v891_v37  ;;  %v897_v52 = vshrl.u32 %v4925_v9, %v891_v37 }
 0x215   : > { %v855_v6 = vmul.f32 %v854_v45, %v852_v49  ;;  %v900_v61 = vshrl.u32 %v4926_v14, %v891_v37  ;;  %vm1079_vm4 = vcmp.eq.s32.totalorder %v5445_v58, 2  ;;  %v5463_v19 = vshrl.u32 %v888_v53, 5 }
 0x216   : > { %v5461_v23 = vsub.s32 %v1144_v43, %v1147_v29  ;;  %v893_v28 = vshll.u32 %v4923_v59, %v890_v36  ;;  %v903_v50 = vshrl.u32 %v4927_v20, %v891_v37  ;;  %vm1076_vm5 = vcmp.eq.s32.totalorder %v5445_v58, 0 }
 0x217   : > { %v856_v56 = vxor.u32 2147483648, %v855_v6  ;;  %v1170_v31 = vsub.s32 4, %v1146_v32  ;;  %v896_v39 = vshll.u32 %v4924_v63, %v890_v36  ;;  %v899_v44 = vshll.u32 %v4925_v9, %v890_v36 }
 0x218   : > { %vm1075_vm6 = vcmp.lt.s32.totalorder %v5445_v58, 2  ;;  %v1150_v24 = vsub.s32 0, %v5461_v23  ;;  %v895_v55 = vor.u32 %v894_v60, %v893_v28  ;;  %v902_v27 = vshll.u32 %v4926_v14, %v890_v36 }
 0x219   : > { %v5473_v62 = vshll.u32 %v884_v51, 8  ;;  %vm1072_vm9 = vweird.f32 %v5243_v25  ;;  %v857_v43 = vsel %vm774_vm7, %v856_v56, %v855_v6  ;;  %v898_v35 = vor.u32 %v897_v52, %v896_v39 }
 0x21a   : > { %v901_v41 = vor.u32 %v900_v61, %v899_v44  ;;  %v906_v33 = vshrl.u32 %v4928_v30, %v891_v37  ;;  %v860_v53 = vsel %vm5397_vm14, %v5246_v26, %v857_v43  ;;  %v4278_v47 = vmin.u32 %v1150_v24, %v5461_v23 }
 0x21b   : > { %v904_v46 = vor.u32 %v903_v50, %v902_v27  ;;  %v905_v42 = vshll.u32 %v4927_v20, %v890_v36  ;;  %4635 = vcosq.f32 %v860_v53  ;;  %v5486_v48 = vsel %vm1086_vm3, %v1170_v31, %v1146_v32 }
 0x21c   : > { %v892_v54 = vshrl.u32 %v4923_v59, %v891_v37  ;;  %vm908_vm7 = vcmp.lt.s32.totalorder %v5463_v19, 1  ;;  %4637 = vsinq.f32 %v860_v53  ;;  %vm5492_vm10 = vcmp.le.f32.partialorder %v1084_v57, 0.7853982 }
 0x21d   : > { %v4632_v49 = vpop.eup %4631  ;;  %v1152_v45 = vclz %v4278_v47  ;;  %v907_v29 = vor.u32 %v906_v33, %v905_v42  ;;  %vm909_vm11 = vcmp.lt.s32.totalorder %v5463_v19, 2  ;;  %vm910_vm12 = vcmp.lt.s32.totalorder %v5463_v19, 3 }
 0x21e   : > { %v4634_v36 = vpop.eup %4633  ;;  %v1080_v32 = vxor.u32 2147483648, %v4632_v49  ;;  %vm911_vm13 = vcmp.lt.s32.totalorder %v5463_v19, 4  ;;  %v916_v37 = vsel %vm908_vm7, %v895_v55, %v898_v35  ;;  %v912_v61 = vsel %vm908_vm7, %v892_v54, %v895_v55 }
 0x21f   : > { %v1077_v51 = vxor.u32 2147483648, %v4634_v36  ;;  %v4279_v60 = vadd.s32 4294967294, %v1152_v45  ;;  %v913_v57 = vsel %vm911_vm13, %v901_v41, 2102212464  ;;  %v917_v6 = vsel %vm911_vm13, %v904_v46, 920167782 }
 0x220   : > { %v1081_v52 = vsel %vm1079_vm4, %v1080_v32, %v4634_v36  ;;  %v918_v28 = vsel %vm910_vm12, %v901_v41, %v917_v6  ;;  %v920_v50 = vsel %vm908_vm7, %v898_v35, %v901_v41  ;;  %v921_v39 = vsel %vm911_vm13, %v907_v29, 1326507024  ;;  %v338_v36 = vpop.permute.xlu0 %337 }
 0x221   : > { %v1078_v56 = vsel %vm1076_vm5, %v4632_v49, %v1077_v51  ;;  %vm4280_vm14 = vcmp.lt.s32.totalorder %v4279_v60, 0  ;;  %v919_v31 = vsel %vm909_vm11, %v916_v37, %v918_v28  ;;  %vm867_vm15 = vcmp.lt.s32.totalorder %v5448_v12, 2 }
 0x222   : > { %v1082_v44 = vsel %vm1075_vm6, %v1078_v56, %v1081_v52  ;;  %v1155_v24 = vsel %vm4280_vm14, 0, %v4279_v60  ;;  %v914_v55 = vsel %vm910_vm12, %v898_v35, %v913_v57  ;;  %v922_v27 = vsel %vm910_vm12, %v904_v46, %v921_v39 }
 0x223   : > { %v1083_v43 = vsel %vm1072_vm9, nan, %v1082_v44  ;;  %vm864_vm0 = vweird.f32 %v5246_v26  ;;  %v1156_v41 = vsub.s32 32, %v1155_v24  ;;  %v1157_v33 = vshll.u32 %v5461_v23, %v1155_v24 }
 0x224   : > { %v1160_v53 = vsub.s32 4294967266, %v1155_v24  ;;  %4102 = vst [vmem:[%s5525_s20 + $0x10] sm:$0xff] %v1083_v43  ;;  %v923_v58 = vsel %vm909_vm11, %v920_v50, %v922_v27  ;;  %v5531_v35 = vmul.u32.u64.low %v5473_v62, %v919_v31  ;;  %v5532_v47 = vmul.u32.u64.high %v5473_v62, %v919_v31, %v5531_v35 }
 0x225   : > { %v1295_v25 = vand.u32 2139095040, %v5453_v34  ;;  %v1158_v46 = vshrl.u32 %v5456_v10, %v1156_v41  ;;  %v5538_v23 = vmul.u32.u64.low %v5473_v62, %v923_v58  ;;  %v5539_v54 = vmul.u32.u64.high %v5473_v62, %v923_v58, %v5538_v23  ;;  %v4636_v49 = vpop.eup %4635  ;;  %v353_v58 = vpop.permute.xlu1 %352 }
 0x226   : > { %v1161_v42 = vadd.s32 127, %v1160_v53  ;;  %vm868_vm1 = vcmp.eq.s32.totalorder %v5448_v12, 0  ;;  %vm871_vm2 = vcmp.eq.s32.totalorder %v5448_v12, 2  ;;  %v1173_v45 = vsel %vm5492_vm10, 0, %v5486_v48  ;;  %v4638_v32 = vpop.eup %4637 }
 0x227   : > { %v1296_v29 = vshrl.u32 %v1295_v25, 23  ;;  %v872_v37 = vxor.u32 2147483648, %v4636_v49  ;;  %v1159_v51 = vor.u32 %v1158_v46, %v1157_v33  ;;  %v915_v60 = vsel %vm909_vm11, %v912_v61, %v914_v55 }
 0x228   : > { %v1162_v10 = vshll.u32 %v1161_v42, 23  ;;  %v869_v57 = vxor.u32 2147483648, %v4638_v32  ;;  %v934_v6 = vadd.s32 1, %v5532_v47  ;;  %v1292_v52 = vand.u32 2147483647, %v5453_v34 }
 0x229   : > { %v4285_v28 = vadd.s32 4294967169, %v1296_v29  ;;  %v873_v50 = vsel %vm871_vm2, %v872_v37, %v4638_v32  ;;  %v1177_v31 = vadd.s32 3, %v1173_v45  ;;  %v672_v48 = vsel %vm5228_vm8, %v338_v36, %v5203_v1 }
 0x22a   : > { %v1163_v56 = vor.u32 4788187, %v1162_v10  ;;  %v870_v39 = vsel %vm868_vm1, %v4636_v49, %v869_v57  ;;  %v931_v19 = vmul.u32 %v5473_v62, %v915_v60  ;;  %vm933_vm4 = vc.u32 %v5539_v54, %v5531_v35 }
 0x22b   : > { %v1302_v61 = vadd.s32 1, %v4285_v28  ;;  %v874_v44 = vsel %vm867_vm15, %v870_v39, %v873_v50  ;;  %v1166_v55 = vcvt.s32.f32 %v1159_v51  ;;  %v935_v27 = vsel %vm933_vm4, %v934_v6, %v5532_v47 }
 0x22c   : > { %v1164_v24 = vand.u32 2147483647, %v1163_v56  ;;  %v875_v43 = vsel %vm864_vm0, nan, %v874_v44  ;;  %v936_v1 = vadd.s32 %v935_v27, %v931_v19  ;;  %v1299_v41 = vand.u32 8388607, %v1292_v52 }
 0x22d   : > { %vm1303_vm5 = vcmp.gt.s32.totalorder %v1302_v61, 0  ;;  %4100 = vst [vmem:[%s5525_s20] sm:$0xff] %v875_v43  ;;  %v708_v53 = vmul.f32 %v5232_v18, %v672_v48  ;;  %v5567_v42 = vand.u32 3, %v1177_v31  ;;  %vm878_vm6 = vcmp.lt.s32.totalorder %v5343_v38, 0 }
 0x22e   : > { %v1167_v62 = vmul.f32 %v1166_v55, %v1164_v24  ;;  %v1304_v33 = vsel %vm1303_vm5, %v1302_v61, 0  ;;  %v937_v12 = vadd.s32 536870912, %v936_v1  ;;  %v1300_v47 = vor.u32 8388608, %v1299_v41 }
 0x22f   : > { %v1306_v25 = vand.u32 31, %v1304_v33  ;;  %v675_v49 = vsel %vm5228_vm8, %v353_v58, %v5207_v2  ;;  %v5575_v29 = vshrl.u32 %v1304_v33, 5  ;;  %v5579_v32 = vadd.f32 %v5234_v21, %v708_v53 }
 0x230   : > { %v1168_v46 = vxor.u32 2147483648, %v1167_v62  ;;  %v938_v26 = vshrl.u32 %v937_v12, 30  ;;  %v932_v55 = vadd.s32 %v5531_v35, %v5539_v54  ;;  %v5599_v27 = vshll.u32 %v1300_v47, 8 }
 0x231   : > { %v1307_v23 = vsub.s32 32, %v1306_v25  ;;  %v1309_v36 = vshll.u32 %v4923_v59, %v1306_v25  ;;  %v1312_v10 = vshll.u32 %v4924_v63, %v1306_v25  ;;  %v1315_v60 = vshll.u32 %v4925_v9, %v1306_v25 }
 0x232   : > { %v1169_v45 = vsel %vm1086_vm3, %v1168_v46, %v1167_v62  ;;  %v939_v51 = vshll.u32 %v938_v26, 30  ;;  %v1318_v50 = vshll.u32 %v4926_v14, %v1306_v25  ;;  %v962_v56 = vsub.s32 4, %v938_v26 }
 0x233   : > { %v1172_v37 = vsel %vm5492_vm10, %v5260_v40, %v1169_v45  ;;  %v1310_v2 = vshrl.u32 %v4924_v63, %v1307_v23  ;;  %v1313_v57 = vshrl.u32 %v4925_v9, %v1307_v23  ;;  %v1316_v6 = vshrl.u32 %v4926_v14, %v1307_v23 }
 0x234   : > { %4639 = vcosq.f32 %v1172_v37  ;;  %v5589_v28 = vsub.s32 %v936_v1, %v939_v51  ;;  %v1319_v22 = vshrl.u32 %v4927_v20, %v1307_v23  ;;  %v1321_v39 = vshll.u32 %v4927_v20, %v1306_v25 }
 0x235   : > { %4641 = vsinq.f32 %v1172_v37  ;;  %v1311_v31 = vor.u32 %v1310_v2, %v1309_v36  ;;  %v1314_v48 = vor.u32 %v1313_v57, %v1312_v10  ;;  %v1317_v61 = vor.u32 %v1316_v6, %v1315_v60 }
 0x236   : > { %v942_v19 = vsub.s32 0, %v5589_v28  ;;  %v1320_v44 = vor.u32 %v1319_v22, %v1318_v50  ;;  %v1322_v24 = vshrl.u32 %v4928_v30, %v1307_v23  ;;  %vm1183_vm3 = vcmp.eq.s32.totalorder %v5567_v42, 2 }
 0x237   : > { %v1191_v43 = vand.u32 2139095040, %v5579_v32  ;;  %v5603_v1 = vmul.f32 %v5232_v18, %v675_v49  ;;  %vm1180_vm9 = vcmp.eq.s32.totalorder %v5567_v42, 0  ;;  %vm5608_vm7 = vcmp.le.f32.partialorder %v876_v0, 0.7853982 }
 0x238   : > { %v4270_v62 = vmin.u32 %v942_v19, %v5589_v28  ;;  %v1323_v33 = vor.u32 %v1322_v24, %v1321_v39  ;;  %vm1324_vm10 = vcmp.lt.s32.totalorder %v5575_v29, 1  ;;  %vm1327_vm11 = vcmp.lt.s32.totalorder %v5575_v29, 4 }
 0x239   : > { %vm1179_vm12 = vcmp.lt.s32.totalorder %v5567_v42, 2  ;;  %v963_v18 = vsel %vm878_vm6, %v962_v56, %v938_v26  ;;  %v1308_v35 = vshrl.u32 %v4923_v59, %v1307_v23  ;;  %v1332_v0 = vsel %vm1324_vm10, %v1311_v31, %v1314_v48 }
 0x23a   : > { %v1333_v54 = vsel %vm1327_vm11, %v1320_v44, 920167782  ;;  %vm1176_vm13 = vweird.f32 %v5260_v40  ;;  %v944_v53 = vclz %v4270_v62  ;;  %vm1326_vm14 = vcmp.lt.s32.totalorder %v5575_v29, 3 }
 0x23b   : > { %v1329_v58 = vsel %vm1327_vm11, %v1317_v61, 2102212464  ;;  %v1336_v12 = vsel %vm1324_vm10, %v1314_v48, %v1317_v61  ;;  %vm1325_vm15 = vcmp.lt.s32.totalorder %v5575_v29, 2  ;;  %v1334_v25 = vsel %vm1326_vm14, %v1317_v61, %v1333_v54 }
 0x23c   : > { %v1337_v46 = vsel %vm1327_vm11, %v1323_v33, 1326507024  ;;  %v1192_v26 = vshrl.u32 %v1191_v43, 23  ;;  %v4271_v47 = vadd.s32 4294967294, %v944_v53  ;;  %v1328_v23 = vsel %vm1324_vm10, %v1308_v35, %v1311_v31 }
 0x23d   : > { %v1335_v49 = vsel %vm1325_vm15, %v1332_v0, %v1334_v25  ;;  %v1338_v45 = vsel %vm1326_vm14, %v1320_v44, %v1337_v46  ;;  %v1330_v37 = vsel %vm1326_vm14, %v1314_v48, %v1329_v58  ;;  %v1188_v31 = vand.u32 2147483647, %v5579_v32 }
 0x23e   : > { %v4640_v36 = vpop.eup %4639  ;;  %v1339_v51 = vsel %vm1325_vm15, %v1336_v12, %v1338_v45  ;;  %v5633_v10 = vmul.u32.u64.low %v5599_v27, %v1335_v49  ;;  %v5634_v60 = vmul.u32.u64.high %v5599_v27, %v1335_v49, %v5633_v10  ;;  %vm4272_vm0 = vcmp.lt.s32.totalorder %v4271_v47, 0 }
 0x23f   : > { %v4642_v2 = vpop.eup %4641  ;;  %v1184_v57 = vxor.u32 2147483648, %v4640_v36  ;;  %v5638_v6 = vmul.u32.u64.low %v5599_v27, %v1339_v51  ;;  %v5639_v50 = vmul.u32.u64.high %v5599_v27, %v1339_v51, %v5638_v6  ;;  %v947_v56 = vsel %vm4272_vm0, 0, %v4271_v47 }
 0x240   : > { %v1181_v22 = vxor.u32 2147483648, %v4642_v2  ;;  %v4281_v48 = vadd.s32 4294967169, %v1192_v26  ;;  %v948_v19 = vsub.s32 32, %v947_v56  ;;  %v952_v61 = vsub.s32 4294967266, %v947_v56 }
 0x241   : > { %v1185_v39 = vsel %vm1183_vm3, %v1184_v57, %v4642_v2  ;;  %v1331_v44 = vsel %vm1325_vm15, %v1328_v23, %v1330_v37  ;;  %v965_v43 = vsel %vm5608_vm7, 0, %v963_v18  ;;  %v1350_v62 = vadd.s32 1, %v5634_v60 }
 0x242   : > { %v1182_v24 = vsel %vm1180_vm9, %v4640_v36, %v1181_v22  ;;  %v1198_v33 = vadd.s32 1, %v4281_v48  ;;  %v949_v0 = vshll.u32 %v5589_v28, %v947_v56  ;;  %v950_v54 = vshrl.u32 %v932_v55, %v948_v19 }
 0x243   : > { %v1186_v35 = vsel %vm1179_vm12, %v1182_v24, %v1185_v39  ;;  %v953_v53 = vadd.s32 127, %v952_v61  ;;  %v1347_v58 = vmul.u32 %v5599_v27, %v1331_v44  ;;  %vm1349_vm1 = vc.u32 %v5639_v50, %v5633_v10 }
 0x244   : > { %v1187_v29 = vsel %vm1176_vm13, nan, %v1186_v35  ;;  %vm1199_vm2 = vcmp.gt.s32.totalorder %v1198_v33, 0  ;;  %v951_v18 = vor.u32 %v950_v54, %v949_v0  ;;  %v1351_v25 = vsel %vm1349_vm1, %v1350_v62, %v5634_v60 }
 0x245   : > { %4103 = vst [vmem:[%s5525_s20 + $0x18] sm:$0xff] %v1187_v29  ;;  %v954_v12 = vshll.u32 %v953_v53, 23  ;;  %v1200_v42 = vsel %vm1199_vm2, %v1198_v33, 0  ;;  %v1352_v46 = vadd.s32 %v1351_v25, %v1347_v58  ;;  %v969_v55 = vadd.s32 3, %v965_v43 }
 0x246   : > { %v1202_v26 = vand.u32 31, %v1200_v42  ;;  %v1195_v40 = vand.u32 8388607, %v1188_v31  ;;  %v958_v49 = vcvt.s32.f32 %v951_v18  ;;  %v5663_v45 = vshrl.u32 %v1200_v42, 5 }
 0x247   : > { %v955_v28 = vor.u32 4788187, %v954_v12  ;;  %v1353_v47 = vadd.s32 536870912, %v1352_v46  ;;  %v5667_v36 = vadd.f32 %v5234_v21, %v5603_v1  ;;  %v5678_v61 = vand.u32 3, %v969_v55 }
 0x248   : > { %v1203_v23 = vsub.s32 32, %v1202_v26  ;;  %v1214_v2 = vshll.u32 %v4926_v14, %v1202_v26  ;;  %v1205_v39 = vshll.u32 %v4923_v59, %v1202_v26  ;;  %v1208_v21 = vshll.u32 %v4924_v63, %v1202_v26 }
 0x249   : > { %v956_v27 = vand.u32 2147483647, %v955_v28  ;;  %v1354_v37 = vshrl.u32 %v1353_v47, 30  ;;  %v1211_v1 = vshll.u32 %v4925_v9, %v1202_v26  ;;  %v1217_v24 = vshll.u32 %v4927_v20, %v1202_v26 }
 0x24a   : > { %v1206_v51 = vshrl.u32 %v4924_v63, %v1203_v23  ;;  %v1209_v60 = vshrl.u32 %v4925_v9, %v1203_v23  ;;  %v1212_v6 = vshrl.u32 %v4926_v14, %v1203_v23  ;;  %v1215_v22 = vshrl.u32 %v4927_v20, %v1203_v23 }
 0x24b   : > { %v959_v57 = vmul.f32 %v958_v49, %v956_v27  ;;  %v1218_v56 = vshrl.u32 %v4928_v30, %v1203_v23  ;;  %v1355_v48 = vshll.u32 %v1354_v37, 30  ;;  %vm1294_vm4 = vcmp.lt.s32.totalorder %v5453_v34, 0 }
 0x24c   : > { %v1216_v44 = vor.u32 %v1215_v22, %v1214_v2  ;;  %v1207_v62 = vor.u32 %v1206_v51, %v1205_v39  ;;  %v1210_v33 = vor.u32 %v1209_v60, %v1208_v21  ;;  %v1213_v35 = vor.u32 %v1212_v6, %v1211_v1 }
 0x24d   : > { %v960_v19 = vxor.u32 2147483648, %v959_v57  ;;  %v5682_v43 = vsub.s32 %v1352_v46, %v1355_v48  ;;  %v1196_v54 = vor.u32 8388608, %v1195_v40  ;;  %v1219_v53 = vor.u32 %v1218_v56, %v1217_v24 }
 0x24e   : > { %v1503_v29 = vand.u32 2139095040, %v5667_v36  ;;  %v1204_v12 = vshrl.u32 %v4923_v59, %v1203_v23  ;;  %vm1223_vm5 = vcmp.lt.s32.totalorder %v5663_v45, 4  ;;  %vm1220_vm3 = vcmp.lt.s32.totalorder %v5663_v45, 1 }
 0x24f   : > { %v961_v0 = vsel %vm878_vm6, %v960_v19, %v959_v57  ;;  %v1358_v18 = vsub.s32 0, %v5682_v43  ;;  %vm1222_vm9 = vcmp.lt.s32.totalorder %v5663_v45, 3  ;;  %v1229_v25 = vsel %vm1223_vm5, %v1216_v44, 920167782 }
 0x250   : > { %v964_v58 = vsel %vm5608_vm7, %v5343_v38, %v961_v0  ;;  %v1225_v46 = vsel %vm1223_vm5, %v1213_v35, 2102212464  ;;  %v1228_v26 = vsel %vm1220_vm3, %v1207_v62, %v1210_v33  ;;  %v1378_v28 = vsub.s32 4, %v1354_v37 }
 0x251   : > { %4643 = vcosq.f32 %v964_v58  ;;  %v4286_v42 = vmin.u32 %v1358_v18, %v5682_v43  ;;  %v1230_v41 = vsel %vm1222_vm9, %v1213_v35, %v1229_v25  ;;  %v1232_v55 = vsel %vm1220_vm3, %v1210_v33, %v1213_v35 }
 0x252   : > { %4645 = vsinq.f32 %v964_v58  ;;  %v1233_v47 = vsel %vm1223_vm5, %v1219_v53, 1326507024  ;;  %vm5700_vm6 = vcmp.le.f32.partialorder %v1292_v52, 0.7853982  ;;  %vm1221_vm7 = vcmp.lt.s32.totalorder %v5663_v45, 2 }
 0x253   : > { %v1360_v23 = vclz %v4286_v42  ;;  %v1236_v27 = vshll.u32 %v1196_v54, 8  ;;  %v1224_v49 = vsel %vm1220_vm3, %v1204_v12, %v1207_v62  ;;  %v1226_v51 = vsel %vm1222_vm9, %v1210_v33, %v1225_v46 }
 0x254   : > { %v1231_v60 = vsel %vm1221_vm7, %v1228_v26, %v1230_v41  ;;  %v1234_v2 = vsel %vm1222_vm9, %v1216_v44, %v1233_v47  ;;  %vm971_vm10 = vcmp.lt.s32.totalorder %v5678_v61, 2  ;;  %v1379_v56 = vsel %vm1294_vm4, %v1378_v28, %v1354_v37 }
 0x255   : > { %v4287_v57 = vadd.s32 4294967294, %v1360_v23  ;;  %v1235_v52 = vsel %vm1221_vm7, %v1232_v55, %v1234_v2  ;;  %v5713_v6 = vmul.u32.u64.low %v1236_v27, %v1231_v60  ;;  %v5714_v22 = vmul.u32.u64.high %v1236_v27, %v1231_v60, %v5713_v6 }
 0x256   : > { %v5720_v48 = vmul.u32.u64.low %v1236_v27, %v1235_v52  ;;  %v5721_v39 = vmul.u32.u64.high %v1236_v27, %v1235_v52, %v5720_v48  ;;  %v1504_v21 = vshrl.u32 %v1503_v29, 23  ;;  %vm972_vm11 = vcmp.eq.s32.totalorder %v5678_v61, 0 }
 0x257   : > { %vm975_vm12 = vcmp.eq.s32.totalorder %v5678_v61, 2  ;;  %vm4288_vm13 = vcmp.lt.s32.totalorder %v4287_v57, 0  ;;  %v1227_v1 = vsel %vm1221_vm7, %v1224_v49, %v1226_v51  ;;  %v1348_v19 = vadd.s32 %v5633_v10, %v5639_v50  ;;  %v349_v49 = vpop.permute.xlu0 %348 }
 0x258   : > { %v1363_v44 = vsel %vm4288_vm13, 0, %v4287_v57  ;;  %v1500_v24 = vand.u32 2147483647, %v5667_v36  ;;  %v4293_v62 = vadd.s32 4294967169, %v1504_v21  ;;  %v1381_v35 = vsel %vm5700_vm6, 0, %v1379_v56 }
 0x259   : > { %v1364_v37 = vsub.s32 32, %v1363_v44  ;;  %v1368_v33 = vsub.s32 4294967266, %v1363_v44  ;;  %v1246_v0 = vadd.s32 1, %v5714_v22  ;;  %v1365_v53 = vshll.u32 %v5682_v43, %v1363_v44 }
 0x25a   : > { %v1243_v29 = vmul.u32 %v1236_v27, %v1227_v1  ;;  %vm1245_vm14 = vc.u32 %v5721_v39, %v5713_v6  ;;  %v1510_v45 = vadd.s32 1, %v4293_v62  ;;  %v1385_v42 = vadd.s32 3, %v1381_v35 }
 0x25b   : > { %v4644_v54 = vpop.eup %4643  ;;  %v1366_v58 = vshrl.u32 %v1348_v19, %v1364_v37  ;;  %v1369_v18 = vadd.s32 127, %v1368_v33  ;;  %v1247_v12 = vsel %vm1245_vm14, %v1246_v0, %v5714_v22  ;;  %v1507_v23 = vand.u32 8388607, %v1500_v24 }
 0x25c   : > { %v4646_v10 = vpop.eup %4645  ;;  %v976_v50 = vxor.u32 2147483648, %v4644_v54  ;;  %v1248_v46 = vadd.s32 %v1247_v12, %v1243_v29  ;;  %vm1511_vm15 = vcmp.gt.s32.totalorder %v1510_v45, 0  ;;  %vm968_vm0 = vweird.f32 %v5343_v38 }
 0x25d   : > { %v973_v25 = vxor.u32 2147483648, %v4646_v10  ;;  %v1367_v43 = vor.u32 %v1366_v58, %v1365_v53  ;;  %v1370_v28 = vshll.u32 %v1369_v18, 23  ;;  %v1512_v41 = vsel %vm1511_vm15, %v1510_v45, 0 }
 0x25e   : > { %v977_v26 = vsel %vm975_vm12, %v976_v50, %v4646_v10  ;;  %v1249_v47 = vadd.s32 536870912, %v1248_v46  ;;  %v1514_v27 = vand.u32 31, %v1512_v41  ;;  %v5749_v48 = vand.u32 3, %v1385_v42 }
 0x25f   : > { %v974_v55 = vsel %vm972_vm11, %v4644_v54, %v973_v25  ;;  %v1371_v60 = vor.u32 4788187, %v1370_v28  ;;  %v1374_v56 = vcvt.s32.f32 %v1367_v43  ;;  %v674_v21 = vsel %vm5228_vm8, %v349_v49, %v5209_v3  ;;  %v5763_v3 = vld [vmem:[#allocation5] ss:$0 sm:$0xff] }
 0x260   : > { %v978_v51 = vsel %vm971_vm10, %v974_v55, %v977_v26  ;;  %v5746_v57 = vshrl.u32 %v1249_v47, 30  ;;  %v1515_v52 = vsub.s32 32, %v1514_v27  ;;  %v1508_v38 = vor.u32 8388608, %v1507_v23  ;;  %v5778_v47 = vld [vmem:[#allocation5 + $0x2] ss:$0 sm:$0xff] }
 0x261   : > { %v979_v2 = vsel %vm968_vm0, nan, %v978_v51  ;;  %v1372_v22 = vand.u32 2147483647, %v1371_v60  ;;  %v1517_v61 = vshll.u32 %v4923_v59, %v1514_v27  ;;  %v1513_v0 = vshrl.u32 %v1512_v41, 5 }
 0x262   : > { %4101 = vst [vmem:[%s5525_s20 + $0x8] sm:$0xff] %v979_v2  ;;  %v1251_v1 = vshll.u32 %v5746_v57, 30  ;;  %v1518_v19 = vshrl.u32 %v4924_v63, %v1515_v52  ;;  %v1521_v62 = vshrl.u32 %v4925_v9, %v1515_v52  ;;  %v1524_v37 = vshrl.u32 %v4926_v14, %v1515_v52 }
 0x263   : > { %v1375_v44 = vmul.f32 %v1374_v56, %v1372_v22  ;;  %v1527_v33 = vshrl.u32 %v4927_v20, %v1515_v52  ;;  %v1520_v54 = vshll.u32 %v4924_v63, %v1514_v27  ;;  %v710_v53 = vmul.f32 %v5763_v3, %v674_v21 }
 0x264   : > { %v5760_v35 = vsub.s32 %v1248_v46, %v1251_v1  ;;  %v1519_v45 = vor.u32 %v1518_v19, %v1517_v61  ;;  %v1523_v10 = vshll.u32 %v4925_v9, %v1514_v27  ;;  %v1526_v50 = vshll.u32 %v4926_v14, %v1514_v27 }
 0x265   : > { %v1376_v29 = vxor.u32 2147483648, %v1375_v44  ;;  %v1522_v18 = vor.u32 %v1521_v62, %v1520_v54  ;;  %v1529_v12 = vshll.u32 %v4927_v20, %v1514_v27  ;;  %v1530_v25 = vshrl.u32 %v4928_v30, %v1515_v52 }
 0x266   : > { %v1254_v58 = vsub.s32 0, %v5760_v35  ;;  %v1525_v46 = vor.u32 %v1524_v37, %v1523_v10  ;;  %v1528_v26 = vor.u32 %v1527_v33, %v1526_v50  ;;  %v1548_v43 = vshll.u32 %v1508_v38, 8  ;;  %v364_v33 = vpop.permute.xlu1 %363 }
 0x267   : > { %v1377_v42 = vsel %vm1294_vm4, %v1376_v29, %v1375_v44  ;;  %vm1190_vm1 = vcmp.lt.s32.totalorder %v5579_v32, 0  ;;  %v1531_v55 = vor.u32 %v1530_v25, %v1529_v12  ;;  %v5781_v23 = vadd.f32 %v5778_v47, %v710_v53 }
 0x268   : > { %v1380_v28 = vsel %vm5700_vm6, %v5453_v34, %v1377_v42  ;;  %v4282_v41 = vmin.u32 %v1254_v58, %v5760_v35  ;;  %v1274_v27 = vsub.s32 4, %v5746_v57  ;;  %v1516_v49 = vshrl.u32 %v4923_v59, %v1515_v52 }
 0x269   : > { %4647 = vcosq.f32 %v1380_v28  ;;  %vm1532_vm2 = vcmp.lt.s32.totalorder %v1513_v0, 1  ;;  %vm1535_vm4 = vcmp.lt.s32.totalorder %v1513_v0, 4  ;;  %vm1534_vm5 = vcmp.lt.s32.totalorder %v1513_v0, 3 }
 0x26a   : > { %4649 = vsinq.f32 %v1380_v28  ;;  %v1256_v51 = vclz %v4282_v41  ;;  %v1540_v40 = vsel %vm1532_vm2, %v1519_v45, %v1522_v18  ;;  %v1537_v60 = vsel %vm1535_vm4, %v1525_v46, 2102212464 }
 0x26b   : > { %v1541_v2 = vsel %vm1535_vm4, %v1528_v26, 920167782  ;;  %v1544_v22 = vsel %vm1532_vm2, %v1522_v18, %v1525_v46  ;;  %vm1533_vm3 = vcmp.lt.s32.totalorder %v1513_v0, 2  ;;  %v1545_v1 = vsel %vm1535_vm4, %v1531_v55, 1326507024 }
 0x26c   : > { %v4283_v56 = vadd.s32 4294967294, %v1256_v51  ;;  %v1542_v21 = vsel %vm1534_vm5, %v1525_v46, %v1541_v2  ;;  %v1536_v38 = vsel %vm1532_vm2, %v1516_v49, %v1519_v45  ;;  %v1538_v61 = vsel %vm1534_vm5, %v1522_v18, %v1537_v60 }
 0x26d   : > { %v1543_v19 = vsel %vm1533_vm3, %v1540_v40, %v1542_v21  ;;  %v1546_v44 = vsel %vm1534_vm5, %v1528_v26, %v1545_v1  ;;  %vm5792_vm6 = vcmp.le.f32.partialorder %v1188_v31, 0.7853982  ;;  %vm1384_vm7 = vweird.f32 %v5453_v34 }
 0x26e   : > { %vm4284_vm9 = vcmp.lt.s32.totalorder %v4283_v56, 0  ;;  %v1547_v52 = vsel %vm1533_vm3, %v1544_v22, %v1546_v44  ;;  %v5787_v62 = vmul.u32.u64.low %v1548_v43, %v1543_v19  ;;  %v5788_v37 = vmul.u32.u64.high %v1548_v43, %v1543_v19, %v5787_v62 }
 0x26f   : > { %v1259_v53 = vsel %vm4284_vm9, 0, %v4283_v56  ;;  %v5796_v29 = vmul.u32.u64.low %v1548_v43, %v1547_v52  ;;  %v5797_v45 = vmul.u32.u64.high %v1548_v43, %v1547_v52, %v5796_v29  ;;  %v1244_v10 = vadd.s32 %v5713_v6, %v5721_v39 }
 0x270   : > { %v1260_v50 = vsub.s32 32, %v1259_v53  ;;  %v1264_v58 = vsub.s32 4294967266, %v1259_v53  ;;  %v1539_v18 = vsel %vm1533_vm3, %v1536_v38, %v1538_v61  ;;  %vm1391_vm10 = vcmp.eq.s32.totalorder %v5749_v48, 2 }
 0x271   : > { %v1275_v31 = vsel %vm1190_vm1, %v1274_v27, %v5746_v57  ;;  %v1399_v12 = vand.u32 2139095040, %v5781_v23  ;;  %v677_v25 = vsel %vm5228_vm8, %v364_v33, %v5211_v4  ;;  %v1261_v42 = vshll.u32 %v5760_v35, %v1259_v53  ;;  %v5827_v53 = vpop.permute.xlu0 %359 }
 0x272   : > { %v1262_v46 = vshrl.u32 %v1244_v10, %v1260_v50  ;;  %v1265_v6 = vadd.s32 127, %v1264_v58  ;;  %v1558_v39 = vadd.s32 1, %v5788_v37  ;;  %v1555_v26 = vmul.u32 %v1548_v43, %v1539_v18 }
 0x273   : > { %v4648_v0 = vpop.eup %4647  ;;  %vm1557_vm11 = vc.u32 %v5797_v45, %v5787_v62  ;;  %v1396_v28 = vand.u32 2147483647, %v5781_v23  ;;  %v1400_v41 = vshrl.u32 %v1399_v12, 23  ;;  %v1277_v35 = vsel %vm5792_vm6, 0, %v1275_v31 }
 0x274   : > { %v4650_v57 = vpop.eup %4649  ;;  %v1392_v55 = vxor.u32 2147483648, %v4648_v0  ;;  %v1263_v27 = vor.u32 %v1262_v46, %v1261_v42  ;;  %v1266_v49 = vshll.u32 %v1265_v6, 23  ;;  %v1559_v51 = vsel %vm1557_vm11, %v1558_v39, %v5788_v37 }
 0x275   : > { %v1389_v4 = vxor.u32 2147483648, %v4650_v57  ;;  %v1560_v40 = vadd.s32 %v1559_v51, %v1555_v26  ;;  %v4289_v60 = vadd.s32 4294967169, %v1400_v41  ;;  %vm1388_vm12 = vcmp.eq.s32.totalorder %v5749_v48, 0 }
 0x276   : > { %v1393_v43 = vsel %vm1391_vm10, %v1392_v55, %v4650_v57  ;;  %v1267_v2 = vor.u32 4788187, %v1266_v49  ;;  %v713_v22 = vmul.f32 %v5763_v3, %v677_v25  ;;  %vm1387_vm13 = vcmp.lt.s32.totalorder %v5749_v48, 2 }
 0x277   : > { %v1390_v56 = vsel %vm1388_vm12, %v4648_v0, %v1389_v4  ;;  %v1561_v21 = vadd.s32 536870912, %v1560_v40  ;;  %v1406_v1 = vadd.s32 1, %v4289_v60  ;;  %v1270_v19 = vcvt.s32.f32 %v1263_v27 }
 0x278   : > { %v1394_v38 = vsel %vm1387_vm13, %v1390_v56, %v1393_v43  ;;  %v1268_v61 = vand.u32 2147483647, %v1267_v2  ;;  %v1281_v44 = vadd.s32 3, %v1277_v35  ;;  %v1403_v33 = vand.u32 8388607, %v1396_v28 }
 0x279   : > { %v1395_v52 = vsel %vm1384_vm7, nan, %v1394_v38  ;;  %v1562_v37 = vshrl.u32 %v1561_v21, 30  ;;  %vm1407_vm14 = vcmp.gt.s32.totalorder %v1406_v1, 0  ;;  %v5831_v10 = vadd.f32 %v5778_v47, %v713_v22 }
 0x27a   : > { %4105 = vst [vmem:[%s5525_s20 + $0x28] sm:$0xff] %v1395_v52  ;;  %v1271_v29 = vmul.f32 %v1270_v19, %v1268_v61  ;;  %v1408_v48 = vsel %vm1407_vm14, %v1406_v1, 0  ;;  %vm5835_vm15 = vcmp.le.f32.partialorder %v1500_v24, 0.7853982  ;;  %vm1502_vm0 = vcmp.lt.s32.totalorder %v5667_v36, 0 }
 0x27b   : > { %v1563_v34 = vshll.u32 %v1562_v37, 30  ;;  %v1410_v58 = vand.u32 31, %v1408_v48  ;;  %v5840_v31 = vand.u32 3, %v1281_v44  ;;  %v5843_v12 = vadd.s32 %v5787_v62, %v5797_v45 }
 0x27c   : > { %v1272_v18 = vxor.u32 2147483648, %v1271_v29  ;;  %v676_v25 = vsel %vm5228_vm8, %v5827_v53, %v5213_v5  ;;  %v1586_v24 = vsub.s32 4, %v1562_v37  ;;  %v1404_v46 = vor.u32 8388608, %v1403_v33 }
 0x27d   : > { %v5849_v42 = vsub.s32 %v1560_v40, %v1563_v34  ;;  %v1411_v6 = vsub.s32 32, %v1410_v58  ;;  %v5853_v0 = vshrl.u32 %v1408_v48, 5  ;;  %v1413_v26 = vshll.u32 %v4923_v59, %v1410_v58 }
 0x27e   : > { %v1273_v39 = vsel %vm1190_vm1, %v1272_v18, %v1271_v29  ;;  %v1711_v62 = vand.u32 2139095040, %v5831_v10  ;;  %v1416_v57 = vshll.u32 %v4924_v63, %v1410_v58  ;;  %v1419_v55 = vshll.u32 %v4925_v9, %v1410_v58 }
 0x27f   : > { %v1276_v45 = vsel %vm5792_vm6, %v5579_v32, %v1273_v39  ;;  %v1566_v41 = vsub.s32 0, %v5849_v42  ;;  %v1414_v27 = vshrl.u32 %v4924_v63, %v1411_v6  ;;  %v1417_v49 = vshrl.u32 %v4925_v9, %v1411_v6 }
 0x280   : > { %4651 = vcosq.f32 %v1276_v45  ;;  %v1420_v51 = vshrl.u32 %v4926_v14, %v1411_v6  ;;  %v1587_v54 = vsel %vm1502_vm0, %v1586_v24, %v1562_v37  ;;  %v1422_v35 = vshll.u32 %v4926_v14, %v1410_v58 }
 0x281   : > { %4653 = vsinq.f32 %v1276_v45  ;;  %v4294_v4 = vmin.u32 %v1566_v41, %v5849_v42  ;;  %v1415_v40 = vor.u32 %v1414_v27, %v1413_v26  ;;  %v1418_v60 = vor.u32 %v1417_v49, %v1416_v57 }
 0x282   : > { %v1421_v43 = vor.u32 %v1420_v51, %v1419_v55  ;;  %v1423_v2 = vshrl.u32 %v4927_v20, %v1411_v6  ;;  %v5871_v56 = vshll.u32 %v1404_v46, 8  ;;  %v1708_v21 = vand.u32 2147483647, %v5831_v10 }
 0x283   : > { %v1568_v22 = vclz %v4294_v4  ;;  %v1712_v1 = vshrl.u32 %v1711_v62, 23  ;;  %vm1287_vm1 = vcmp.eq.s32.totalorder %v5840_v31, 2  ;;  %v1589_v38 = vsel %vm5835_vm15, 0, %v1587_v54 }
 0x284   : > { %v1424_v61 = vor.u32 %v1423_v2, %v1422_v35  ;;  %v1425_v19 = vshll.u32 %v4927_v20, %v1410_v58  ;;  %v1426_v44 = vshrl.u32 %v4928_v30, %v1411_v6  ;;  %vm1284_vm2 = vcmp.eq.s32.totalorder %v5840_v31, 0 }
 0x285   : > { %v4295_v52 = vadd.s32 4294967294, %v1568_v22  ;;  %v1412_v37 = vshrl.u32 %v4923_v59, %v1411_v6  ;;  %vm1428_vm4 = vcmp.lt.s32.totalorder %v5853_v0, 1  ;;  %vm1431_vm5 = vcmp.lt.s32.totalorder %v5853_v0, 4 }
 0x286   : > { %vm1283_vm3 = vcmp.lt.s32.totalorder %v5840_v31, 2  ;;  %v1427_v33 = vor.u32 %v1426_v44, %v1425_v19  ;;  %vm1429_vm9 = vcmp.lt.s32.totalorder %v5853_v0, 2  ;;  %v1433_v29 = vsel %vm1431_vm5, %v1421_v43, 2102212464 }
 0x287   : > { %v1436_v48 = vsel %vm1428_vm4, %v1415_v40, %v1418_v60  ;;  %vm1280_vm6 = vweird.f32 %v5579_v32  ;;  %vm4296_vm7 = vcmp.lt.s32.totalorder %v4295_v52, 0  ;;  %vm1430_vm10 = vcmp.lt.s32.totalorder %v5853_v0, 3 }
 0x288   : > { %v1432_v34 = vsel %vm1428_vm4, %v1412_v37, %v1415_v40  ;;  %v1437_v58 = vsel %vm1431_vm5, %v1424_v61, 920167782  ;;  %v1571_v18 = vsel %vm4296_vm7, 0, %v4295_v52  ;;  %v1440_v46 = vsel %vm1428_vm4, %v1418_v60, %v1421_v43 }
 0x289   : > { %v1438_v24 = vsel %vm1430_vm10, %v1421_v43, %v1437_v58  ;;  %v1441_v6 = vsel %vm1431_vm5, %v1427_v33, 1326507024  ;;  %v1572_v39 = vsub.s32 32, %v1571_v18  ;;  %v1576_v26 = vsub.s32 4294967266, %v1571_v18 }
 0x28a   : > { %v1434_v62 = vsel %vm1430_vm10, %v1418_v60, %v1433_v29  ;;  %v1439_v45 = vsel %vm1429_vm9, %v1436_v48, %v1438_v24  ;;  %v4652_v41 = vpop.eup %4651  ;;  %v1573_v57 = vshll.u32 %v5849_v42, %v1571_v18  ;;  %v1442_v55 = vsel %vm1430_vm10, %v1424_v61, %v1441_v6 }
 0x28b   : > { %v5891_v27 = vmul.u32.u64.low %v5871_v56, %v1439_v45  ;;  %v5892_v49 = vmul.u32.u64.high %v5871_v56, %v1439_v45, %v5891_v27  ;;  %v4654_v51 = vpop.eup %4653  ;;  %v1288_v4 = vxor.u32 2147483648, %v4652_v41  ;;  %v1574_v54 = vshrl.u32 %v5843_v12, %v1572_v39 }
 0x28c   : > { %v1577_v35 = vadd.s32 127, %v1576_v26  ;;  %v1443_v40 = vsel %vm1429_vm9, %v1440_v46, %v1442_v55  ;;  %v1285_v60 = vxor.u32 2147483648, %v4654_v51  ;;  %v4301_v42 = vadd.s32 4294967169, %v1712_v1 }
 0x28d   : > { %v5899_v43 = vmul.u32.u64.low %v5871_v56, %v1443_v40  ;;  %v5900_v2 = vmul.u32.u64.high %v5871_v56, %v1443_v40, %v5899_v43  ;;  %v1289_v22 = vsel %vm1287_vm1, %v1288_v4, %v4654_v51  ;;  %v1575_v61 = vor.u32 %v1574_v54, %v1573_v57 }
 0x28e   : > { %v1578_v19 = vshll.u32 %v1577_v35, 23  ;;  %v1435_v44 = vsel %vm1429_vm9, %v1432_v34, %v1434_v62  ;;  %v1286_v12 = vsel %vm1284_vm2, %v4652_v41, %v1285_v60  ;;  %v1454_v52 = vadd.s32 1, %v5892_v49 }
 0x28f   : > { %v1718_v37 = vadd.s32 1, %v4301_v42  ;;  %v712_v1 = vmul.f32 %v5763_v3, %v676_v25  ;;  %v1290_v33 = vsel %vm1283_vm3, %v1286_v12, %v1289_v22  ;;  %v1593_v48 = vadd.s32 3, %v1589_v38 }
 0x290   : > { %v1579_v29 = vor.u32 4788187, %v1578_v19  ;;  %v1715_v0 = vand.u32 8388607, %v1708_v21  ;;  %v1291_v34 = vsel %vm1280_vm6, nan, %v1290_v33  ;;  %v1451_v58 = vmul.u32 %v5871_v56, %v1435_v44 }
 0x291   : > { %vm1453_vm11 = vc.u32 %v5900_v2, %v5891_v27  ;;  %vm1719_vm12 = vcmp.gt.s32.totalorder %v1718_v37, 0  ;;  %4104 = vst [vmem:[%s5525_s20 + $0x20] sm:$0xff] %v1291_v34  ;;  %v1582_v53 = vcvt.s32.f32 %v1575_v61  ;;  %v5926_v46 = vand.u32 3, %v1593_v48 }
 0x292   : > { %v1580_v5 = vand.u32 2147483647, %v1579_v29  ;;  %v1455_v31 = vsel %vm1453_vm11, %v1454_v52, %v5892_v49  ;;  %v1720_v25 = vsel %vm1719_vm12, %v1718_v37, 0  ;;  %v1716_v6 = vor.u32 8388608, %v1715_v0 }
 0x293   : > { %v1456_v18 = vadd.s32 %v1455_v31, %v1451_v58  ;;  %v1722_v38 = vand.u32 31, %v1720_v25  ;;  %v5928_v39 = vshrl.u32 %v1720_v25, 5  ;;  %v5931_v26 = vadd.f32 %v5778_v47, %v712_v1  ;;  %v375_v31 = vpop.permute.xlu1 %374 }
 0x294   : > { %v1583_v24 = vmul.f32 %v1582_v53, %v1580_v5  ;;  %vm1398_vm13 = vcmp.lt.s32.totalorder %v5781_v23, 0  ;;  %v5951_v1 = vshll.u32 %v1716_v6, 8  ;;  %vm5956_vm14 = vcmp.le.f32.partialorder %v1396_v28, 0.7853982 }
 0x295   : > { %v1457_v32 = vadd.s32 536870912, %v1456_v18  ;;  %v1723_v56 = vsub.s32 32, %v1722_v38  ;;  %v1725_v45 = vshll.u32 %v4923_v59, %v1722_v38  ;;  %v1728_v41 = vshll.u32 %v4924_v63, %v1722_v38 }
 0x296   : > { %v1584_v62 = vxor.u32 2147483648, %v1583_v24  ;;  %v1731_v57 = vshll.u32 %v4925_v9, %v1722_v38  ;;  %v1734_v4 = vshll.u32 %v4926_v14, %v1722_v38  ;;  %v1737_v61 = vshll.u32 %v4927_v20, %v1722_v38 }
 0x297   : > { %v1458_v55 = vshrl.u32 %v1457_v32, 30  ;;  %v1726_v49 = vshrl.u32 %v4924_v63, %v1723_v56  ;;  %v1729_v51 = vshrl.u32 %v4925_v9, %v1723_v56  ;;  %v1732_v35 = vshrl.u32 %v4926_v14, %v1723_v56 }
 0x298   : > { %v1585_v54 = vsel %vm1502_vm0, %v1584_v62, %v1583_v24  ;;  %v1735_v40 = vshrl.u32 %v4927_v20, %v1723_v56  ;;  %v1738_v60 = vshrl.u32 %v4928_v30, %v1723_v56  ;;  %v1607_v33 = vand.u32 2139095040, %v5931_v26 }
 0x299   : > { %v1588_v43 = vsel %vm5835_vm15, %v5667_v36, %v1585_v54  ;;  %v1459_v42 = vshll.u32 %v1458_v55, 30  ;;  %v1727_v22 = vor.u32 %v1726_v49, %v1725_v45  ;;  %v1730_v19 = vor.u32 %v1729_v51, %v1728_v41 }
 0x29a   : > { %4655 = vcosq.f32 %v1588_v43  ;;  %v1733_v44 = vor.u32 %v1732_v35, %v1731_v57  ;;  %v1736_v12 = vor.u32 %v1735_v40, %v1734_v4  ;;  %v1739_v37 = vor.u32 %v1738_v60, %v1737_v61 }
 0x29b   : > { %4657 = vsinq.f32 %v1588_v43  ;;  %v5948_v52 = vsub.s32 %v1456_v18, %v1459_v42  ;;  %v1724_v48 = vshrl.u32 %v4923_v59, %v1723_v56  ;;  %vm1740_vm15 = vcmp.lt.s32.totalorder %v5928_v39, 1 }
 0x29c   : > { %vm1743_vm0 = vcmp.lt.s32.totalorder %v5928_v39, 4  ;;  %vm1599_vm1 = vcmp.eq.s32.totalorder %v5926_v46, 2  ;;  %vm1742_vm2 = vcmp.lt.s32.totalorder %v5928_v39, 3  ;;  %v1748_v34 = vsel %vm1740_vm15, %v1727_v22, %v1730_v19 }
 0x29d   : > { %v1462_v29 = vsub.s32 0, %v5948_v52  ;;  %v1745_v0 = vsel %vm1743_vm0, %v1733_v44, 2102212464  ;;  %v1749_v28 = vsel %vm1743_vm0, %v1736_v12, 920167782  ;;  %vm1596_vm4 = vcmp.eq.s32.totalorder %v5926_v46, 0 }
 0x29e   : > { %v1482_v5 = vsub.s32 4, %v1458_v55  ;;  %vm1741_vm5 = vcmp.lt.s32.totalorder %v5928_v39, 2  ;;  %v1750_v53 = vsel %vm1742_vm2, %v1733_v44, %v1749_v28  ;;  %vm1595_vm3 = vcmp.lt.s32.totalorder %v5926_v46, 2 }
 0x29f   : > { %v4290_v58 = vmin.u32 %v1462_v29, %v5948_v52  ;;  %v1751_v25 = vsel %vm1741_vm5, %v1748_v34, %v1750_v53  ;;  %v1752_v18 = vsel %vm1740_vm15, %v1730_v19, %v1733_v44  ;;  %v1753_v38 = vsel %vm1743_vm0, %v1739_v37, 1326507024 }
 0x2a0   : > { %v1608_v24 = vshrl.u32 %v1607_v33, 23  ;;  %vm1592_vm9 = vweird.f32 %v5667_v36  ;;  %v1744_v32 = vsel %vm1740_vm15, %v1724_v48, %v1727_v22  ;;  %v1746_v56 = vsel %vm1742_vm2, %v1730_v19, %v1745_v0 }
 0x2a1   : > { %v1464_v6 = vclz %v4290_v58  ;;  %v1604_v62 = vand.u32 2147483647, %v5931_v26  ;;  %v1754_v45 = vsel %vm1742_vm2, %v1736_v12, %v1753_v38  ;;  %v679_v49 = vsel %vm5228_vm8, %v375_v31, %v5215_v7 }
 0x2a2   : > { %v5987_v41 = vmul.u32.u64.low %v5951_v1, %v1751_v25  ;;  %v5988_v57 = vmul.u32.u64.high %v5951_v1, %v1751_v25, %v5987_v41  ;;  %v1483_v4 = vsel %vm1398_vm13, %v1482_v5, %v1458_v55  ;;  %v1755_v54 = vsel %vm1741_vm5, %v1752_v18, %v1754_v45 }
 0x2a3   : > { %v4291_v51 = vadd.s32 4294967294, %v1464_v6  ;;  %v4297_v35 = vadd.s32 4294967169, %v1608_v24  ;;  %v1452_v60 = vadd.s32 %v5891_v27, %v5900_v2  ;;  %v1747_v43 = vsel %vm1741_vm5, %v1744_v32, %v1746_v56 }
 0x2a4   : > { %v4656_v40 = vpop.eup %4655  ;;  %v6003_v42 = vmul.u32.u64.low %v5951_v1, %v1755_v54  ;;  %v6004_v22 = vmul.u32.u64.high %v5951_v1, %v1755_v54, %v6003_v42  ;;  %v1611_v55 = vand.u32 8388607, %v1604_v62  ;;  %v1485_v37 = vsel %vm5956_vm14, 0, %v1483_v4 }
 0x2a5   : > { %v4658_v7 = vpop.eup %4657  ;;  %v1600_v61 = vxor.u32 2147483648, %v4656_v40  ;;  %vm4292_vm6 = vcmp.lt.s32.totalorder %v4291_v51, 0  ;;  %v1614_v19 = vadd.s32 1, %v4297_v35  ;;  %v1766_v27 = vadd.s32 1, %v5988_v57 }
 0x2a6   : > { %v1597_v44 = vxor.u32 2147483648, %v4658_v7  ;;  %v1467_v12 = vsel %vm4292_vm6, 0, %v4291_v51  ;;  %v1763_v29 = vmul.u32 %v5951_v1, %v1747_v43  ;;  %vm1765_vm7 = vc.u32 %v6004_v22, %v5987_v41 }
 0x2a7   : > { %v1601_v2 = vsel %vm1599_vm1, %v1600_v61, %v4658_v7  ;;  %v1468_v39 = vsub.s32 32, %v1467_v12  ;;  %v1472_v33 = vsub.s32 4294967266, %v1467_v12  ;;  %v1469_v0 = vshll.u32 %v5948_v52, %v1467_v12 }
 0x2a8   : > { %v1598_v48 = vsel %vm1596_vm4, %v4656_v40, %v1597_v44  ;;  %vm1615_vm10 = vcmp.gt.s32.totalorder %v1614_v19, 0  ;;  %v1767_v5 = vsel %vm1765_vm7, %v1766_v27, %v5988_v57  ;;  %v715_v25 = vmul.f32 %v5763_v3, %v679_v49 }
 0x2a9   : > { %v1602_v34 = vsel %vm1595_vm3, %v1598_v48, %v1601_v2  ;;  %v1470_v28 = vshrl.u32 %v1452_v60, %v1468_v39  ;;  %v1473_v58 = vadd.s32 127, %v1472_v33  ;;  %v1768_v1 = vadd.s32 %v1767_v5, %v1763_v29 }
 0x2aa   : > { %v1603_v53 = vsel %vm1592_vm9, nan, %v1602_v34  ;;  %v1616_v31 = vsel %vm1615_vm10, %v1614_v19, 0  ;;  %v1489_v32 = vadd.s32 3, %v1485_v37  ;;  %v1612_v51 = vor.u32 8388608, %v1611_v55 }
 0x2ab   : > { %4107 = vst [vmem:[%s5525_s20 + $0x38] sm:$0xff] %v1603_v53  ;;  %v1471_v52 = vor.u32 %v1470_v28, %v1469_v0  ;;  %v1474_v18 = vshll.u32 %v1473_v58, 23  ;;  %v1618_v38 = vand.u32 31, %v1616_v31  ;;  %v1769_v24 = vadd.s32 536870912, %v1768_v1 }
 0x2ac   : > { %v6029_v57 = vadd.f32 %v5778_v47, %v715_v25  ;;  %v1617_v7 = vshrl.u32 %v1616_v31, 5  ;;  %v6043_v33 = vand.u32 3, %v1489_v32  ;;  %v6047_v0 = vshll.u32 %v1612_v51, 8 }
 0x2ad   : > { %v1475_v6 = vor.u32 4788187, %v1474_v18  ;;  %v1619_v46 = vsub.s32 32, %v1618_v38  ;;  %v1478_v56 = vcvt.s32.f32 %v1471_v52  ;;  %v6026_v45 = vshrl.u32 %v1769_v24, 30 }
 0x2ae   : > { %v1621_v4 = vshll.u32 %v4923_v59, %v1618_v38  ;;  %v1624_v40 = vshll.u32 %v4924_v63, %v1618_v38  ;;  %v1627_v61 = vshll.u32 %v4925_v9, %v1618_v38  ;;  %v1630_v55 = vshll.u32 %v4926_v14, %v1618_v38 }
 0x2af   : > { %v1476_v36 = vand.u32 2147483647, %v1475_v6  ;;  %v1622_v49 = vshrl.u32 %v4924_v63, %v1619_v46  ;;  %v1625_v54 = vshrl.u32 %v4925_v9, %v1619_v46  ;;  %v1771_v35 = vshll.u32 %v6026_v45, 30 }
 0x2b0   : > { %v1628_v60 = vshrl.u32 %v4926_v14, %v1619_v46  ;;  %v1631_v43 = vshrl.u32 %v4927_v20, %v1619_v46  ;;  %v1634_v39 = vshrl.u32 %v4928_v30, %v1619_v46  ;;  %v1633_v48 = vshll.u32 %v4927_v20, %v1618_v38 }
 0x2b1   : > { %v1479_v42 = vmul.f32 %v1478_v56, %v1476_v36  ;;  %v6040_v19 = vsub.s32 %v1768_v1, %v1771_v35  ;;  %v1623_v44 = vor.u32 %v1622_v49, %v1621_v4  ;;  %v1626_v12 = vor.u32 %v1625_v54, %v1624_v40 }
 0x2b2   : > { %v1629_v27 = vor.u32 %v1628_v60, %v1627_v61  ;;  %v1632_v2 = vor.u32 %v1631_v43, %v1630_v55  ;;  %vm1710_vm11 = vcmp.lt.s32.totalorder %v5831_v10, 0  ;;  %v1620_v28 = vshrl.u32 %v4923_v59, %v1619_v46 }
 0x2b3   : > { %v1480_v37 = vxor.u32 2147483648, %v1479_v42  ;;  %v1774_v29 = vsub.s32 0, %v6040_v19  ;;  %vm1636_vm12 = vcmp.lt.s32.totalorder %v1617_v7, 1  ;;  %v1919_v58 = vand.u32 2139095040, %v6029_v57 }
 0x2b4   : > { %v1635_v1 = vor.u32 %v1634_v39, %v1633_v48  ;;  %vm1639_vm15 = vcmp.lt.s32.totalorder %v1617_v7, 4  ;;  %v1644_v25 = vsel %vm1636_vm12, %v1623_v44, %v1626_v12  ;;  %v1794_v38 = vsub.s32 4, %v6026_v45 }
 0x2b5   : > { %v1481_v34 = vsel %vm1398_vm13, %v1480_v37, %v1479_v42  ;;  %v4302_v53 = vmin.u32 %v1774_v29, %v6040_v19  ;;  %v1641_v31 = vsel %vm1639_vm15, %v1629_v27, 2102212464  ;;  %v1645_v52 = vsel %vm1639_vm15, %v1632_v2, 920167782 }
 0x2b6   : > { %v1484_v5 = vsel %vm5956_vm14, %v5781_v23, %v1481_v34  ;;  %vm1638_vm13 = vcmp.lt.s32.totalorder %v1617_v7, 3  ;;  %vm1637_vm0 = vcmp.lt.s32.totalorder %v1617_v7, 2  ;;  %v1640_v50 = vsel %vm1636_vm12, %v1620_v28, %v1623_v44 }
 0x2b7   : > { %4659 = vcosq.f32 %v1484_v5  ;;  %v1776_v18 = vclz %v4302_v53  ;;  %v1646_v24 = vsel %vm1638_vm13, %v1629_v27, %v1645_v52  ;;  %v1648_v6 = vsel %vm1636_vm12, %v1626_v12, %v1629_v27  ;;  %v371_v53 = vpop.permute.xlu0 %370 }
 0x2b8   : > { %4661 = vsinq.f32 %v1484_v5  ;;  %v1642_v46 = vsel %vm1638_vm13, %v1626_v12, %v1641_v31  ;;  %v1647_v56 = vsel %vm1637_vm0, %v1644_v25, %v1646_v24  ;;  %v1649_v51 = vsel %vm1639_vm15, %v1635_v1, 1326507024 }
 0x2b9   : > { %v4303_v32 = vadd.s32 4294967294, %v1776_v18  ;;  %v1650_v36 = vsel %vm1638_vm13, %v1632_v2, %v1649_v51  ;;  %v6067_v4 = vmul.u32.u64.low %v6047_v0, %v1647_v56  ;;  %v6068_v49 = vmul.u32.u64.high %v6047_v0, %v1647_v56, %v6067_v4 }
 0x2ba   : > { %v1920_v54 = vshrl.u32 %v1919_v58, 23  ;;  %vm6073_vm14 = vcmp.le.f32.partialorder %v1708_v21, 0.7853982  ;;  %v1764_v40 = vadd.s32 %v5987_v41, %v6004_v22  ;;  %v1651_v60 = vsel %vm1637_vm0, %v1648_v6, %v1650_v36 }
 0x2bb   : > { %vm4304_vm1 = vcmp.lt.s32.totalorder %v4303_v32, 0  ;;  %v6081_v42 = vmul.u32.u64.low %v6047_v0, %v1651_v60  ;;  %v6082_v61 = vmul.u32.u64.high %v6047_v0, %v1651_v60, %v6081_v42  ;;  %v1795_v21 = vsel %vm1710_vm11, %v1794_v38, %v6026_v45 }
 0x2bc   : > { %v1779_v43 = vsel %vm4304_vm1, 0, %v4303_v32  ;;  %v4309_v55 = vadd.s32 4294967169, %v1920_v54  ;;  %v1643_v37 = vsel %vm1637_vm0, %v1640_v50, %v1642_v46  ;;  %vm1491_vm2 = vcmp.lt.s32.totalorder %v6043_v33, 2 }
 0x2bd   : > { %v1780_v44 = vsub.s32 32, %v1779_v43  ;;  %v1784_v12 = vsub.s32 4294967266, %v1779_v43  ;;  %vm1492_vm4 = vcmp.eq.s32.totalorder %v6043_v33, 0  ;;  %v1662_v41 = vadd.s32 1, %v6068_v49 }
 0x2be   : > { %v1926_v22 = vadd.s32 1, %v4309_v55  ;;  %v1781_v27 = vshll.u32 %v6040_v19, %v1779_v43  ;;  %v1916_v29 = vand.u32 2147483647, %v6029_v57  ;;  %v1797_v34 = vsel %vm6073_vm14, 0, %v1795_v21 }
 0x2bf   : > { %v1782_v2 = vshrl.u32 %v1764_v40, %v1780_v44  ;;  %v1785_v39 = vadd.s32 127, %v1784_v12  ;;  %v1659_v45 = vmul.u32 %v6047_v0, %v1643_v37  ;;  %vm1661_vm5 = vc.u32 %v6082_v61, %v6067_v4 }
 0x2c0   : > { %vm1927_vm3 = vcmp.gt.s32.totalorder %v1926_v22, 0  ;;  %v1663_v19 = vsel %vm1661_vm5, %v1662_v41, %v6068_v49  ;;  %vm1495_vm9 = vcmp.eq.s32.totalorder %v6043_v33, 2  ;;  %v1801_v0 = vadd.s32 3, %v1797_v34 }
 0x2c1   : > { %v4660_v48 = vpop.eup %4659  ;;  %v1783_v58 = vor.u32 %v1782_v2, %v1781_v27  ;;  %v1786_v5 = vshll.u32 %v1785_v39, 23  ;;  %v1664_v31 = vadd.s32 %v1663_v19, %v1659_v45  ;;  %v1928_v25 = vsel %vm1927_vm3, %v1926_v22, 0 }
 0x2c2   : > { %v4662_v7 = vpop.eup %4661  ;;  %v1496_v28 = vxor.u32 2147483648, %v4660_v48  ;;  %v1923_v38 = vand.u32 8388607, %v1916_v29  ;;  %v1930_v6 = vand.u32 31, %v1928_v25  ;;  %v678_v32 = vsel %vm5228_vm8, %v371_v53, %v5217_v8 }
 0x2c3   : > { %v1493_v1 = vxor.u32 2147483648, %v4662_v7  ;;  %v1787_v18 = vor.u32 4788187, %v1786_v5  ;;  %v1665_v24 = vadd.s32 536870912, %v1664_v31  ;;  %vm1488_vm6 = vweird.f32 %v5781_v23 }
 0x2c4   : > { %v1497_v52 = vsel %vm1495_vm9, %v1496_v28, %v4662_v7  ;;  %v1790_v51 = vcvt.s32.f32 %v1783_v58  ;;  %v1931_v54 = vsub.s32 32, %v1930_v6  ;;  %v6111_v60 = vand.u32 3, %v1801_v0 }
 0x2c5   : > { %v1494_v50 = vsel %vm1492_vm4, %v4660_v48, %v1493_v1  ;;  %v1788_v56 = vand.u32 2147483647, %v1787_v18  ;;  %v1666_v49 = vshrl.u32 %v1665_v24, 30  ;;  %v1924_v43 = vor.u32 8388608, %v1923_v38 }
 0x2c6   : > { %v1498_v46 = vsel %vm1491_vm2, %v1494_v50, %v1497_v52  ;;  %v714_v42 = vmul.f32 %v5763_v3, %v678_v32  ;;  %v1933_v8 = vshll.u32 %v4923_v59, %v1930_v6  ;;  %v1934_v23 = vshrl.u32 %v4924_v63, %v1931_v54 }
 0x2c7   : > { %v1499_v36 = vsel %vm1488_vm6, nan, %v1498_v46  ;;  %v1791_v40 = vmul.f32 %v1790_v51, %v1788_v56  ;;  %v1667_v55 = vshll.u32 %v1666_v49, 30  ;;  %v1936_v33 = vshll.u32 %v4924_v63, %v1930_v6 }
 0x2c8   : > { %4106 = vst [vmem:[%s5525_s20 + $0x30] sm:$0xff] %v1499_v36  ;;  %v1937_v12 = vshrl.u32 %v4925_v9, %v1931_v54  ;;  %v1940_v21 = vshrl.u32 %v4926_v14, %v1931_v54  ;;  %v1943_v37 = vshrl.u32 %v4927_v20, %v1931_v54  ;;  %v1929_v22 = vshrl.u32 %v1928_v25, 5 }
 0x2c9   : > { %v1792_v44 = vxor.u32 2147483648, %v1791_v40  ;;  %v6120_v41 = vsub.s32 %v1664_v31, %v1667_v55  ;;  %v1939_v27 = vshll.u32 %v4925_v9, %v1930_v6  ;;  %v1942_v2 = vshll.u32 %v4926_v14, %v1930_v6 }
 0x2ca   : > { %vm1606_vm7 = vcmp.lt.s32.totalorder %v5931_v26, 0  ;;  %v1935_v48 = vor.u32 %v1934_v23, %v1933_v8  ;;  %v1938_v34 = vor.u32 %v1937_v12, %v1936_v33  ;;  %v6127_v45 = vshll.u32 %v1924_v43, 8 }
 0x2cb   : > { %v1793_v39 = vsel %vm1710_vm11, %v1792_v44, %v1791_v40  ;;  %v1670_v28 = vsub.s32 0, %v6120_v41  ;;  %v1941_v58 = vor.u32 %v1940_v21, %v1939_v27  ;;  %v1944_v5 = vor.u32 %v1943_v37, %v1942_v2  ;;  %v386_v40 = vpop.permute.xlu1 %385 }
 0x2cc   : > { %v1796_v7 = vsel %vm6073_vm14, %v5831_v10, %v1793_v39  ;;  %v1945_v19 = vshll.u32 %v4927_v20, %v1930_v6  ;;  %v1946_v53 = vshrl.u32 %v4928_v30, %v1931_v54  ;;  %v6136_v1 = vadd.f32 %v5778_v47, %v714_v42 }
 0x2cd   : > { %4663 = vcosq.f32 %v1796_v7  ;;  %vm6140_vm10 = vcmp.le.f32.partialorder %v1604_v62, 0.7853982  ;;  %v4298_v35 = vmin.u32 %v1670_v28, %v6120_v41  ;;  %vm1948_vm11 = vcmp.lt.s32.totalorder %v1929_v22, 1 }
 0x2ce   : > { %4665 = vsinq.f32 %v1796_v7  ;;  %vm1951_vm12 = vcmp.lt.s32.totalorder %v1929_v22, 4  ;;  %v1690_v25 = vsub.s32 4, %v1666_v49  ;;  %v1947_v52 = vor.u32 %v1946_v53, %v1945_v19 }
 0x2cf   : > { %v1956_v18 = vsel %vm1948_vm11, %v1935_v48, %v1938_v34  ;;  %v1957_v0 = vsel %vm1951_vm12, %v1944_v5, 920167782  ;;  %v1672_v38 = vclz %v4298_v35  ;;  %v1932_v50 = vshrl.u32 %v4923_v59, %v1931_v54 }
 0x2d0   : > { %vm1950_vm15 = vcmp.lt.s32.totalorder %v1929_v22, 3  ;;  %v1953_v24 = vsel %vm1951_vm12, %v1941_v58, 2102212464  ;;  %vm1949_vm13 = vcmp.lt.s32.totalorder %v1929_v22, 2  ;;  %v1960_v62 = vsel %vm1948_vm11, %v1938_v34, %v1941_v58 }
 0x2d1   : > { %v1958_v6 = vsel %vm1950_vm15, %v1941_v58, %v1957_v0  ;;  %v1961_v32 = vsel %vm1951_vm12, %v1947_v52, 1326507024  ;;  %vm1804_vm0 = vcmp.eq.s32.totalorder %v6111_v60, 0  ;;  %v4299_v46 = vadd.s32 4294967294, %v1672_v38 }
 0x2d2   : > { %v1952_v56 = vsel %vm1948_vm11, %v1932_v50, %v1935_v48  ;;  %v1959_v51 = vsel %vm1949_vm13, %v1956_v18, %v1958_v6  ;;  %v1962_v36 = vsel %vm1950_vm15, %v1944_v5, %v1961_v32  ;;  %vm1803_vm14 = vcmp.lt.s32.totalorder %v6111_v60, 2 }
 0x2d3   : > { %v1954_v43 = vsel %vm1950_vm15, %v1938_v34, %v1953_v24  ;;  %v1963_v54 = vsel %vm1949_vm13, %v1960_v62, %v1962_v36  ;;  %v6154_v42 = vmul.u32.u64.low %v6127_v45, %v1959_v51  ;;  %v6155_v55 = vmul.u32.u64.high %v6127_v45, %v1959_v51, %v6154_v42 }
 0x2d4   : > { %vm4300_vm1 = vcmp.lt.s32.totalorder %v4299_v46, 0  ;;  %v1691_v8 = vsel %vm1606_vm7, %v1690_v25, %v1666_v49  ;;  %v6161_v23 = vmul.u32.u64.low %v6127_v45, %v1963_v54  ;;  %v6162_v33 = vmul.u32.u64.high %v6127_v45, %v1963_v54, %v6161_v23 }
 0x2d5   : > { %vm1807_vm2 = vcmp.eq.s32.totalorder %v6111_v60, 2  ;;  %v1675_v44 = vsel %vm4300_vm1, 0, %v4299_v46  ;;  %v1815_v12 = vand.u32 2139095040, %v6136_v1  ;;  %v681_v21 = vsel %vm5228_vm8, %v386_v40, %v5219_v11 }
 0x2d6   : > { %v1660_v37 = vadd.s32 %v6067_v4, %v6082_v61  ;;  %v1676_v27 = vsub.s32 32, %v1675_v44  ;;  %v1680_v2 = vsub.s32 4294967266, %v1675_v44  ;;  %v1955_v49 = vsel %vm1949_vm13, %v1952_v56, %v1954_v43 }
 0x2d7   : > { %v4664_v39 = vpop.eup %4663  ;;  %v1693_v48 = vsel %vm6140_vm10, 0, %v1691_v8  ;;  %v1974_v34 = vadd.s32 1, %v6155_v55  ;;  %v1812_v7 = vand.u32 2147483647, %v6136_v1  ;;  %v1816_v28 = vshrl.u32 %v1815_v12, 23 }
 0x2d8   : > { %v4666_v58 = vpop.eup %4665  ;;  %v1808_v5 = vxor.u32 2147483648, %v4664_v39  ;;  %v1677_v11 = vshll.u32 %v6120_v41, %v1675_v44  ;;  %v1678_v19 = vshrl.u32 %v1660_v37, %v1676_v27  ;;  %v1681_v53 = vadd.s32 127, %v1680_v2 }
 0x2d9   : > { %v1805_v4 = vxor.u32 2147483648, %v4666_v58  ;;  %v1971_v61 = vmul.u32 %v6127_v45, %v1955_v49  ;;  %vm1973_vm4 = vc.u32 %v6162_v33, %v6154_v42  ;;  %v4305_v22 = vadd.s32 4294967169, %v1816_v28 }
 0x2da   : > { %v1809_v35 = vsel %vm1807_vm2, %v1808_v5, %v4666_v58  ;;  %v1679_v25 = vor.u32 %v1678_v19, %v1677_v11  ;;  %v1682_v52 = vshll.u32 %v1681_v53, 23  ;;  %v1975_v18 = vsel %vm1973_vm4, %v1974_v34, %v6155_v55 }
 0x2db   : > { %v1806_v41 = vsel %vm1804_vm0, %v4664_v39, %v1805_v4  ;;  %v1976_v0 = vadd.s32 %v1975_v18, %v1971_v61  ;;  %v1822_v38 = vadd.s32 1, %v4305_v22  ;;  %v717_v50 = vmul.f32 %v5763_v3, %v681_v21 }
 0x2dc   : > { %vm1800_vm5 = vweird.f32 %v5831_v10  ;;  %v1810_v45 = vsel %vm1803_vm14, %v1806_v41, %v1809_v35  ;;  %v1683_v24 = vor.u32 4788187, %v1682_v52  ;;  %v1697_v62 = vadd.s32 3, %v1693_v48 }
 0x2dd   : > { %v1811_v6 = vsel %vm1800_vm5, nan, %v1810_v45  ;;  %v1977_v32 = vadd.s32 536870912, %v1976_v0  ;;  %vm1823_vm3 = vcmp.gt.s32.totalorder %v1822_v38, 0  ;;  %v1686_v56 = vcvt.s32.f32 %v1679_v25 }
 0x2de   : > { %4109 = vst [vmem:[%s5525_s20 + $0x48] sm:$0xff] %v1811_v6  ;;  %v1684_v46 = vand.u32 2147483647, %v1683_v24  ;;  %v1819_v51 = vand.u32 8388607, %v1812_v7  ;;  %v1824_v36 = vsel %vm1823_vm3, %v1822_v38, 0  ;;  %v6195_v10 = vadd.f32 %v5778_v47, %v717_v50 }
 0x2df   : > { %v6192_v40 = vshrl.u32 %v1977_v32, 30  ;;  %v1826_v3 = vand.u32 31, %v1824_v36  ;;  %v6198_v8 = vand.u32 3, %v1697_v62  ;;  %v1825_v12 = vshrl.u32 %v1824_v36, 5 }
 0x2e0   : > { %v1687_v60 = vmul.f32 %v1686_v56, %v1684_v46  ;;  %v1820_v23 = vor.u32 8388608, %v1819_v51  ;;  %v2127_v37 = vand.u32 2139095040, %v6195_v10  ;;  %v382_v46 = vpop.permute.xlu0 %381  ;;  %vm1696_vm13 = vweird.f32 %v5931_v26 }
 0x2e1   : > { %v1979_v43 = vshll.u32 %v6192_v40, 30  ;;  %v1827_v54 = vsub.s32 32, %v1826_v3  ;;  %v1829_v47 = vshll.u32 %v4923_v59, %v1826_v3  ;;  %v1832_v34 = vshll.u32 %v4924_v63, %v1826_v3 }
 0x2e2   : > { %v1688_v55 = vxor.u32 2147483648, %v1687_v60  ;;  %v1835_v28 = vshll.u32 %v4925_v9, %v1826_v3  ;;  %v1838_v5 = vshll.u32 %v4926_v14, %v1826_v3  ;;  %v1841_v31 = vshll.u32 %v4927_v20, %v1826_v3 }
 0x2e3   : > { %v6200_v44 = vsub.s32 %v1976_v0, %v1979_v43  ;;  %v1830_v21 = vshrl.u32 %v4924_v63, %v1827_v54  ;;  %v1833_v2 = vshrl.u32 %v4925_v9, %v1827_v54  ;;  %v1836_v49 = vshrl.u32 %v4926_v14, %v1827_v54 }
 0x2e4   : > { %v1689_v27 = vsel %vm1606_vm7, %v1688_v55, %v1687_v60  ;;  %v1839_v11 = vshrl.u32 %v4927_v20, %v1827_v54  ;;  %v1842_v22 = vshrl.u32 %v4928_v30, %v1827_v54  ;;  %v6220_v35 = vshll.u32 %v1820_v23, 8 }
 0x2e5   : > { %v1692_v39 = vsel %vm6140_vm10, %v5931_v26, %v1689_v27  ;;  %v1982_v48 = vsub.s32 0, %v6200_v44  ;;  %v1831_v58 = vor.u32 %v1830_v21, %v1829_v47  ;;  %v1834_v53 = vor.u32 %v1833_v2, %v1832_v34 }
 0x2e6   : > { %4667 = vcosq.f32 %v1692_v39  ;;  %v1837_v4 = vor.u32 %v1836_v49, %v1835_v28  ;;  %v1840_v61 = vor.u32 %v1839_v11, %v1838_v5  ;;  %v1828_v52 = vshrl.u32 %v4923_v59, %v1827_v54 }
 0x2e7   : > { %4669 = vsinq.f32 %v1692_v39  ;;  %v4310_v19 = vmin.u32 %v1982_v48, %v6200_v44  ;;  %vm1844_vm9 = vcmp.lt.s32.totalorder %v1825_v12, 1  ;;  %v2128_v18 = vshrl.u32 %v2127_v37, 23 }
 0x2e8   : > { %vm1703_vm6 = vcmp.eq.s32.totalorder %v6198_v8, 2  ;;  %v1843_v41 = vor.u32 %v1842_v22, %v1841_v31  ;;  %vm1845_vm7 = vcmp.lt.s32.totalorder %v1825_v12, 2  ;;  %vm1846_vm10 = vcmp.lt.s32.totalorder %v1825_v12, 3 }
 0x2e9   : > { %v1984_v25 = vclz %v4310_v19  ;;  %vm1847_vm11 = vcmp.lt.s32.totalorder %v1825_v12, 4  ;;  %vm1700_vm12 = vcmp.eq.s32.totalorder %v6198_v8, 0  ;;  %v1852_v50 = vsel %vm1844_vm9, %v1831_v58, %v1834_v53 }
 0x2ea   : > { %v1849_v38 = vsel %vm1847_vm11, %v1837_v4, 2102212464  ;;  %v1853_v45 = vsel %vm1847_vm11, %v1840_v61, 920167782  ;;  %vm1699_vm15 = vcmp.lt.s32.totalorder %v6198_v8, 2  ;;  %v1848_v24 = vsel %vm1844_vm9, %v1828_v52, %v1831_v58 }
 0x2eb   : > { %v4311_v0 = vadd.s32 4294967294, %v1984_v25  ;;  %v1854_v6 = vsel %vm1846_vm10, %v1837_v4, %v1853_v45  ;;  %v1856_v62 = vsel %vm1844_vm9, %v1834_v53, %v1837_v4  ;;  %v1857_v32 = vsel %vm1847_vm11, %v1843_v41, 1326507024  ;;  %v6262_v52 = vld [vmem:[#allocation5] ss:$0 sm:$0xff] }
 0x2ec   : > { %vm1918_vm0 = vcmp.lt.s32.totalorder %v6029_v57, 0  ;;  %v1850_v56 = vsel %vm1846_vm10, %v1834_v53, %v1849_v38  ;;  %v1855_v51 = vsel %vm1845_vm7, %v1852_v50, %v1854_v6  ;;  %v1858_v36 = vsel %vm1846_vm10, %v1840_v61, %v1857_v32 }
 0x2ed   : > { %vm4312_vm14 = vcmp.lt.s32.totalorder %v4311_v0, 0  ;;  %v1859_v60 = vsel %vm1845_vm7, %v1856_v62, %v1858_v36  ;;  %v6234_v43 = vmul.u32.u64.low %v6220_v35, %v1855_v51  ;;  %v6235_v54 = vmul.u32.u64.high %v6220_v35, %v1855_v51, %v6234_v43 }
 0x2ee   : > { %v1987_v3 = vsel %vm4312_vm14, 0, %v4311_v0  ;;  %v1972_v55 = vadd.s32 %v6154_v42, %v6162_v33  ;;  %v680_v37 = vsel %vm5228_vm8, %v382_v46, %v5221_v13  ;;  %v1851_v47 = vsel %vm1845_vm7, %v1848_v24, %v1850_v56  ;;  %v6281_v46 = vld [vmem:[#allocation5 + $0x2] ss:$0 sm:$0xff] }
 0x2ef   : > { %v1988_v23 = vsub.s32 32, %v1987_v3  ;;  %v1992_v21 = vsub.s32 4294967266, %v1987_v3  ;;  %v6245_v2 = vmul.u32.u64.low %v6220_v35, %v1859_v60  ;;  %v6246_v49 = vmul.u32.u64.high %v6220_v35, %v1859_v60, %v6245_v2 }
 0x2f0   : > { %v4668_v27 = vpop.eup %4667  ;;  %v4317_v39 = vadd.s32 4294967169, %v2128_v18  ;;  %v1989_v28 = vshll.u32 %v6200_v44, %v1987_v3  ;;  %v2002_v5 = vsub.s32 4, %v6192_v40  ;;  %v1870_v11 = vadd.s32 1, %v6235_v54 }
 0x2f1   : > { %v4670_v48 = vpop.eup %4669  ;;  %v1704_v34 = vxor.u32 2147483648, %v4668_v27  ;;  %v1990_v58 = vshrl.u32 %v1972_v55, %v1988_v23  ;;  %v1993_v42 = vadd.s32 127, %v1992_v21  ;;  %v2124_v4 = vand.u32 2147483647, %v6195_v10 }
 0x2f2   : > { %v1701_v33 = vxor.u32 2147483648, %v4670_v48  ;;  %v2134_v13 = vadd.s32 1, %v4317_v39  ;;  %v1867_v44 = vmul.u32 %v6220_v35, %v1851_v47  ;;  %vm1869_vm1 = vc.u32 %v6246_v49, %v6234_v43 }
 0x2f3   : > { %v1705_v12 = vsel %vm1703_vm6, %v1704_v34, %v4670_v48  ;;  %v1991_v19 = vor.u32 %v1990_v58, %v1989_v28  ;;  %v1994_v53 = vshll.u32 %v1993_v42, 23  ;;  %v1871_v25 = vsel %vm1869_vm1, %v1870_v11, %v6235_v54 }
 0x2f4   : > { %v1702_v61 = vsel %vm1700_vm12, %v4668_v27, %v1701_v33  ;;  %vm2135_vm2 = vcmp.gt.s32.totalorder %v2134_v13, 0  ;;  %v716_v18 = vmul.f32 %v6262_v52, %v680_v37  ;;  %v2003_v35 = vsel %vm1918_vm0, %v2002_v5, %v6192_v40 }
 0x2f5   : > { %v1706_v31 = vsel %vm1699_vm15, %v1702_v61, %v1705_v12  ;;  %v1995_v22 = vor.u32 4788187, %v1994_v53  ;;  %v1872_v0 = vadd.s32 %v1871_v25, %v1867_v44  ;;  %v2136_v38 = vsel %vm2135_vm2, %v2134_v13, 0 }
 0x2f6   : > { %v1707_v41 = vsel %vm1696_vm13, nan, %v1706_v31  ;;  %v1998_v8 = vcvt.s32.f32 %v1991_v19  ;;  %v2138_v45 = vand.u32 31, %v2136_v38  ;;  %vm6273_vm4 = vcmp.le.f32.partialorder %v1916_v29, 0.7853982 }
 0x2f7   : > { %4108 = vst [vmem:[%s5525_s20 + $0x40] sm:$0xff] %v1707_v41  ;;  %v1996_v50 = vand.u32 2147483647, %v1995_v22  ;;  %v1873_v6 = vadd.s32 536870912, %v1872_v0  ;;  %v2131_v26 = vand.u32 8388607, %v2124_v4  ;;  %v6284_v56 = vadd.f32 %v6281_v46, %v716_v18 }
 0x2f8   : > { %v2005_v40 = vsel %vm6273_vm4, 0, %v2003_v35  ;;  %v2139_v32 = vsub.s32 32, %v2138_v45  ;;  %v2137_v29 = vshrl.u32 %v2136_v38, 5  ;;  %v2141_v36 = vshll.u32 %v4923_v59, %v2138_v45 }
 0x2f9   : > { %v1999_v62 = vmul.f32 %v1998_v8, %v1996_v50  ;;  %v6286_v51 = vshrl.u32 %v1873_v6, 30  ;;  %v2144_v3 = vshll.u32 %v4924_v63, %v2138_v45  ;;  %v2147_v23 = vshll.u32 %v4925_v9, %v2138_v45 }
 0x2fa   : > { %v2142_v54 = vshrl.u32 %v4924_v63, %v2139_v32  ;;  %v2145_v55 = vshrl.u32 %v4925_v9, %v2139_v32  ;;  %v2148_v37 = vshrl.u32 %v4926_v14, %v2139_v32  ;;  %v2150_v27 = vshll.u32 %v4926_v14, %v2138_v45 }
 0x2fb   : > { %v2000_v60 = vxor.u32 2147483648, %v1999_v62  ;;  %v1875_v21 = vshll.u32 %v6286_v51, 30  ;;  %v2151_v47 = vshrl.u32 %v4927_v20, %v2139_v32  ;;  %v2153_v48 = vshll.u32 %v4927_v20, %v2138_v45 }
 0x2fc   : > { %v2143_v39 = vor.u32 %v2142_v54, %v2141_v36  ;;  %v2154_v34 = vshrl.u32 %v4928_v30, %v2139_v32  ;;  %v2146_v42 = vor.u32 %v2145_v55, %v2144_v3  ;;  %v2149_v33 = vor.u32 %v2148_v37, %v2147_v23 }
 0x2fd   : > { %v2001_v2 = vsel %vm1918_vm0, %v2000_v60, %v1999_v62  ;;  %v6304_v58 = vsub.s32 %v1872_v0, %v1875_v21  ;;  %v2132_v5 = vor.u32 8388608, %v2131_v26  ;;  %v2152_v11 = vor.u32 %v2151_v47, %v2150_v27 }
 0x2fe   : > { %v2004_v28 = vsel %vm6273_vm4, %v6029_v57, %v2001_v2  ;;  %v2155_v13 = vor.u32 %v2154_v34, %v2153_v48  ;;  %v2009_v12 = vadd.s32 3, %v2005_v40  ;;  %vm1814_vm5 = vcmp.lt.s32.totalorder %v6136_v1, 0 }
 0x2ff   : > { %4671 = vcosq.f32 %v2004_v28  ;;  %v1878_v19 = vsub.s32 0, %v6304_v58  ;;  %v2140_v53 = vshrl.u32 %v4923_v59, %v2139_v32  ;;  %vm2156_vm3 = vcmp.lt.s32.totalorder %v2137_v29, 1 }
 0x300   : > { %4673 = vsinq.f32 %v2004_v28  ;;  %vm2158_vm9 = vcmp.lt.s32.totalorder %v2137_v29, 3  ;;  %vm2159_vm6 = vcmp.lt.s32.totalorder %v2137_v29, 4  ;;  %v2023_v61 = vand.u32 2139095040, %v6284_v56 }
 0x301   : > { %v4306_v44 = vmin.u32 %v1878_v19, %v6304_v58  ;;  %v2160_v31 = vsel %vm2156_vm3, %v2140_v53, %v2143_v39  ;;  %v2161_v22 = vsel %vm2159_vm6, %v2149_v33, 2102212464  ;;  %v2164_v25 = vsel %vm2156_vm3, %v2143_v39, %v2146_v42 }
 0x302   : > { %v2162_v18 = vsel %vm2158_vm9, %v2146_v42, %v2161_v22  ;;  %v2165_v41 = vsel %vm2159_vm6, %v2152_v11, 920167782  ;;  %v2168_v35 = vsel %vm2156_vm3, %v2146_v42, %v2149_v33  ;;  %v2169_v0 = vsel %vm2159_vm6, %v2155_v13, 1326507024 }
 0x303   : > { %v2010_v38 = vand.u32 3, %v2009_v12  ;;  %v1880_v50 = vclz %v4306_v44  ;;  %v1898_v8 = vsub.s32 4, %v6286_v51  ;;  %v2172_v45 = vshll.u32 %v2132_v5, 8 }
 0x304   : > { %vm2157_vm7 = vcmp.lt.s32.totalorder %v2137_v29, 2  ;;  %v2166_v24 = vsel %vm2158_vm9, %v2149_v33, %v2165_v41  ;;  %v2170_v6 = vsel %vm2158_vm9, %v2152_v11, %v2169_v0  ;;  %v2024_v26 = vshrl.u32 %v2023_v61, 23  ;;  %v397_v29 = vpop.permute.xlu1 %396 }
 0x305   : > { %vm2008_vm10 = vweird.f32 %v6029_v57  ;;  %vm6318_vm11 = vcmp.le.f32.partialorder %v1812_v7, 0.7853982  ;;  %v4307_v40 = vadd.s32 4294967294, %v1880_v50  ;;  %v2163_v32 = vsel %vm2157_vm7, %v2160_v31, %v2162_v18 }
 0x306   : > { %v2167_v36 = vsel %vm2157_vm7, %v2164_v25, %v2166_v24  ;;  %v2171_v3 = vsel %vm2157_vm7, %v2168_v35, %v2170_v6  ;;  %vm2012_vm12 = vcmp.eq.s32.totalorder %v2010_v38, 0  ;;  %vm2015_vm15 = vcmp.eq.s32.totalorder %v2010_v38, 2 }
 0x307   : > { %v6322_v60 = vmul.u32.u64.low %v2172_v45, %v2171_v3  ;;  %v6323_v54 = vmul.u32.u64.high %v2172_v45, %v2171_v3, %v6322_v60  ;;  %v6325_v55 = vmul.u32.u64.low %v2172_v45, %v2167_v36  ;;  %v6326_v23 = vmul.u32.u64.high %v2172_v45, %v2167_v36, %v6325_v55 }
 0x308   : > { %vm4308_vm13 = vcmp.lt.s32.totalorder %v4307_v40, 0  ;;  %v4313_v21 = vadd.s32 4294967169, %v2024_v26  ;;  %v1868_v37 = vadd.s32 %v6234_v43, %v6246_v49  ;;  %v1899_v47 = vsel %vm1814_vm5, %v1898_v8, %v6286_v51  ;;  %v6345_v53 = vpop.permute.xlu1 %583 }
 0x309   : > { %v4672_v7 = vpop.eup %4671  ;;  %v1883_v27 = vsel %vm4308_vm13, 0, %v4307_v40  ;;  %v2020_v2 = vand.u32 2147483647, %v6284_v56  ;;  %v2179_v42 = vmul.u32 %v2172_v45, %v2163_v32  ;;  %vm2181_vm0 = vc.u32 %v6323_v54, %v6325_v55 }
 0x30a   : > { %v4674_v39 = vpop.eup %4673  ;;  %v2016_v48 = vxor.u32 2147483648, %v4672_v7  ;;  %v1884_v34 = vsub.s32 32, %v1883_v27  ;;  %v1888_v28 = vsub.s32 4294967266, %v1883_v27  ;;  %v1885_v5 = vshll.u32 %v6304_v58, %v1883_v27 }
 0x30b   : > { %v2013_v33 = vxor.u32 2147483648, %v4674_v39  ;;  %v2182_v43 = vadd.s32 1, %v6326_v23  ;;  %v2030_v13 = vadd.s32 1, %v4313_v21  ;;  %vm2011_vm14 = vcmp.lt.s32.totalorder %v2010_v38, 2 }
 0x30c   : > { %v2017_v49 = vsel %vm2015_vm15, %v2016_v48, %v4674_v39  ;;  %v1886_v11 = vshrl.u32 %v1868_v37, %v1884_v34  ;;  %v1889_v51 = vadd.s32 127, %v1888_v28  ;;  %v683_v58 = vsel %vm5228_vm8, %v397_v29, %v5224_v15  ;;  %v6357_v40 = vpop.permute.xlu1 %594 }
 0x30d   : > { %v2014_v12 = vsel %vm2012_vm12, %v4672_v7, %v2013_v33  ;;  %v2183_v19 = vsel %vm2181_vm0, %v2182_v43, %v6326_v23  ;;  %v1901_v18 = vsel %vm6318_vm11, 0, %v1899_v47  ;;  %v2027_v41 = vand.u32 8388607, %v2020_v2 }
 0x30e   : > { %v2018_v61 = vsel %vm2011_vm14, %v2014_v12, %v2017_v49  ;;  %v1887_v44 = vor.u32 %v1886_v11, %v1885_v5  ;;  %v1890_v31 = vshll.u32 %v1889_v51, 23  ;;  %v2184_v22 = vadd.s32 %v2183_v19, %v2179_v42 }
 0x30f   : > { %v2019_v25 = vsel %vm2008_vm10, nan, %v2018_v61  ;;  %vm2031_vm1 = vcmp.gt.s32.totalorder %v2030_v13, 0  ;;  %v719_v38 = vmul.f32 %v6262_v52, %v683_v58  ;;  %v1905_v57 = vadd.s32 3, %v1901_v18 }
 0x310   : > { %4111 = vst [vmem:[%s5525_s20 + $0x58] sm:$0xff] %v2019_v25  ;;  %v1891_v35 = vor.u32 4788187, %v1890_v31  ;;  %v2185_v0 = vadd.s32 536870912, %v2184_v22  ;;  %v2032_v15 = vsel %vm2031_vm1, %v2030_v13, 0  ;;  %v1894_v45 = vcvt.s32.f32 %v1887_v44  ;;  %v6384_v19 = vpop.permute.xlu1 %605 }
 0x311   : > { %v2034_v50 = vand.u32 31, %v2032_v15  ;;  %v2028_v6 = vor.u32 8388608, %v2027_v41  ;;  %v6362_v60 = vadd.f32 %v6281_v46, %v719_v38  ;;  %v6372_v48 = vand.u32 3, %v1905_v57 }
 0x312   : > { %v1892_v8 = vand.u32 2147483647, %v1891_v35  ;;  %v6355_v24 = vshrl.u32 %v2185_v0, 30  ;;  %v2033_v34 = vshrl.u32 %v2032_v15, 5  ;;  %vm2126_vm2 = vcmp.lt.s32.totalorder %v6195_v10, 0 }
 0x313   : > { %v2035_v26 = vsub.s32 32, %v2034_v50  ;;  %v2037_v3 = vshll.u32 %v4923_v59, %v2034_v50  ;;  %v2040_v29 = vshll.u32 %v4924_v63, %v2034_v50  ;;  %v2043_v47 = vshll.u32 %v4925_v9, %v2034_v50 }
 0x314   : > { %v1895_v32 = vmul.f32 %v1894_v45, %v1892_v8  ;;  %v2187_v36 = vshll.u32 %v6355_v24, 30  ;;  %v2046_v42 = vshll.u32 %v4926_v14, %v2034_v50  ;;  %v2049_v13 = vshll.u32 %v4927_v20, %v2034_v50 }
 0x315   : > { %v2038_v23 = vshrl.u32 %v4924_v63, %v2035_v26  ;;  %v2041_v21 = vshrl.u32 %v4925_v9, %v2035_v26  ;;  %v2044_v7 = vshrl.u32 %v4926_v14, %v2035_v26  ;;  %v2047_v39 = vshrl.u32 %v4927_v20, %v2035_v26 }
 0x316   : > { %v1896_v37 = vxor.u32 2147483648, %v1895_v32  ;;  %v6368_v27 = vsub.s32 %v2184_v22, %v2187_v36  ;;  %v2050_v12 = vshrl.u32 %v4928_v30, %v2035_v26  ;;  %v6387_v61 = vshll.u32 %v2028_v6, 8 }
 0x317   : > { %v2039_v28 = vor.u32 %v2038_v23, %v2037_v3  ;;  %v2042_v43 = vor.u32 %v2041_v21, %v2040_v29  ;;  %v2045_v49 = vor.u32 %v2044_v7, %v2043_v47  ;;  %v2048_v51 = vor.u32 %v2047_v39, %v2046_v42 }
 0x318   : > { %v1897_v33 = vsel %vm1814_vm5, %v1896_v37, %v1895_v32  ;;  %v2190_v5 = vsub.s32 0, %v6368_v27  ;;  %v2335_v44 = vand.u32 2139095040, %v6362_v60  ;;  %v2210_v62 = vsub.s32 4, %v6355_v24 }
 0x319   : > { %v1900_v11 = vsel %vm6318_vm11, %v6136_v1, %v1897_v33  ;;  %v2036_v31 = vshrl.u32 %v4923_v59, %v2035_v26  ;;  %v2051_v22 = vor.u32 %v2050_v12, %v2049_v13  ;;  %vm6394_vm4 = vcmp.le.f32.partialorder %v2124_v4, 0.7853982  ;;  %v6402_v26 = vpop.permute.xlu1 %616 }
 0x31a   : > { %4675 = vcosq.f32 %v1900_v11  ;;  %v4318_v58 = vmin.u32 %v2190_v5, %v6368_v27  ;;  %vm2052_vm5 = vcmp.lt.s32.totalorder %v2033_v34, 1  ;;  %vm2053_vm3 = vcmp.lt.s32.totalorder %v2033_v34, 2 }
 0x31b   : > { %4677 = vsinq.f32 %v1900_v11  ;;  %vm2055_vm9 = vcmp.lt.s32.totalorder %v2033_v34, 4  ;;  %vm2054_vm6 = vcmp.lt.s32.totalorder %v2033_v34, 3  ;;  %v2060_v35 = vsel %vm2052_vm5, %v2039_v28, %v2042_v43 }
 0x31c   : > { %v2192_v18 = vclz %v4318_v58  ;;  %v2057_v41 = vsel %vm2055_vm9, %v2045_v49, 2102212464  ;;  %v2061_v0 = vsel %vm2055_vm9, %v2048_v51, 920167782  ;;  %vm1911_vm7 = vcmp.eq.s32.totalorder %v6372_v48, 2 }
 0x31d   : > { %v2056_v38 = vsel %vm2052_vm5, %v2036_v31, %v2039_v28  ;;  %v2062_v50 = vsel %vm2054_vm6, %v2045_v49, %v2061_v0  ;;  %v2064_v8 = vsel %vm2052_vm5, %v2042_v43, %v2045_v49  ;;  %v2058_v4 = vsel %vm2054_vm6, %v2042_v43, %v2057_v41 }
 0x31e   : > { %v4319_v15 = vadd.s32 4294967294, %v2192_v18  ;;  %v2063_v45 = vsel %vm2053_vm3, %v2060_v35, %v2062_v50  ;;  %v2065_v57 = vsel %vm2055_vm9, %v2051_v22, 1326507024  ;;  %v2336_v6 = vshrl.u32 %v2335_v44, 23  ;;  %v6430_v44 = vpop.permute.xlu1 %627 }
 0x31f   : > { %vm1907_vm10 = vcmp.lt.s32.totalorder %v6372_v48, 2  ;;  %v2066_v32 = vsel %vm2054_vm6, %v2048_v51, %v2065_v57  ;;  %v6407_v36 = vmul.u32.u64.low %v6387_v61, %v2063_v45  ;;  %v6408_v3 = vmul.u32.u64.high %v6387_v61, %v2063_v45, %v6407_v36 }
 0x320   : > { %vm4320_vm11 = vcmp.lt.s32.totalorder %v4319_v15, 0  ;;  %vm1904_vm12 = vweird.f32 %v6136_v1  ;;  %v2067_v29 = vsel %vm2053_vm3, %v2064_v8, %v2066_v32  ;;  %v2332_v21 = vand.u32 2147483647, %v6362_v60 }
 0x321   : > { %v2195_v23 = vsel %vm4320_vm11, 0, %v4319_v15  ;;  %v4325_v7 = vadd.s32 4294967169, %v2336_v6  ;;  %v2180_v37 = vadd.s32 %v6325_v55, %v6323_v54  ;;  %v2211_v28 = vsel %vm2126_vm2, %v2210_v62, %v6355_v24  ;;  %v393_v55 = vpop.permute.xlu0 %392 }
 0x322   : > { %v2196_v47 = vsub.s32 32, %v2195_v23  ;;  %v2200_v39 = vsub.s32 4294967266, %v2195_v23  ;;  %v2059_v42 = vsel %vm2053_vm3, %v2056_v38, %v2058_v4  ;;  %v2197_v11 = vshll.u32 %v6368_v27, %v2195_v23 }
 0x323   : > { %v6421_v33 = vmul.u32.u64.low %v6387_v61, %v2067_v29  ;;  %v6422_v5 = vmul.u32.u64.high %v6387_v61, %v2067_v29, %v6421_v33  ;;  %v2342_v43 = vadd.s32 1, %v4325_v7  ;;  %v2078_v54 = vadd.s32 1, %v6408_v3 }
 0x324   : > { %v4676_v49 = vpop.eup %4675  ;;  %v2198_v51 = vshrl.u32 %v2180_v37, %v2196_v47  ;;  %v2201_v13 = vadd.s32 127, %v2200_v39  ;;  %v2213_v24 = vsel %vm6394_vm4, 0, %v2211_v28  ;;  %v2339_v34 = vand.u32 8388607, %v2332_v21  ;;  %v6450_v37 = vpop.permute.xlu1 %638 }
 0x325   : > { %v4678_v12 = vpop.eup %4677  ;;  %v1912_v58 = vxor.u32 2147483648, %v4676_v49  ;;  %vm2343_vm15 = vcmp.gt.s32.totalorder %v2342_v43, 0  ;;  %vm1908_vm13 = vcmp.eq.s32.totalorder %v6372_v48, 0  ;;  %v2075_v41 = vmul.u32 %v6387_v61, %v2059_v42  ;;  %v6446_v23 = vpop.permute.xlu0 %579 }
 0x326   : > { %v1909_v62 = vxor.u32 2147483648, %v4678_v12  ;;  %v2199_v31 = vor.u32 %v2198_v51, %v2197_v11  ;;  %v2202_v22 = vshll.u32 %v2201_v13, 23  ;;  %v2344_v27 = vsel %vm2343_vm15, %v2342_v43, 0 }
 0x327   : > { %v1913_v18 = vsel %vm1911_vm7, %v1912_v58, %v4678_v12  ;;  %vm2077_vm0 = vc.u32 %v6422_v5, %v6407_v36  ;;  %v682_v38 = vsel %vm5228_vm8, %v393_v55, %v5226_v16  ;;  %v2217_v8 = vadd.s32 3, %v2213_v24 }
 0x328   : > { %v1910_v35 = vsel %vm1908_vm13, %v4676_v49, %v1909_v62  ;;  %v2203_v0 = vor.u32 4788187, %v2202_v22  ;;  %v2079_v15 = vsel %vm2077_vm0, %v2078_v54, %v6408_v3  ;;  %v2346_v45 = vand.u32 31, %v2344_v27 }
 0x329   : > { %v1914_v50 = vsel %vm1907_vm10, %v1910_v35, %v1913_v18  ;;  %v2080_v4 = vadd.s32 %v2079_v15, %v2075_v41  ;;  %v2206_v6 = vcvt.s32.f32 %v2199_v31  ;;  %v2340_v32 = vor.u32 8388608, %v2339_v34  ;;  %v6466_v22 = vpop.permute.xlu0 %590 }
 0x32a   : > { %v1915_v61 = vsel %vm1904_vm12, nan, %v1914_v50  ;;  %v2204_v57 = vand.u32 2147483647, %v2203_v0  ;;  %v2345_v29 = vshrl.u32 %v2344_v27, 5  ;;  %v2347_v7 = vsub.s32 32, %v2346_v45  ;;  %v6475_v0 = vpop.permute.xlu1 %649 }
 0x32b   : > { %4110 = vst [vmem:[%s5525_s20 + $0x50] sm:$0xff] %v1915_v61  ;;  %v2081_v3 = vadd.s32 536870912, %v2080_v4  ;;  %v718_v16 = vmul.f32 %v6262_v52, %v682_v38  ;;  %v2349_v47 = vshll.u32 %v4923_v59, %v2346_v45  ;;  %v2352_v39 = vshll.u32 %v4924_v63, %v2346_v45 }
 0x32c   : > { %v2207_v48 = vmul.f32 %v2206_v6, %v2204_v57  ;;  %v2355_v1 = vshll.u32 %v4925_v9, %v2346_v45  ;;  %v2350_v42 = vshrl.u32 %v4924_v63, %v2347_v7  ;;  %v2353_v33 = vshrl.u32 %v4925_v9, %v2347_v7 }
 0x32d   : > { %v2082_v28 = vshrl.u32 %v2081_v3, 30  ;;  %v2358_v43 = vshll.u32 %v4926_v14, %v2346_v45  ;;  %v2356_v11 = vshrl.u32 %v4926_v14, %v2347_v7  ;;  %v2359_v51 = vshrl.u32 %v4927_v20, %v2347_v7 }
 0x32e   : > { %v2208_v49 = vxor.u32 2147483648, %v2207_v48  ;;  %v2362_v13 = vshrl.u32 %v4928_v30, %v2347_v7  ;;  %v6461_v54 = vand.u32 3, %v2217_v8  ;;  %v2351_v12 = vor.u32 %v2350_v42, %v2349_v47  ;;  %v6484_v47 = vpop.permute.xlu0 %601 }
 0x32f   : > { %v2083_v55 = vshll.u32 %v2082_v28, 30  ;;  %v2361_v58 = vshll.u32 %v4927_v20, %v2346_v45  ;;  %v2354_v34 = vor.u32 %v2353_v33, %v2352_v39  ;;  %v2357_v62 = vor.u32 %v2356_v11, %v2355_v1 }
 0x330   : > { %v2209_v24 = vsel %vm2126_vm2, %v2208_v49, %v2207_v48  ;;  %v2360_v31 = vor.u32 %v2359_v51, %v2358_v43  ;;  %v6473_v35 = vshll.u32 %v2340_v32, 8  ;;  %vm2364_vm14 = vcmp.lt.s32.totalorder %v2345_v29, 1 }
 0x331   : > { %v2212_v27 = vsel %vm6394_vm4, %v6195_v10, %v2209_v24  ;;  %v6471_v18 = vsub.s32 %v2080_v4, %v2083_v55  ;;  %v2363_v41 = vor.u32 %v2362_v13, %v2361_v58  ;;  %vm2367_vm1 = vcmp.lt.s32.totalorder %v2345_v29, 4 }
 0x332   : > { %4679 = vcosq.f32 %v2212_v27  ;;  %v6478_v15 = vadd.f32 %v6281_v46, %v718_v16  ;;  %vm2365_vm2 = vcmp.lt.s32.totalorder %v2345_v29, 2  ;;  %v2369_v50 = vsel %vm2367_vm1, %v2357_v62, 2102212464 }
 0x333   : > { %4681 = vsinq.f32 %v2212_v27  ;;  %v2086_v38 = vsub.s32 0, %v6471_v18  ;;  %v2348_v25 = vshrl.u32 %v4923_v59, %v2347_v7  ;;  %vm2366_vm4 = vcmp.lt.s32.totalorder %v2345_v29, 3  ;;  %v408_v7 = vpop.permute.xlu1 %407 }
 0x334   : > { %v2372_v8 = vsel %vm2364_vm14, %v2351_v12, %v2354_v34  ;;  %v2373_v4 = vsel %vm2367_vm1, %v2360_v31, 920167782  ;;  %v2376_v57 = vsel %vm2364_vm14, %v2354_v34, %v2357_v62  ;;  %v2377_v6 = vsel %vm2367_vm1, %v2363_v41, 1326507024  ;;  %v6516_v41 = vpop.permute.xlu0 %612 }
 0x335   : > { %v4314_v45 = vmin.u32 %v2086_v38, %v6471_v18  ;;  %v2374_v61 = vsel %vm2366_vm4, %v2357_v62, %v2373_v4  ;;  %v2368_v32 = vsel %vm2364_vm14, %v2348_v25, %v2351_v12  ;;  %v2370_v3 = vsel %vm2366_vm4, %v2354_v34, %v2369_v50 }
 0x336   : > { %v2375_v16 = vsel %vm2365_vm2, %v2372_v8, %v2374_v61  ;;  %v2378_v48 = vsel %vm2366_vm4, %v2360_v31, %v2377_v6  ;;  %vm2022_vm5 = vcmp.lt.s32.totalorder %v6284_v56, 0  ;;  %v2106_v1 = vsub.s32 4, %v2082_v28 }
 0x337   : > { %v2088_v39 = vclz %v4314_v45  ;;  %vm6489_vm3 = vcmp.le.f32.partialorder %v2020_v2, 0.7853982  ;;  %v2379_v33 = vsel %vm2365_vm2, %v2376_v57, %v2378_v48  ;;  %v2371_v51 = vsel %vm2365_vm2, %v2368_v32, %v2370_v3 }
 0x338   : > { %v6495_v43 = vmul.u32.u64.low %v6473_v35, %v2375_v16  ;;  %v6496_v49 = vmul.u32.u64.high %v6473_v35, %v2375_v16, %v6495_v43  ;;  %v6500_v13 = vmul.u32.u64.low %v6473_v35, %v2379_v33  ;;  %v6501_v55 = vmul.u32.u64.high %v6473_v35, %v2379_v33, %v6500_v13 }
 0x339   : > { %v4315_v11 = vadd.s32 4294967294, %v2088_v39  ;;  %vm2219_vm9 = vcmp.lt.s32.totalorder %v6461_v54, 2  ;;  %vm2220_vm6 = vcmp.eq.s32.totalorder %v6461_v54, 0  ;;  %v2231_v2 = vand.u32 2139095040, %v6478_v15 }
 0x33a   : > { %v685_v12 = vsel %vm5228_vm8, %v408_v7, %v6345_v53  ;;  %vm2223_vm7 = vcmp.eq.s32.totalorder %v6461_v54, 2  ;;  %v2076_v29 = vadd.s32 %v6407_v36, %v6422_v5  ;;  %v2107_v58 = vsel %vm2022_vm5, %v2106_v1, %v2082_v28  ;;  %v6531_v7 = vpop.permute.xlu0 %623 }
 0x33b   : > { %vm4316_vm10 = vcmp.lt.s32.totalorder %v4315_v11, 0  ;;  %v2387_v62 = vmul.u32 %v6473_v35, %v2371_v51  ;;  %v2390_v31 = vadd.s32 1, %v6496_v49  ;;  %v2232_v27 = vshrl.u32 %v2231_v2, 23 }
 0x33c   : > { %v4680_v24 = vpop.eup %4679  ;;  %v2091_v34 = vsel %vm4316_vm10, 0, %v4315_v11  ;;  %v2228_v8 = vand.u32 2147483647, %v6478_v15  ;;  %vm2389_vm11 = vc.u32 %v6501_v55, %v6495_v43  ;;  %v2109_v6 = vsel %vm6489_vm3, 0, %v2107_v58 }
 0x33d   : > { %v4682_v38 = vpop.eup %4681  ;;  %v2224_v53 = vxor.u32 2147483648, %v4680_v24  ;;  %v2092_v50 = vsub.s32 32, %v2091_v34  ;;  %v2096_v25 = vsub.s32 4294967266, %v2091_v34  ;;  %v2093_v5 = vshll.u32 %v6471_v18, %v2091_v34 }
 0x33e   : > { %v2221_v36 = vxor.u32 2147483648, %v4682_v38  ;;  %v4321_v28 = vadd.s32 4294967169, %v2232_v27  ;;  %v2391_v61 = vsel %vm2389_vm11, %v2390_v31, %v6496_v49  ;;  %vm2216_vm12 = vweird.f32 %v6195_v10 }
 0x33f   : > { %v2225_v35 = vsel %vm2223_vm7, %v2224_v53, %v4682_v38  ;;  %v2094_v4 = vshrl.u32 %v2076_v29, %v2092_v50  ;;  %v2097_v45 = vadd.s32 127, %v2096_v25  ;;  %v2392_v32 = vadd.s32 %v2391_v61, %v2387_v62  ;;  %v6549_v25 = vpop.permute.xlu0 %634 }
 0x340   : > { %v2222_v57 = vsel %vm2220_vm6, %v4680_v24, %v2221_v36  ;;  %v2238_v3 = vadd.s32 1, %v4321_v28  ;;  %v721_v33 = vmul.f32 %v6262_v52, %v685_v12  ;;  %v2113_v11 = vadd.s32 3, %v2109_v6 }
 0x341   : > { %v2226_v18 = vsel %vm2219_vm9, %v2222_v57, %v2225_v35  ;;  %v2095_v16 = vor.u32 %v2094_v4, %v2093_v5  ;;  %v2098_v48 = vshll.u32 %v2097_v45, 23  ;;  %v2393_v1 = vadd.s32 536870912, %v2392_v32 }
 0x342   : > { %v2227_v39 = vsel %vm2216_vm12, nan, %v2226_v18  ;;  %vm2239_vm15 = vcmp.gt.s32.totalorder %v2238_v3, 0  ;;  %v2235_v51 = vand.u32 8388607, %v2228_v8  ;;  %vm2334_vm13 = vcmp.lt.s32.totalorder %v6362_v60, 0 }
 0x343   : > { %4113 = vst [vmem:[%s5525_s20 + $0x68] sm:$0xff] %v2227_v39  ;;  %v2099_v49 = vor.u32 4788187, %v2098_v48  ;;  %v2240_v13 = vsel %vm2239_vm15, %v2238_v3, 0  ;;  %v2394_v10 = vshrl.u32 %v2393_v1, 30  ;;  %v2102_v29 = vcvt.s32.f32 %v2095_v16 }
 0x344   : > { %v2242_v2 = vand.u32 31, %v2240_v13  ;;  %v6538_v62 = vand.u32 3, %v2113_v11  ;;  %v2236_v31 = vor.u32 8388608, %v2235_v51  ;;  %v6541_v12 = vadd.f32 %v6281_v46, %v721_v33  ;;  %v6575_v51 = vpop.permute.xlu0 %645 }
 0x345   : > { %v2100_v54 = vand.u32 2147483647, %v2099_v49  ;;  %v2395_v58 = vshll.u32 %v2394_v10, 30  ;;  %v2388_v27 = vadd.s32 %v6495_v43, %v6501_v55  ;;  %v6546_v53 = vshrl.u32 %v2240_v13, 5 }
 0x346   : > { %v2243_v24 = vsub.s32 32, %v2242_v2  ;;  %v2245_v5 = vshll.u32 %v4923_v59, %v2242_v2  ;;  %v2248_v45 = vshll.u32 %v4924_v63, %v2242_v2  ;;  %v2251_v43 = vshll.u32 %v4925_v9, %v2242_v2 }
 0x347   : > { %v2103_v34 = vmul.f32 %v2102_v29, %v2100_v54  ;;  %v6544_v38 = vsub.s32 %v2392_v32, %v2395_v58  ;;  %v2418_v57 = vsub.s32 4, %v2394_v10  ;;  %v2254_v32 = vshll.u32 %v4926_v14, %v2242_v2 }
 0x348   : > { %v2246_v50 = vshrl.u32 %v4924_v63, %v2243_v24  ;;  %v2249_v28 = vshrl.u32 %v4925_v9, %v2243_v24  ;;  %v2252_v35 = vshrl.u32 %v4926_v14, %v2243_v24  ;;  %v2255_v55 = vshrl.u32 %v4927_v20, %v2243_v24 }
 0x349   : > { %v2104_v36 = vxor.u32 2147483648, %v2103_v34  ;;  %v2398_v4 = vsub.s32 0, %v6544_v38  ;;  %v2257_v1 = vshll.u32 %v4927_v20, %v2242_v2  ;;  %v2258_v33 = vshrl.u32 %v4928_v30, %v2243_v24 }
 0x34a   : > { %v2247_v6 = vor.u32 %v2246_v50, %v2245_v5  ;;  %v2250_v16 = vor.u32 %v2249_v28, %v2248_v45  ;;  %v2253_v48 = vor.u32 %v2252_v35, %v2251_v43  ;;  %v2256_v39 = vor.u32 %v2255_v55, %v2254_v32 }
 0x34b   : > { %v2105_v61 = vsel %vm2022_vm5, %v2104_v36, %v2103_v34  ;;  %v4326_v18 = vmin.u32 %v2398_v4, %v6544_v38  ;;  %vm6569_vm0 = vcmp.le.f32.partialorder %v2332_v21, 0.7853982  ;;  %v6573_v42 = vshll.u32 %v2236_v31, 8 }
 0x34c   : > { %v2108_v3 = vsel %vm6489_vm3, %v6284_v56, %v2105_v61  ;;  %v2543_v13 = vand.u32 2139095040, %v6541_v12  ;;  %v2419_v54 = vsel %vm2334_vm13, %v2418_v57, %v2394_v10  ;;  %v2244_v2 = vshrl.u32 %v4923_v59, %v2243_v24  ;;  %v404_v57 = vpop.permute.xlu0 %403 }
 0x34d   : > { %4683 = vcosq.f32 %v2108_v3  ;;  %v2400_v11 = vclz %v4326_v18  ;;  %v2259_v29 = vor.u32 %v2258_v33, %v2257_v1  ;;  %vm2260_vm14 = vcmp.lt.s32.totalorder %v6546_v53, 1 }
 0x34e   : > { %4685 = vsinq.f32 %v2108_v3  ;;  %vm2262_vm1 = vcmp.lt.s32.totalorder %v6546_v53, 3  ;;  %vm2263_vm2 = vcmp.lt.s32.totalorder %v6546_v53, 4  ;;  %v2268_v21 = vsel %vm2260_vm14, %v2247_v6, %v2250_v16 }
 0x34f   : > { %v4327_v58 = vadd.s32 4294967294, %v2400_v11  ;;  %v2265_v34 = vsel %vm2263_vm2, %v2253_v48, 2102212464  ;;  %v2269_v31 = vsel %vm2263_vm2, %v2256_v39, 920167782  ;;  %v2272_v50 = vsel %vm2260_vm14, %v2250_v16, %v2253_v48 }
 0x350   : > { %v2273_v36 = vsel %vm2263_vm2, %v2259_v29, 1326507024  ;;  %vm2116_vm4 = vcmp.eq.s32.totalorder %v6538_v62, 0  ;;  %vm2261_vm3 = vcmp.lt.s32.totalorder %v6546_v53, 2  ;;  %v2270_v10 = vsel %vm2262_vm1, %v2253_v48, %v2269_v31 }
 0x351   : > { %vm4328_vm5 = vcmp.lt.s32.totalorder %v4327_v58, 0  ;;  %v2274_v24 = vsel %vm2262_vm1, %v2256_v39, %v2273_v36  ;;  %vm2115_vm9 = vcmp.lt.s32.totalorder %v6538_v62, 2  ;;  %v2264_v28 = vsel %vm2260_vm14, %v2244_v2, %v2247_v6 }
 0x352   : > { %v2403_v5 = vsel %vm4328_vm5, 0, %v4327_v58  ;;  %v2271_v35 = vsel %vm2261_vm3, %v2268_v21, %v2270_v10  ;;  %v2275_v4 = vsel %vm2261_vm3, %v2272_v50, %v2274_v24  ;;  %vm2112_vm6 = vweird.f32 %v6284_v56 }
 0x353   : > { %v2404_v45 = vsub.s32 32, %v2403_v5  ;;  %v2408_v43 = vsub.s32 4294967266, %v2403_v5  ;;  %v2266_v55 = vsel %vm2262_vm1, %v2250_v16, %v2265_v34  ;;  %v2544_v61 = vshrl.u32 %v2543_v13, 23 }
 0x354   : > { %v6605_v32 = vmul.u32.u64.low %v6573_v42, %v2275_v4  ;;  %v6606_v3 = vmul.u32.u64.high %v6573_v42, %v2275_v4, %v6605_v32  ;;  %v6609_v6 = vmul.u32.u64.low %v6573_v42, %v2271_v35  ;;  %v6610_v18 = vmul.u32.u64.high %v6573_v42, %v2271_v35, %v6609_v6 }
 0x355   : > { %v2405_v48 = vshll.u32 %v6544_v38, %v2403_v5  ;;  %v2406_v39 = vshrl.u32 %v2388_v27, %v2404_v45  ;;  %v2409_v1 = vadd.s32 127, %v2408_v43  ;;  %v4333_v33 = vadd.s32 4294967169, %v2544_v61 }
 0x356   : > { %vm2119_vm7 = vcmp.eq.s32.totalorder %v6538_v62, 2  ;;  %v2421_v16 = vsel %vm6569_vm0, 0, %v2419_v54  ;;  %v2267_v13 = vsel %vm2261_vm3, %v2264_v28, %v2266_v55  ;;  %v684_v2 = vsel %vm5228_vm8, %v404_v57, %v6446_v23  ;;  %v6630_v28 = vpop.permute.xlu1 %418 }
 0x357   : > { %v4684_v11 = vpop.eup %4683  ;;  %v2407_v21 = vor.u32 %v2406_v39, %v2405_v48  ;;  %v2410_v38 = vshll.u32 %v2409_v1, 23  ;;  %v2550_v27 = vadd.s32 1, %v4333_v33  ;;  %vm2285_vm10 = vc.u32 %v6606_v3, %v6609_v6 }
 0x358   : > { %v4686_v29 = vpop.eup %4685  ;;  %v2120_v58 = vxor.u32 2147483648, %v4684_v11  ;;  %v2286_v31 = vadd.s32 1, %v6610_v18  ;;  %v2540_v54 = vand.u32 2147483647, %v6541_v12  ;;  %v2283_v36 = vmul.u32 %v6573_v42, %v2267_v13 }
 0x359   : > { %v2117_v34 = vxor.u32 2147483648, %v4686_v29  ;;  %v2411_v50 = vor.u32 4788187, %v2410_v38  ;;  %vm2551_vm11 = vcmp.gt.s32.totalorder %v2550_v27, 0  ;;  %v2425_v10 = vadd.s32 3, %v2421_v16 }
 0x35a   : > { %v2121_v53 = vsel %vm2119_vm7, %v2120_v58, %v4686_v29  ;;  %v2287_v24 = vsel %vm2285_vm10, %v2286_v31, %v6610_v18  ;;  %v2552_v5 = vsel %vm2551_vm11, %v2550_v27, 0  ;;  %v2414_v45 = vcvt.s32.f32 %v2407_v21 }
 0x35b   : > { %v2118_v23 = vsel %vm2116_vm4, %v4684_v11, %v2117_v34  ;;  %v2412_v4 = vand.u32 2147483647, %v2411_v50  ;;  %v2288_v43 = vadd.s32 %v2287_v24, %v2283_v36  ;;  %v2554_v42 = vand.u32 31, %v2552_v5 }
 0x35c   : > { %v2122_v35 = vsel %vm2115_vm9, %v2118_v23, %v2121_v53  ;;  %v2547_v32 = vand.u32 8388607, %v2540_v54  ;;  %v687_v18 = vsel %vm5228_vm8, %v6630_v28, %v6357_v40  ;;  %v6643_v62 = vand.u32 3, %v2425_v10 }
 0x35d   : > { %v2123_v55 = vsel %vm2112_vm6, nan, %v2122_v35  ;;  %v2415_v61 = vmul.f32 %v2414_v45, %v2412_v4  ;;  %v2289_v57 = vadd.s32 536870912, %v2288_v43  ;;  %v2553_v48 = vshrl.u32 %v2552_v5, 5 }
 0x35e   : > { %4112 = vst [vmem:[%s5525_s20 + $0x60] sm:$0xff] %v2123_v55  ;;  %v2555_v39 = vsub.s32 32, %v2554_v42  ;;  %v720_v1 = vmul.f32 %v6262_v52, %v684_v2  ;;  %v2557_v11 = vshll.u32 %v4923_v59, %v2554_v42  ;;  %v2560_v16 = vshll.u32 %v4924_v63, %v2554_v42 }
 0x35f   : > { %v2416_v56 = vxor.u32 2147483648, %v2415_v61  ;;  %v6646_v33 = vshrl.u32 %v2289_v57, 30  ;;  %v2563_v58 = vshll.u32 %v4925_v9, %v2554_v42  ;;  %v2566_v2 = vshll.u32 %v4926_v14, %v2554_v42 }
 0x360   : > { %v2558_v13 = vshrl.u32 %v4924_v63, %v2555_v39  ;;  %v2561_v29 = vshrl.u32 %v4925_v9, %v2555_v39  ;;  %v2564_v21 = vshrl.u32 %v4926_v14, %v2555_v39  ;;  %v2567_v27 = vshrl.u32 %v4927_v20, %v2555_v39 }
 0x361   : > { %v2417_v38 = vsel %vm2334_vm13, %v2416_v56, %v2415_v61  ;;  %v2291_v52 = vshll.u32 %v6646_v33, 30  ;;  %v2548_v23 = vor.u32 8388608, %v2547_v32  ;;  %v2569_v24 = vshll.u32 %v4927_v20, %v2554_v42 }
 0x362   : > { %v2420_v34 = vsel %vm6569_vm0, %v6362_v60, %v2417_v38  ;;  %v2559_v31 = vor.u32 %v2558_v13, %v2557_v11  ;;  %v2562_v53 = vor.u32 %v2561_v29, %v2560_v16  ;;  %v2565_v50 = vor.u32 %v2564_v21, %v2563_v58 }
 0x363   : > { %4687 = vcosq.f32 %v2420_v34  ;;  %v6662_v36 = vsub.s32 %v2288_v43, %v2291_v52  ;;  %v2568_v10 = vor.u32 %v2567_v27, %v2566_v2  ;;  %v2570_v5 = vshrl.u32 %v4928_v30, %v2555_v39 }
 0x364   : > { %4689 = vsinq.f32 %v2420_v34  ;;  %v6667_v35 = vadd.f32 %v6281_v46, %v720_v1  ;;  %vm2230_vm12 = vcmp.lt.s32.totalorder %v6478_v15, 0  ;;  %vm2572_vm15 = vcmp.lt.s32.totalorder %v2553_v48, 1 }
 0x365   : > { %v2294_v49 = vsub.s32 0, %v6662_v36  ;;  %vm2574_vm13 = vcmp.lt.s32.totalorder %v2553_v48, 3  ;;  %vm2575_vm0 = vcmp.lt.s32.totalorder %v2553_v48, 4  ;;  %v2571_v4 = vor.u32 %v2570_v5, %v2569_v24 }
 0x366   : > { %v2577_v45 = vsel %vm2575_vm0, %v2565_v50, 2102212464  ;;  %v2580_v43 = vsel %vm2572_vm15, %v2559_v31, %v2562_v53  ;;  %v2581_v55 = vsel %vm2575_vm0, %v2568_v10, 920167782  ;;  %v2556_v42 = vshrl.u32 %v4923_v59, %v2555_v39 }
 0x367   : > { %v4322_v61 = vmin.u32 %v2294_v49, %v6662_v36  ;;  %vm2573_vm14 = vcmp.lt.s32.totalorder %v2553_v48, 2  ;;  %v2582_v46 = vsel %vm2574_vm13, %v2565_v50, %v2581_v55  ;;  %v2584_v32 = vsel %vm2572_vm15, %v2562_v53, %v2565_v50 }
 0x368   : > { %v2583_v57 = vsel %vm2573_vm14, %v2580_v43, %v2582_v46  ;;  %v2585_v1 = vsel %vm2575_vm0, %v2571_v4, 1326507024  ;;  %v2588_v56 = vshll.u32 %v2548_v23, 8  ;;  %vm2427_vm1 = vcmp.lt.s32.totalorder %v6643_v62, 2 }
 0x369   : > { %vm2428_vm2 = vcmp.eq.s32.totalorder %v6643_v62, 0  ;;  %vm6681_vm4 = vcmp.le.f32.partialorder %v2228_v8, 0.7853982  ;;  %v2296_v39 = vclz %v4322_v61  ;;  %v2576_v16 = vsel %vm2572_vm15, %v2556_v42, %v2559_v31 }
 0x36a   : > { %v2578_v13 = vsel %vm2574_vm13, %v2562_v53, %v2577_v45  ;;  %vm2424_vm5 = vweird.f32 %v6362_v60  ;;  %v2314_v29 = vsub.s32 4, %v6646_v33  ;;  %v2586_v58 = vsel %vm2574_vm13, %v2568_v10, %v2585_v1  ;;  %v6700_v53 = vld [vmem:[#allocation5] ss:$0 sm:$0xff] }
 0x36b   : > { %v6690_v21 = vmul.u32.u64.low %v2588_v56, %v2583_v57  ;;  %v6691_v38 = vmul.u32.u64.high %v2588_v56, %v2583_v57, %v6690_v21  ;;  %vm2431_vm3 = vcmp.eq.s32.totalorder %v6643_v62, 2  ;;  %v4323_v8 = vadd.s32 4294967294, %v2296_v39 }
 0x36c   : > { %v2587_v52 = vsel %vm2573_vm14, %v2584_v32, %v2586_v58  ;;  %v2439_v2 = vand.u32 2139095040, %v6667_v35  ;;  %v2579_v27 = vsel %vm2573_vm14, %v2576_v16, %v2578_v13  ;;  %v723_v50 = vmul.f32 %v6700_v53, %v687_v18 }
 0x36d   : > { %v6697_v34 = vmul.u32.u64.low %v2588_v56, %v2587_v52  ;;  %v6698_v31 = vmul.u32.u64.high %v2588_v56, %v2587_v52, %v6697_v34  ;;  %v4688_v23 = vpop.eup %4687  ;;  %v2284_v10 = vadd.s32 %v6609_v6, %v6606_v3  ;;  %vm4324_vm9 = vcmp.lt.s32.totalorder %v4323_v8, 0 }
 0x36e   : > { %v2436_v48 = vand.u32 2147483647, %v6667_v35  ;;  %v2440_v24 = vshrl.u32 %v2439_v2, 23  ;;  %v4690_v5 = vpop.eup %4689  ;;  %v2432_v49 = vxor.u32 2147483648, %v4688_v23  ;;  %v2299_v4 = vsel %vm4324_vm9, 0, %v4323_v8 }
 0x36f   : > { %v2315_v45 = vsel %vm2230_vm12, %v2314_v29, %v6646_v33  ;;  %v2598_v43 = vadd.s32 1, %v6691_v38  ;;  %v2429_v40 = vxor.u32 2147483648, %v4690_v5  ;;  %v2300_v28 = vsub.s32 32, %v2299_v4  ;;  %v415_v29 = vpop.permute.xlu0 %414  ;;  %v6733_v34 = vld [vmem:[#allocation5 + $0x2] ss:$0 sm:$0xff] }
 0x370   : > { %v2304_v18 = vsub.s32 4294967266, %v2299_v4  ;;  %v2595_v55 = vmul.u32 %v2588_v56, %v2579_v27  ;;  %v2433_v3 = vsel %vm2431_vm3, %v2432_v49, %v4690_v5  ;;  %v2301_v6 = vshll.u32 %v6662_v36, %v2299_v4 }
 0x371   : > { %vm2597_vm6 = vc.u32 %v6698_v31, %v6690_v21  ;;  %v4329_v61 = vadd.s32 4294967169, %v2440_v24  ;;  %v2430_v42 = vsel %vm2428_vm2, %v4688_v23, %v2429_v40  ;;  %v2302_v46 = vshrl.u32 %v2284_v10, %v2300_v28 }
 0x372   : > { %v2305_v33 = vadd.s32 127, %v2304_v18  ;;  %v2599_v57 = vsel %vm2597_vm6, %v2598_v43, %v6691_v38  ;;  %v2434_v32 = vsel %vm2427_vm1, %v2430_v42, %v2433_v3  ;;  %v2317_v1 = vsel %vm6681_vm4, 0, %v2315_v45 }
 0x373   : > { %v2600_v56 = vadd.s32 %v2599_v57, %v2595_v55  ;;  %v2446_v39 = vadd.s32 1, %v4329_v61  ;;  %v2435_v36 = vsel %vm2424_vm5, nan, %v2434_v32  ;;  %v2303_v16 = vor.u32 %v2302_v46, %v2301_v6 }
 0x374   : > { %v2306_v13 = vshll.u32 %v2305_v33, 23  ;;  %4115 = vst [vmem:[%s5525_s20 + $0x78] sm:$0xff] %v2435_v36  ;;  %v2321_v52 = vadd.s32 3, %v2317_v1  ;;  %v2443_v62 = vand.u32 8388607, %v2436_v48  ;;  %v6736_v60 = vadd.f32 %v6733_v34, %v723_v50 }
 0x375   : > { %v2601_v58 = vadd.s32 536870912, %v2600_v56  ;;  %vm2447_vm7 = vcmp.gt.s32.totalorder %v2446_v39, 0  ;;  %v686_v23 = vsel %vm5228_vm8, %v415_v29, %v6466_v22  ;;  %v2310_v24 = vcvt.s32.f32 %v2303_v16 }
 0x376   : > { %v2307_v8 = vor.u32 4788187, %v2306_v13  ;;  %v2448_v38 = vsel %vm2447_vm7, %v2446_v39, 0  ;;  %v6742_v45 = vand.u32 3, %v2321_v52  ;;  %v2444_v43 = vor.u32 8388608, %v2443_v62 }
 0x377   : > { %v6731_v2 = vshrl.u32 %v2601_v58, 30  ;;  %v2450_v27 = vand.u32 31, %v2448_v38  ;;  %v6745_v40 = vmul.f32 %v6700_v53, %v686_v23  ;;  %v2596_v28 = vadd.s32 %v6690_v21, %v6698_v31 }
 0x378   : > { %v2308_v10 = vand.u32 2147483647, %v2307_v8  ;;  %v2751_v22 = vand.u32 2139095040, %v6736_v60  ;;  %v2449_v57 = vshrl.u32 %v2448_v38, 5  ;;  %vm2542_vm10 = vcmp.lt.s32.totalorder %v6541_v12, 0 }
 0x379   : > { %v2603_v5 = vshll.u32 %v6731_v2, 30  ;;  %v2451_v49 = vsub.s32 32, %v2450_v27  ;;  %v2453_v3 = vshll.u32 %v4923_v59, %v2450_v27  ;;  %v2456_v46 = vshll.u32 %v4924_v63, %v2450_v27 }
 0x37a   : > { %v2311_v4 = vmul.f32 %v2310_v24, %v2308_v10  ;;  %v2459_v33 = vshll.u32 %v4925_v9, %v2450_v27  ;;  %v2462_v1 = vshll.u32 %v4926_v14, %v2450_v27  ;;  %v2465_v29 = vshll.u32 %v4927_v20, %v2450_v27 }
 0x37b   : > { %v6748_v50 = vsub.s32 %v2600_v56, %v2603_v5  ;;  %v2454_v18 = vshrl.u32 %v4924_v63, %v2451_v49  ;;  %v2457_v6 = vshrl.u32 %v4925_v9, %v2451_v49  ;;  %v2460_v61 = vshrl.u32 %v4926_v14, %v2451_v49 }
 0x37c   : > { %v2312_v55 = vxor.u32 2147483648, %v2311_v4  ;;  %v2463_v21 = vshrl.u32 %v4927_v20, %v2451_v49  ;;  %v2466_v58 = vshrl.u32 %v4928_v30, %v2451_v49  ;;  %v6769_v52 = vshll.u32 %v2444_v43, 8 }
 0x37d   : > { %v2606_v42 = vsub.s32 0, %v6748_v50  ;;  %v2455_v32 = vor.u32 %v2454_v18, %v2453_v3  ;;  %v2458_v36 = vor.u32 %v2457_v6, %v2456_v46  ;;  %v2461_v16 = vor.u32 %v2460_v61, %v2459_v33 }
 0x37e   : > { %v2313_v31 = vsel %vm2230_vm12, %v2312_v55, %v2311_v4  ;;  %v2464_v13 = vor.u32 %v2463_v21, %v2462_v1  ;;  %v2752_v62 = vshrl.u32 %v2751_v22, 23  ;;  %v2626_v11 = vsub.s32 4, %v6731_v2 }
 0x37f   : > { %v2316_v56 = vsel %vm6681_vm4, %v6478_v15, %v2313_v31  ;;  %v4334_v39 = vmin.u32 %v2606_v42, %v6748_v50  ;;  %v2452_v38 = vshrl.u32 %v4923_v59, %v2451_v49  ;;  %v2467_v23 = vor.u32 %v2466_v58, %v2465_v29 }
 0x380   : > { %4691 = vcosq.f32 %v2316_v56  ;;  %vm2468_vm11 = vcmp.lt.s32.totalorder %v2449_v57, 1  ;;  %vm2470_vm12 = vcmp.lt.s32.totalorder %v2449_v57, 3  ;;  %vm2471_vm15 = vcmp.lt.s32.totalorder %v2449_v57, 4 }
 0x381   : > { %4693 = vsinq.f32 %v2316_v56  ;;  %v2608_v8 = vclz %v4334_v39  ;;  %v2476_v27 = vsel %vm2468_vm11, %v2455_v32, %v2458_v36  ;;  %v2473_v24 = vsel %vm2471_vm15, %v2461_v16, 2102212464 }
 0x382   : > { %v2477_v5 = vsel %vm2471_vm15, %v2464_v13, 920167782  ;;  %v2480_v4 = vsel %vm2468_vm11, %v2458_v36, %v2461_v16  ;;  %v2481_v18 = vsel %vm2471_vm15, %v2467_v23, 1326507024  ;;  %vm6777_vm13 = vcmp.le.f32.partialorder %v2540_v54, 0.7853982 }
 0x383   : > { %v4335_v10 = vadd.s32 4294967294, %v2608_v8  ;;  %vm2469_vm14 = vcmp.lt.s32.totalorder %v2449_v57, 2  ;;  %v2478_v49 = vsel %vm2470_vm12, %v2461_v16, %v2477_v5  ;;  %v2482_v22 = vsel %vm2470_vm12, %v2464_v13, %v2481_v18 }
 0x384   : > { %vm2323_vm1 = vcmp.lt.s32.totalorder %v6742_v45, 2  ;;  %v2472_v3 = vsel %vm2468_vm11, %v2452_v38, %v2455_v32  ;;  %v2479_v6 = vsel %vm2469_vm14, %v2476_v27, %v2478_v49  ;;  %v2483_v61 = vsel %vm2469_vm14, %v2480_v4, %v2482_v22 }
 0x385   : > { %vm4336_vm0 = vcmp.lt.s32.totalorder %v4335_v10, 0  ;;  %vm2320_vm2 = vweird.f32 %v6478_v15  ;;  %v2474_v46 = vsel %vm2470_vm12, %v2458_v36, %v2473_v24  ;;  %v4341_v33 = vadd.s32 4294967169, %v2752_v62 }
 0x386   : > { %v2611_v55 = vsel %vm4336_vm0, 0, %v4335_v10  ;;  %v6790_v21 = vmul.u32.u64.low %v6769_v52, %v2483_v61  ;;  %v6791_v31 = vmul.u32.u64.high %v6769_v52, %v2483_v61, %v6790_v21  ;;  %vm2324_vm4 = vcmp.eq.s32.totalorder %v6742_v45, 0 }
 0x387   : > { %v2612_v54 = vsub.s32 32, %v2611_v55  ;;  %v2616_v42 = vsub.s32 4294967266, %v2611_v55  ;;  %v6794_v1 = vmul.u32.u64.low %v6769_v52, %v2479_v6  ;;  %v6795_v56 = vmul.u32.u64.high %v6769_v52, %v2479_v6, %v6794_v1 }
 0x388   : > { %v2613_v32 = vshll.u32 %v6748_v50, %v2611_v55  ;;  %v2758_v13 = vadd.s32 1, %v4341_v33  ;;  %vm2327_vm5 = vcmp.eq.s32.totalorder %v6742_v45, 2  ;;  %v2627_v36 = vsel %vm2542_vm10, %v2626_v11, %v6731_v2 }
 0x389   : > { %v2614_v39 = vshrl.u32 %v2596_v28, %v2612_v54  ;;  %v2617_v16 = vadd.s32 127, %v2616_v42  ;;  %v2475_v58 = vsel %vm2469_vm14, %v2472_v3, %v2474_v46  ;;  %vm2493_vm9 = vc.u32 %v6791_v31, %v6794_v1 }
 0x38a   : > { %v4692_v29 = vpop.eup %4691  ;;  %vm2759_vm3 = vcmp.gt.s32.totalorder %v2758_v13, 0  ;;  %v2494_v28 = vadd.s32 1, %v6795_v56  ;;  %v2748_v10 = vand.u32 2147483647, %v6736_v60  ;;  %v2491_v2 = vmul.u32 %v6769_v52, %v2475_v58 }
 0x38b   : > { %v4694_v8 = vpop.eup %4693  ;;  %v2328_v62 = vxor.u32 2147483648, %v4692_v29  ;;  %v2615_v38 = vor.u32 %v2614_v39, %v2613_v32  ;;  %v2618_v23 = vshll.u32 %v2617_v16, 23  ;;  %v2760_v57 = vsel %vm2759_vm3, %v2758_v13, 0 }
 0x38c   : > { %v2325_v50 = vxor.u32 2147483648, %v4694_v8  ;;  %v2629_v5 = vsel %vm6777_vm13, 0, %v2627_v36  ;;  %v2495_v4 = vsel %vm2493_vm9, %v2494_v28, %v6795_v56  ;;  %v2762_v18 = vand.u32 31, %v2760_v57 }
 0x38d   : > { %v2329_v27 = vsel %vm2327_vm5, %v2328_v62, %v4694_v8  ;;  %v2619_v24 = vor.u32 4788187, %v2618_v23  ;;  %v2622_v55 = vcvt.s32.f32 %v2615_v38  ;;  %v2496_v3 = vadd.s32 %v2495_v4, %v2491_v2 }
 0x38e   : > { %v2326_v11 = vsel %vm2324_vm4, %v4692_v29, %v2325_v50  ;;  %v2755_v52 = vand.u32 8388607, %v2748_v10  ;;  %v2763_v61 = vsub.s32 32, %v2762_v18  ;;  %v6823_v54 = vadd.f32 %v6733_v34, %v6745_v40 }
 0x38f   : > { %v2330_v49 = vsel %vm2323_vm1, %v2326_v11, %v2329_v27  ;;  %v2620_v22 = vand.u32 2147483647, %v2619_v24  ;;  %v2633_v46 = vadd.s32 3, %v2629_v5  ;;  %v2497_v33 = vadd.s32 536870912, %v2496_v3 }
 0x390   : > { %v2331_v6 = vsel %vm2320_vm2, nan, %v2330_v49  ;;  %v2761_v45 = vshrl.u32 %v2760_v57, 5  ;;  %v2765_v21 = vshll.u32 %v4923_v59, %v2762_v18  ;;  %v2766_v56 = vshrl.u32 %v4924_v63, %v2763_v61 }
 0x391   : > { %4114 = vst [vmem:[%s5525_s20 + $0x70] sm:$0xff] %v2331_v6  ;;  %v2623_v42 = vmul.f32 %v2622_v55, %v2620_v22  ;;  %v2769_v15 = vshrl.u32 %v4925_v9, %v2763_v61  ;;  %v2772_v32 = vshrl.u32 %v4926_v14, %v2763_v61  ;;  %v2498_v16 = vshrl.u32 %v2497_v33, 30 }
 0x392   : > { %v2768_v13 = vshll.u32 %v4924_v63, %v2762_v18  ;;  %v2775_v40 = vshrl.u32 %v4927_v20, %v2763_v61  ;;  %v2771_v29 = vshll.u32 %v4925_v9, %v2762_v18  ;;  %v2774_v36 = vshll.u32 %v4926_v14, %v2762_v18 }
 0x393   : > { %v2624_v39 = vxor.u32 2147483648, %v2623_v42  ;;  %v2777_v58 = vshll.u32 %v4927_v20, %v2762_v18  ;;  %v2778_v8 = vshrl.u32 %v4928_v30, %v2763_v61  ;;  %v2499_v38 = vshll.u32 %v2498_v16, 30 }
 0x394   : > { %v2767_v23 = vor.u32 %v2766_v56, %v2765_v21  ;;  %v2770_v50 = vor.u32 %v2769_v15, %v2768_v13  ;;  %v2773_v27 = vor.u32 %v2772_v32, %v2771_v29  ;;  %v2776_v24 = vor.u32 %v2775_v40, %v2774_v36 }
 0x395   : > { %v2625_v62 = vsel %vm2542_vm10, %v2624_v39, %v2623_v42  ;;  %v2779_v2 = vor.u32 %v2778_v8, %v2777_v58  ;;  %v6841_v57 = vand.u32 3, %v2633_v46  ;;  %v6843_v11 = vsub.s32 %v2496_v3, %v2499_v38 }
 0x396   : > { %v2628_v28 = vsel %vm6777_vm13, %v6541_v12, %v2625_v62  ;;  %v2644_v5 = vand.u32 2147483647, %v6823_v54  ;;  %vm2438_vm6 = vcmp.lt.s32.totalorder %v6667_v35, 0  ;;  %v2756_v4 = vor.u32 8388608, %v2755_v52 }
 0x397   : > { %4695 = vcosq.f32 %v2628_v28  ;;  %vm2780_vm7 = vcmp.lt.s32.totalorder %v2761_v45, 1  ;;  %v2647_v18 = vand.u32 2139095040, %v6823_v54  ;;  %v2502_v43 = vsub.s32 0, %v6843_v11 }
 0x398   : > { %4697 = vsinq.f32 %v2628_v28  ;;  %vm2782_vm10 = vcmp.lt.s32.totalorder %v2761_v45, 3  ;;  %vm2783_vm11 = vcmp.lt.s32.totalorder %v2761_v45, 4  ;;  %v2788_v49 = vsel %vm2780_vm7, %v2767_v23, %v2770_v50 }
 0x399   : > { %v2764_v22 = vshrl.u32 %v4923_v59, %v2763_v61  ;;  %v2785_v55 = vsel %vm2783_vm11, %v2773_v27, 2102212464  ;;  %v2789_v3 = vsel %vm2783_vm11, %v2776_v24, 920167782  ;;  %v2793_v6 = vsel %vm2783_vm11, %v2779_v2, 1326507024 }
 0x39a   : > { %v4330_v42 = vmin.u32 %v2502_v43, %v6843_v11  ;;  %vm2781_vm12 = vcmp.lt.s32.totalorder %v2761_v45, 2  ;;  %v2790_v46 = vsel %vm2782_vm10, %v2773_v27, %v2789_v3  ;;  %v2792_v52 = vsel %vm2780_vm7, %v2770_v50, %v2773_v27 }
 0x39b   : > { %v2791_v33 = vsel %vm2781_vm12, %v2788_v49, %v2790_v46  ;;  %v2794_v21 = vsel %vm2782_vm10, %v2776_v24, %v2793_v6  ;;  %v2796_v56 = vshll.u32 %v2756_v4, 8  ;;  %v2648_v15 = vshrl.u32 %v2647_v18, 23  ;;  %v430_v6 = vpop.permute.xlu1 %429 }
 0x39c   : > { %v2504_v32 = vclz %v4330_v42  ;;  %v2522_v39 = vsub.s32 4, %v2498_v16  ;;  %v2784_v61 = vsel %vm2780_vm7, %v2764_v22, %v2767_v23  ;;  %v2786_v13 = vsel %vm2782_vm10, %v2770_v50, %v2785_v55 }
 0x39d   : > { %vm2632_vm15 = vweird.f32 %v6541_v12  ;;  %v2795_v40 = vsel %vm2781_vm12, %v2792_v52, %v2794_v21  ;;  %v6860_v29 = vmul.u32.u64.low %v2796_v56, %v2791_v33  ;;  %v6861_v36 = vmul.u32.u64.high %v2796_v56, %v2791_v33, %v6860_v29 }
 0x39e   : > { %v4337_v58 = vadd.s32 4294967169, %v2648_v15  ;;  %vm2635_vm13 = vcmp.lt.s32.totalorder %v6841_v57, 2  ;;  %v4331_v8 = vadd.s32 4294967294, %v2504_v32  ;;  %vm2636_vm0 = vcmp.eq.s32.totalorder %v6841_v57, 0 }
 0x39f   : > { %v6865_v62 = vmul.u32.u64.low %v2796_v56, %v2795_v40  ;;  %v6866_v38 = vmul.u32.u64.high %v2796_v56, %v2795_v40, %v6865_v62  ;;  %vm2639_vm14 = vcmp.eq.s32.totalorder %v6841_v57, 2  ;;  %v2787_v23 = vsel %vm2781_vm12, %v2784_v61, %v2786_v13 }
 0x3a0   : > { %v2654_v50 = vadd.s32 1, %v4337_v58  ;;  %v2492_v27 = vadd.s32 %v6794_v1, %v6791_v31  ;;  %vm4332_vm1 = vcmp.lt.s32.totalorder %v4331_v8, 0  ;;  %v2523_v24 = vsel %vm2438_vm6, %v2522_v39, %v2498_v16  ;;  %v426_v39 = vpop.permute.xlu0 %425 }
 0x3a1   : > { %v4696_v28 = vpop.eup %4695  ;;  %v2651_v2 = vand.u32 8388607, %v2644_v5  ;;  %v2507_v43 = vsel %vm4332_vm1, 0, %v4331_v8  ;;  %v2806_v49 = vadd.s32 1, %v6861_v36  ;;  %v2803_v3 = vmul.u32 %v2796_v56, %v2787_v23 }
 0x3a2   : > { %v4698_v4 = vpop.eup %4697  ;;  %v2640_v18 = vxor.u32 2147483648, %v4696_v28  ;;  %vm2655_vm2 = vcmp.gt.s32.totalorder %v2654_v50, 0  ;;  %v2508_v22 = vsub.s32 32, %v2507_v43  ;;  %v2512_v55 = vsub.s32 4294967266, %v2507_v43 }
 0x3a3   : > { %v2637_v45 = vxor.u32 2147483648, %v4698_v4  ;;  %v2509_v1 = vshll.u32 %v6843_v11, %v2507_v43  ;;  %vm2805_vm4 = vc.u32 %v6866_v38, %v6860_v29  ;;  %v2656_v16 = vsel %vm2655_vm2, %v2654_v50, 0 }
 0x3a4   : > { %v2641_v31 = vsel %vm2639_vm14, %v2640_v18, %v4698_v4  ;;  %v2510_v46 = vshrl.u32 %v2492_v27, %v2508_v22  ;;  %v2513_v52 = vadd.s32 127, %v2512_v55  ;;  %v2807_v33 = vsel %vm2805_vm4, %v2806_v49, %v6861_v36 }
 0x3a5   : > { %v2638_v42 = vsel %vm2636_vm0, %v4696_v28, %v2637_v45  ;;  %v2808_v56 = vadd.s32 %v2807_v33, %v2803_v3  ;;  %v2658_v15 = vand.u32 31, %v2656_v16  ;;  %v689_v11 = vsel %vm5228_vm8, %v430_v6, %v6384_v19 }
 0x3a6   : > { %v2642_v21 = vsel %vm2635_vm13, %v2638_v42, %v2641_v31  ;;  %vm6895_vm5 = vcmp.le.f32.partialorder %v2436_v48, 0.7853982  ;;  %v2511_v61 = vor.u32 %v2510_v46, %v2509_v1  ;;  %v2514_v13 = vshll.u32 %v2513_v52, 23 }
 0x3a7   : > { %v2643_v32 = vsel %vm2632_vm15, nan, %v2642_v21  ;;  %v2525_v57 = vsel %vm6895_vm5, 0, %v2523_v24  ;;  %v2809_v40 = vadd.s32 536870912, %v2808_v56  ;;  %v2659_v36 = vsub.s32 32, %v2658_v15 }
 0x3a8   : > { %4117 = vst [vmem:[%s5525_s20 + $0x88] sm:$0xff] %v2643_v32  ;;  %v2515_v58 = vor.u32 4788187, %v2514_v13  ;;  %v2652_v8 = vor.u32 8388608, %v2651_v2  ;;  %v2657_v19 = vshrl.u32 %v2656_v16, 5  ;;  %v725_v12 = vmul.f32 %v6700_v53, %v689_v11 }
 0x3a9   : > { %v2518_v62 = vcvt.s32.f32 %v2511_v61  ;;  %v6903_v23 = vshrl.u32 %v2809_v40, 30  ;;  %v2662_v48 = vshrl.u32 %v4924_v63, %v2659_v36  ;;  %v2665_v50 = vshrl.u32 %v4925_v9, %v2659_v36 }
 0x3aa   : > { %v2516_v28 = vand.u32 2147483647, %v2515_v58  ;;  %v2668_v27 = vshrl.u32 %v4926_v14, %v2659_v36  ;;  %v2670_v4 = vshll.u32 %v4926_v14, %v2658_v15  ;;  %v2671_v24 = vshrl.u32 %v4927_v20, %v2659_v36 }
 0x3ab   : > { %v2811_v18 = vshll.u32 %v6903_v23, 30  ;;  %v2661_v2 = vshll.u32 %v4923_v59, %v2658_v15  ;;  %v2664_v43 = vshll.u32 %v4924_v63, %v2658_v15  ;;  %v2667_v49 = vshll.u32 %v4925_v9, %v2658_v15 }
 0x3ac   : > { %v2519_v45 = vmul.f32 %v2518_v62, %v2516_v28  ;;  %v2672_v22 = vor.u32 %v2671_v24, %v2670_v4  ;;  %v2674_v55 = vshrl.u32 %v4928_v30, %v2659_v36  ;;  %v2529_v42 = vadd.s32 3, %v2525_v57 }
 0x3ad   : > { %v6915_v3 = vsub.s32 %v2808_v56, %v2811_v18  ;;  %v2663_v6 = vor.u32 %v2662_v48, %v2661_v2  ;;  %v2666_v31 = vor.u32 %v2665_v50, %v2664_v43  ;;  %v2669_v1 = vor.u32 %v2668_v27, %v2667_v49 }
 0x3ae   : > { %v2520_v16 = vxor.u32 2147483648, %v2519_v45  ;;  %v2673_v46 = vshll.u32 %v4927_v20, %v2658_v15  ;;  %v6918_v52 = vshll.u32 %v2652_v8, 8  ;;  %vm2676_vm3 = vcmp.lt.s32.totalorder %v2657_v19, 1 }
 0x3af   : > { %v2814_v33 = vsub.s32 0, %v6915_v3  ;;  %vm2679_vm9 = vcmp.lt.s32.totalorder %v2657_v19, 4  ;;  %v6922_v21 = vadd.f32 %v6733_v34, %v725_v12  ;;  %vm2750_vm7 = vcmp.lt.s32.totalorder %v6736_v60, 0 }
 0x3b0   : > { %v2521_v56 = vsel %vm2438_vm6, %v2520_v16, %v2519_v45  ;;  %v2675_v11 = vor.u32 %v2674_v55, %v2673_v46  ;;  %vm2678_vm10 = vcmp.lt.s32.totalorder %v2657_v19, 3  ;;  %v2685_v32 = vsel %vm2679_vm9, %v2672_v22, 920167782 }
 0x3b1   : > { %v2524_v15 = vsel %vm6895_vm5, %v6667_v35, %v2521_v56  ;;  %v4342_v61 = vmin.u32 %v2814_v33, %v6915_v3  ;;  %v2681_v13 = vsel %vm2679_vm9, %v2669_v1, 2102212464  ;;  %v2684_v57 = vsel %vm2676_vm3, %v2663_v6, %v2666_v31 }
 0x3b2   : > { %4699 = vcosq.f32 %v2524_v15  ;;  %v2834_v40 = vsub.s32 4, %v6903_v23  ;;  %v2660_v58 = vshrl.u32 %v4923_v59, %v2659_v36  ;;  %v2686_v8 = vsel %vm2678_vm10, %v2669_v1, %v2685_v32 }
 0x3b3   : > { %4701 = vsinq.f32 %v2524_v15  ;;  %v2816_v12 = vclz %v4342_v61  ;;  %vm2677_vm6 = vcmp.lt.s32.totalorder %v2657_v19, 2  ;;  %v2688_v62 = vsel %vm2676_vm3, %v2666_v31, %v2669_v1 }
 0x3b4   : > { %v2680_v48 = vsel %vm2676_vm3, %v2660_v58, %v2663_v6  ;;  %v2682_v50 = vsel %vm2678_vm10, %v2666_v31, %v2681_v13  ;;  %v2687_v28 = vsel %vm2677_vm6, %v2684_v57, %v2686_v8  ;;  %v2689_v27 = vsel %vm2679_vm9, %v2675_v11, 1326507024 }
 0x3b5   : > { %v4343_v4 = vadd.s32 4294967294, %v2816_v12  ;;  %v2690_v24 = vsel %vm2678_vm10, %v2672_v22, %v2689_v27  ;;  %v6943_v36 = vmul.u32.u64.low %v6918_v52, %v2687_v28  ;;  %v6944_v18 = vmul.u32.u64.high %v6918_v52, %v2687_v28, %v6943_v36 }
 0x3b6   : > { %v2530_v2 = vand.u32 3, %v2529_v42  ;;  %v2691_v43 = vsel %vm2677_vm6, %v2688_v62, %v2690_v24  ;;  %v2959_v49 = vand.u32 2139095040, %v6922_v21  ;;  %v688_v45 = vsel %vm5228_vm8, %v426_v39, %v6484_v47 }
 0x3b7   : > { %vm4344_vm11 = vcmp.lt.s32.totalorder %v4343_v4, 0  ;;  %v2683_v55 = vsel %vm2677_vm6, %v2680_v48, %v2682_v50  ;;  %v6952_v6 = vmul.u32.u64.low %v6918_v52, %v2691_v43  ;;  %v6953_v31 = vmul.u32.u64.high %v6918_v52, %v2691_v43, %v6952_v6 }
 0x3b8   : > { %vm6957_vm12 = vcmp.le.f32.partialorder %v2748_v10, 0.7853982  ;;  %v2804_v22 = vadd.s32 %v6860_v29, %v6866_v38  ;;  %v2819_v1 = vsel %vm4344_vm11, 0, %v4343_v4  ;;  %v2960_v16 = vshrl.u32 %v2959_v49, 23 }
 0x3b9   : > { %vm2528_vm15 = vweird.f32 %v6667_v35  ;;  %v2820_v47 = vsub.s32 32, %v2819_v1  ;;  %v2824_v42 = vsub.s32 4294967266, %v2819_v1  ;;  %v2835_v46 = vsel %vm2750_vm7, %v2834_v40, %v6903_v23 }
 0x3ba   : > { %v2702_v33 = vadd.s32 1, %v6944_v18  ;;  %vm2531_vm13 = vcmp.lt.s32.totalorder %v2530_v2, 2  ;;  %v2699_v10 = vmul.u32 %v6918_v52, %v2683_v55  ;;  %v4349_v56 = vadd.s32 4294967169, %v2960_v16 }
 0x3bb   : > { %v724_v11 = vmul.f32 %v6700_v53, %v688_v45  ;;  %v2821_v29 = vshll.u32 %v6915_v3, %v2819_v1  ;;  %v2822_v38 = vshrl.u32 %v2804_v22, %v2820_v47  ;;  %v2825_v32 = vadd.s32 127, %v2824_v42 }
 0x3bc   : > { %vm2701_vm0 = vc.u32 %v6953_v31, %v6943_v36  ;;  %v4700_v15 = vpop.eup %4699  ;;  %v2837_v61 = vsel %vm6957_vm12, 0, %v2835_v46  ;;  %v2956_v13 = vand.u32 2147483647, %v6922_v21  ;;  %v2966_v57 = vadd.s32 1, %v4349_v56 }
 0x3bd   : > { %v2703_v23 = vsel %vm2701_vm0, %v2702_v33, %v6944_v18  ;;  %v4702_v52 = vpop.eup %4701  ;;  %v2536_v40 = vxor.u32 2147483648, %v4700_v15  ;;  %v2823_v58 = vor.u32 %v2822_v38, %v2821_v29  ;;  %v2826_v8 = vshll.u32 %v2825_v32, 23  ;;  %v6982_v18 = vpop.permute.xlu1 %440 }
 0x3be   : > { %v2704_v12 = vadd.s32 %v2703_v23, %v2699_v10  ;;  %vm2532_vm14 = vcmp.eq.s32.totalorder %v2530_v2, 0  ;;  %v2533_v3 = vxor.u32 2147483648, %v4702_v52  ;;  %vm2535_vm1 = vcmp.eq.s32.totalorder %v2530_v2, 2 }
 0x3bf   : > { %vm2967_vm2 = vcmp.gt.s32.totalorder %v2966_v57, 0  ;;  %v2537_v62 = vsel %vm2535_vm1, %v2536_v40, %v4702_v52  ;;  %v2827_v39 = vor.u32 4788187, %v2826_v8  ;;  %v2841_v48 = vadd.s32 3, %v2837_v61 }
 0x3c0   : > { %v2705_v50 = vadd.s32 536870912, %v2704_v12  ;;  %v2534_v28 = vsel %vm2532_vm14, %v4700_v15, %v2533_v3  ;;  %v2963_v27 = vand.u32 8388607, %v2956_v13  ;;  %v2968_v4 = vsel %vm2967_vm2, %v2966_v57, 0 }
 0x3c1   : > { %v6980_v24 = vadd.f32 %v6733_v34, %v724_v11  ;;  %v2538_v43 = vsel %vm2531_vm13, %v2534_v28, %v2537_v62  ;;  %v2828_v49 = vand.u32 2147483647, %v2827_v39  ;;  %v2830_v45 = vcvt.s32.f32 %v2823_v58 }
 0x3c2   : > { %v2706_v55 = vshrl.u32 %v2705_v50, 30  ;;  %v2539_v6 = vsel %vm2528_vm15, nan, %v2538_v43  ;;  %v2970_v22 = vand.u32 31, %v2968_v4  ;;  %v6988_v16 = vand.u32 3, %v2841_v48 }
 0x3c3   : > { %4116 = vst [vmem:[%s5525_s20 + $0x80] sm:$0xff] %v2539_v6  ;;  %v2831_v1 = vmul.f32 %v2830_v45, %v2828_v49  ;;  %vm2646_vm4 = vcmp.lt.s32.totalorder %v6823_v54, 0  ;;  %v691_v2 = vsel %vm5228_vm8, %v6982_v18, %v6402_v26  ;;  %v6997_v42 = vadd.s32 %v6943_v36, %v6953_v31 }
 0x3c4   : > { %v2707_v47 = vshll.u32 %v2706_v55, 30  ;;  %v2964_v46 = vor.u32 8388608, %v2963_v27  ;;  %v2971_v35 = vsub.s32 32, %v2970_v22  ;;  %v2855_v33 = vand.u32 2139095040, %v6980_v24 }
 0x3c5   : > { %v2832_v10 = vxor.u32 2147483648, %v2831_v1  ;;  %v2730_v11 = vsub.s32 4, %v2706_v55  ;;  %v7002_v29 = vshrl.u32 %v2968_v4, 5  ;;  %v2973_v38 = vshll.u32 %v4923_v59, %v2970_v22 }
 0x3c6   : > { %v7000_v56 = vsub.s32 %v2704_v12, %v2707_v47  ;;  %v2974_v32 = vshrl.u32 %v4924_v63, %v2971_v35  ;;  %v2976_v15 = vshll.u32 %v4924_v63, %v2970_v22  ;;  %v2977_v61 = vshrl.u32 %v4925_v9, %v2971_v35 }
 0x3c7   : > { %v2833_v36 = vsel %vm2750_vm7, %v2832_v10, %v2831_v1  ;;  %v2979_v23 = vshll.u32 %v4925_v9, %v2970_v22  ;;  %v2980_v57 = vshrl.u32 %v4926_v14, %v2971_v35  ;;  %v2982_v58 = vshll.u32 %v4926_v14, %v2970_v22 }
 0x3c8   : > { %v2710_v31 = vsub.s32 0, %v7000_v56  ;;  %v2836_v52 = vsel %vm6957_vm12, %v6736_v60, %v2833_v36  ;;  %v2975_v40 = vor.u32 %v2974_v32, %v2973_v38  ;;  %v2983_v8 = vshrl.u32 %v4927_v20, %v2971_v35 }
 0x3c9   : > { %4703 = vcosq.f32 %v2836_v52  ;;  %v2978_v3 = vor.u32 %v2977_v61, %v2976_v15  ;;  %v2981_v62 = vor.u32 %v2980_v57, %v2979_v23  ;;  %v2985_v48 = vshll.u32 %v4927_v20, %v2970_v22 }
 0x3ca   : > { %v4338_v12 = vmin.u32 %v2710_v31, %v7000_v56  ;;  %4705 = vsinq.f32 %v2836_v52  ;;  %v2984_v39 = vor.u32 %v2983_v8, %v2982_v58  ;;  %v2986_v50 = vshrl.u32 %v4928_v30, %v2971_v35 }
 0x3cb   : > { %v7021_v27 = vshll.u32 %v2964_v46, 8  ;;  %v2852_v19 = vand.u32 2147483647, %v6980_v24  ;;  %v2856_v4 = vshrl.u32 %v2855_v33, 23  ;;  %v2731_v43 = vsel %vm2646_vm4, %v2730_v11, %v2706_v55 }
 0x3cc   : > { %v2712_v28 = vclz %v4338_v12  ;;  %v2972_v49 = vshrl.u32 %v4923_v59, %v2971_v35  ;;  %v2987_v45 = vor.u32 %v2986_v50, %v2985_v48  ;;  %vm2988_vm5 = vcmp.lt.s32.totalorder %v7002_v29, 1 }
 0x3cd   : > { %vm7030_vm3 = vcmp.le.f32.partialorder %v2644_v5, 0.7853982  ;;  %vm2990_vm9 = vcmp.lt.s32.totalorder %v7002_v29, 3  ;;  %vm2991_vm7 = vcmp.lt.s32.totalorder %v7002_v29, 4  ;;  %v2996_v1 = vsel %vm2988_vm5, %v2975_v40, %v2978_v3 }
 0x3ce   : > { %v4339_v22 = vadd.s32 4294967294, %v2712_v28  ;;  %vm2844_vm10 = vcmp.eq.s32.totalorder %v6988_v16, 0  ;;  %v2993_v55 = vsel %vm2991_vm7, %v2981_v62, 2102212464  ;;  %v2997_v47 = vsel %vm2991_vm7, %v2984_v39, 920167782 }
 0x3cf   : > { %v3000_v46 = vsel %vm2988_vm5, %v2978_v3, %v2981_v62  ;;  %v3001_v35 = vsel %vm2991_vm7, %v2987_v45, 1326507024  ;;  %vm2843_vm6 = vcmp.lt.s32.totalorder %v6988_v16, 2  ;;  %vm2989_vm12 = vcmp.lt.s32.totalorder %v7002_v29, 2 }
 0x3d0   : > { %vm4340_vm11 = vcmp.lt.s32.totalorder %v4339_v22, 0  ;;  %v2998_v5 = vsel %vm2990_vm9, %v2981_v62, %v2997_v47  ;;  %v3002_v33 = vsel %vm2990_vm9, %v2984_v39, %v3001_v35  ;;  %v2992_v11 = vsel %vm2988_vm5, %v2972_v49, %v2975_v40 }
 0x3d1   : > { %v2715_v10 = vsel %vm4340_vm11, 0, %v4339_v22  ;;  %v2999_v38 = vsel %vm2989_vm12, %v2996_v1, %v2998_v5  ;;  %v3003_v32 = vsel %vm2989_vm12, %v3000_v46, %v3002_v33  ;;  %v2994_v36 = vsel %vm2990_vm9, %v2978_v3, %v2993_v55 }
 0x3d2   : > { %v2716_v15 = vsub.s32 32, %v2715_v10  ;;  %v2720_v61 = vsub.s32 4294967266, %v2715_v10  ;;  %v4345_v31 = vadd.s32 4294967169, %v2856_v4  ;;  %v2717_v8 = vshll.u32 %v7000_v56, %v2715_v10 }
 0x3d3   : > { %v7056_v23 = vmul.u32.u64.low %v7021_v27, %v3003_v32  ;;  %v7057_v57 = vmul.u32.u64.high %v7021_v27, %v3003_v32, %v7056_v23  ;;  %v7060_v52 = vmul.u32.u64.low %v7021_v27, %v2999_v38  ;;  %v7061_v58 = vmul.u32.u64.high %v7021_v27, %v2999_v38, %v7060_v52  ;;  %v4704_v40 = vpop.eup %4703 }
 0x3d4   : > { %v2718_v12 = vshrl.u32 %v6997_v42, %v2716_v15  ;;  %v2721_v62 = vadd.s32 127, %v2720_v61  ;;  %v2862_v39 = vadd.s32 1, %v4345_v31  ;;  %v4706_v48 = vpop.eup %4705  ;;  %vm2847_vm15 = vcmp.eq.s32.totalorder %v6988_v16, 2 }
 0x3d5   : > { %v2848_v3 = vxor.u32 2147483648, %v4704_v40  ;;  %v2995_v50 = vsel %vm2989_vm12, %v2992_v11, %v2994_v36  ;;  %v2859_v28 = vand.u32 8388607, %v2852_v19  ;;  %v2845_v4 = vxor.u32 2147483648, %v4706_v48 }
 0x3d6   : > { %v2719_v49 = vor.u32 %v2718_v12, %v2717_v8  ;;  %v2722_v45 = vshll.u32 %v2721_v62, 23  ;;  %vm2863_vm13 = vcmp.gt.s32.totalorder %v2862_v39, 0  ;;  %v2733_v42 = vsel %vm7030_vm3, 0, %v2731_v43 }
 0x3d7   : > { %v2849_v22 = vsel %vm2847_vm15, %v2848_v3, %v4706_v48  ;;  %vm3013_vm0 = vc.u32 %v7057_v57, %v7060_v52  ;;  %v3014_v56 = vadd.s32 1, %v7061_v58  ;;  %v2846_v29 = vsel %vm2844_vm10, %v4704_v40, %v2845_v4 }
 0x3d8   : > { %v2723_v1 = vor.u32 4788187, %v2722_v45  ;;  %v3011_v55 = vmul.u32 %v7021_v27, %v2995_v50  ;;  %v2864_v47 = vsel %vm2863_vm13, %v2862_v39, 0  ;;  %vm2840_vm14 = vweird.f32 %v6736_v60 }
 0x3d9   : > { %v2850_v46 = vsel %vm2843_vm6, %v2846_v29, %v2849_v22  ;;  %v3015_v35 = vsel %vm3013_vm0, %v3014_v56, %v7061_v58  ;;  %v2866_v43 = vand.u32 31, %v2864_v47  ;;  %v2726_v10 = vcvt.s32.f32 %v2719_v49 }
 0x3da   : > { %v2851_v5 = vsel %vm2840_vm14, nan, %v2850_v46  ;;  %v2724_v33 = vand.u32 2147483647, %v2723_v1  ;;  %v3016_v11 = vadd.s32 %v3015_v35, %v3011_v55  ;;  %v2737_v38 = vadd.s32 3, %v2733_v42 }
 0x3db   : > { %4119 = vst [vmem:[%s5525_s20 + $0x98] sm:$0xff] %v2851_v5  ;;  %v2860_v32 = vor.u32 8388608, %v2859_v28  ;;  %v2867_v15 = vsub.s32 32, %v2866_v43  ;;  %v727_v60 = vmul.f32 %v6700_v53, %v691_v2  ;;  %v2869_v61 = vshll.u32 %v4923_v59, %v2866_v43 }
 0x3dc   : > { %v2727_v16 = vmul.f32 %v2726_v10, %v2724_v33  ;;  %v3017_v27 = vadd.s32 536870912, %v3016_v11  ;;  %v2872_v36 = vshll.u32 %v4924_v63, %v2866_v43  ;;  %v2875_v58 = vshll.u32 %v4925_v9, %v2866_v43 }
 0x3dd   : > { %v2870_v31 = vshrl.u32 %v4924_v63, %v2867_v15  ;;  %v2873_v23 = vshrl.u32 %v4925_v9, %v2867_v15  ;;  %v2876_v40 = vshrl.u32 %v4926_v14, %v2867_v15  ;;  %v2879_v26 = vshrl.u32 %v4927_v20, %v2867_v15 }
 0x3de   : > { %v2728_v8 = vxor.u32 2147483648, %v2727_v16  ;;  %v3018_v12 = vshrl.u32 %v3017_v27, 30  ;;  %v2882_v53 = vshrl.u32 %v4928_v30, %v2867_v15  ;;  %v2865_v18 = vshrl.u32 %v2864_v47, 5  ;;  %v437_v27 = vpop.permute.xlu0 %436 }
 0x3df   : > { %v2871_v2 = vor.u32 %v2870_v31, %v2869_v61  ;;  %v2878_v62 = vshll.u32 %v4926_v14, %v2866_v43  ;;  %v2881_v39 = vshll.u32 %v4927_v20, %v2866_v43  ;;  %v2874_v50 = vor.u32 %v2873_v23, %v2872_v36 }
 0x3e0   : > { %v2729_v48 = vsel %vm2646_vm4, %v2728_v8, %v2727_v16  ;;  %v3019_v3 = vshll.u32 %v3018_v12, 30  ;;  %v2877_v28 = vor.u32 %v2876_v40, %v2875_v58  ;;  %v7105_v49 = vand.u32 3, %v2737_v38 }
 0x3e1   : > { %v2732_v4 = vsel %vm7030_vm3, %v6823_v54, %v2729_v48  ;;  %v2880_v45 = vor.u32 %v2879_v26, %v2878_v62  ;;  %v2883_v22 = vor.u32 %v2882_v53, %v2881_v39  ;;  %v7109_v56 = vshll.u32 %v2860_v32, 8 }
 0x3e2   : > { %4707 = vcosq.f32 %v2732_v4  ;;  %v7107_v42 = vsub.s32 %v3016_v11, %v3019_v3  ;;  %v7112_v29 = vadd.f32 %v6733_v34, %v727_v60  ;;  %v2868_v1 = vshrl.u32 %v4923_v59, %v2867_v15 }
 0x3e3   : > { %4709 = vsinq.f32 %v2732_v4  ;;  %vm2884_vm1 = vcmp.lt.s32.totalorder %v2865_v18, 1  ;;  %vm2887_vm2 = vcmp.lt.s32.totalorder %v2865_v18, 4  ;;  %v3042_v55 = vsub.s32 4, %v3018_v12 }
 0x3e4   : > { %v3022_v6 = vsub.s32 0, %v7107_v42  ;;  %v2889_v47 = vsel %vm2887_vm2, %v2877_v28, 2102212464  ;;  %v2892_v46 = vsel %vm2884_vm1, %v2871_v2, %v2874_v50  ;;  %vm2886_vm4 = vcmp.lt.s32.totalorder %v2865_v18, 3 }
 0x3e5   : > { %v2893_v35 = vsel %vm2887_vm2, %v2880_v45, 920167782  ;;  %v2896_v43 = vsel %vm2884_vm1, %v2874_v50, %v2877_v28  ;;  %v2897_v5 = vsel %vm2887_vm2, %v2883_v22, 1326507024  ;;  %vm2885_vm5 = vcmp.lt.s32.totalorder %v2865_v18, 2 }
 0x3e6   : > { %v4350_v33 = vmin.u32 %v3022_v6, %v7107_v42  ;;  %v2894_v10 = vsel %vm2886_vm4, %v2877_v28, %v2893_v35  ;;  %v2898_v34 = vsel %vm2886_vm4, %v2880_v45, %v2897_v5  ;;  %v2888_v11 = vsel %vm2884_vm1, %v2868_v1, %v2871_v2  ;;  %v7153_v22 = vld [vmem:[#allocation5] ss:$0 sm:$0xff] }
 0x3e7   : > { %v2890_v38 = vsel %vm2886_vm4, %v2874_v50, %v2889_v47  ;;  %v2895_v32 = vsel %vm2885_vm5, %v2892_v46, %v2894_v10  ;;  %v2899_v15 = vsel %vm2885_vm5, %v2896_v43, %v2898_v34  ;;  %vm7119_vm3 = vcmp.le.f32.partialorder %v2956_v13, 0.7853982 }
 0x3e8   : > { %vm2958_vm9 = vcmp.lt.s32.totalorder %v6922_v21, 0  ;;  %v3024_v16 = vclz %v4350_v33  ;;  %v7125_v61 = vmul.u32.u64.low %v7109_v56, %v2899_v15  ;;  %v7126_v36 = vmul.u32.u64.high %v7109_v56, %v2899_v15, %v7125_v61 }
 0x3e9   : > { %v7129_v31 = vmul.u32.u64.low %v7109_v56, %v2895_v32  ;;  %v7130_v23 = vmul.u32.u64.high %v7109_v56, %v2895_v32, %v7129_v31  ;;  %v3043_v13 = vsel %vm2958_vm9, %v3042_v55, %v3018_v12  ;;  %v2891_v40 = vsel %vm2885_vm5, %v2888_v11, %v2890_v38 }
 0x3ea   : > { %v4351_v58 = vadd.s32 4294967294, %v3024_v16  ;;  %v3167_v8 = vand.u32 2139095040, %v7112_v29  ;;  %vm2739_vm7 = vcmp.lt.s32.totalorder %v7105_v49, 2  ;;  %vm2740_vm10 = vcmp.eq.s32.totalorder %v7105_v49, 0  ;;  %v7171_v16 = vpop.permute.xlu1 %451 }
 0x3eb   : > { %vm2743_vm6 = vcmp.eq.s32.totalorder %v7105_v49, 2  ;;  %v690_v26 = vsel %vm5228_vm8, %v437_v27, %v6516_v41  ;;  %v3012_v18 = vadd.s32 %v7060_v52, %v7057_v57  ;;  %v3164_v12 = vand.u32 2147483647, %v7112_v29 }
 0x3ec   : > { %v4708_v53 = vpop.eup %4707  ;;  %vm4352_vm11 = vcmp.lt.s32.totalorder %v4351_v58, 0  ;;  %v3168_v2 = vshrl.u32 %v3167_v8, 23  ;;  %v3045_v3 = vsel %vm7119_vm3, 0, %v3043_v13  ;;  %v2907_v50 = vmul.u32 %v7109_v56, %v2891_v40 }
 0x3ed   : > { %v4710_v62 = vpop.eup %4709  ;;  %v2744_v39 = vxor.u32 2147483648, %v4708_v53  ;;  %v3027_v48 = vsel %vm4352_vm11, 0, %v4351_v58  ;;  %vm2909_vm12 = vc.u32 %v7126_v36, %v7129_v31  ;;  %v2910_v57 = vadd.s32 1, %v7130_v23 }
 0x3ee   : > { %v2741_v28 = vxor.u32 2147483648, %v4710_v62  ;;  %v3028_v4 = vsub.s32 32, %v3027_v48  ;;  %v3032_v45 = vsub.s32 4294967266, %v3027_v48  ;;  %v4357_v52 = vadd.s32 4294967169, %v3168_v2 }
 0x3ef   : > { %v2745_v41 = vsel %vm2743_vm6, %v2744_v39, %v4710_v62  ;;  %v726_v1 = vmul.f32 %v7153_v22, %v690_v26  ;;  %v3029_v6 = vshll.u32 %v7107_v42, %v3027_v48  ;;  %vm2736_vm15 = vweird.f32 %v6823_v54  ;;  %v7166_v54 = vld [vmem:[#allocation5 + $0x2] ss:$0 sm:$0xff] }
 0x3f0   : > { %v2742_v56 = vsel %vm2740_vm10, %v4708_v53, %v2741_v28  ;;  %v3030_v55 = vshrl.u32 %v3012_v18, %v3028_v4  ;;  %v3033_v47 = vadd.s32 127, %v3032_v45  ;;  %v2911_v35 = vsel %vm2909_vm12, %v2910_v57, %v7130_v23 }
 0x3f1   : > { %v2746_v46 = vsel %vm2739_vm7, %v2742_v56, %v2745_v41  ;;  %v3174_v43 = vadd.s32 1, %v4357_v52  ;;  %v2912_v34 = vadd.s32 %v2911_v35, %v2907_v50  ;;  %v3049_v11 = vadd.s32 3, %v3045_v3 }
 0x3f2   : > { %v2747_v5 = vsel %vm2736_vm15, nan, %v2746_v46  ;;  %v3031_v33 = vor.u32 %v3030_v55, %v3029_v6  ;;  %v3034_v10 = vshll.u32 %v3033_v47, 23  ;;  %v3171_v38 = vand.u32 8388607, %v3164_v12 }
 0x3f3   : > { %4118 = vst [vmem:[%s5525_s20 + $0x90] sm:$0xff] %v2747_v5  ;;  %vm3175_vm13 = vcmp.gt.s32.totalorder %v3174_v43, 0  ;;  %v2913_v32 = vadd.s32 536870912, %v2912_v34  ;;  %v7169_v49 = vadd.f32 %v7166_v54, %v726_v1  ;;  %vm2854_vm0 = vcmp.lt.s32.totalorder %v6980_v24, 0 }
 0x3f4   : > { %v3035_v42 = vor.u32 4788187, %v3034_v10  ;;  %v3176_v15 = vsel %vm3175_vm13, %v3174_v43, 0  ;;  %v3038_v23 = vcvt.s32.f32 %v3031_v33  ;;  %v7174_v13 = vand.u32 3, %v3049_v11 }
 0x3f5   : > { %v3178_v27 = vand.u32 31, %v3176_v15  ;;  %v2914_v58 = vshrl.u32 %v2913_v32, 30  ;;  %v3172_v40 = vor.u32 8388608, %v3171_v38  ;;  %v693_v26 = vsel %vm5228_vm8, %v7171_v16, %v6430_v44 }
 0x3f6   : > { %v3036_v61 = vand.u32 2147483647, %v3035_v42  ;;  %v3063_v62 = vand.u32 2139095040, %v7169_v49  ;;  %v3177_v52 = vshrl.u32 %v3176_v15, 5  ;;  %vm7199_vm14 = vcmp.le.f32.partialorder %v2852_v19, 0.7853982 }
 0x3f7   : > { %v3179_v8 = vsub.s32 32, %v3178_v27  ;;  %v2915_v18 = vshll.u32 %v2914_v58, 30  ;;  %v3181_v2 = vshll.u32 %v4923_v59, %v3178_v27  ;;  %v3184_v48 = vshll.u32 %v4924_v63, %v3178_v27 }
 0x3f8   : > { %v3039_v53 = vmul.f32 %v3038_v23, %v3036_v61  ;;  %v3187_v45 = vshll.u32 %v4925_v9, %v3178_v27  ;;  %v2938_v57 = vsub.s32 4, %v2914_v58  ;;  %v3190_v56 = vshll.u32 %v4926_v14, %v3178_v27 }
 0x3f9   : > { %v3182_v39 = vshrl.u32 %v4924_v63, %v3179_v8  ;;  %v3185_v3 = vshrl.u32 %v4925_v9, %v3179_v8  ;;  %v3188_v50 = vshrl.u32 %v4926_v14, %v3179_v8  ;;  %v7186_v4 = vsub.s32 %v2912_v34, %v2915_v18 }
 0x3fa   : > { %v3040_v28 = vxor.u32 2147483648, %v3039_v53  ;;  %v3191_v41 = vshrl.u32 %v4927_v20, %v3179_v8  ;;  %v3193_v33 = vshll.u32 %v4927_v20, %v3178_v27  ;;  %v3194_v10 = vshrl.u32 %v4928_v30, %v3179_v8 }
 0x3fb   : > { %v3183_v1 = vor.u32 %v3182_v39, %v3181_v2  ;;  %v2918_v55 = vsub.s32 0, %v7186_v4  ;;  %v3186_v47 = vor.u32 %v3185_v3, %v3184_v48  ;;  %v3189_v46 = vor.u32 %v3188_v50, %v3187_v45 }
 0x3fc   : > { %v3041_v6 = vsel %vm2958_vm9, %v3040_v28, %v3039_v53  ;;  %v3192_v5 = vor.u32 %v3191_v41, %v3190_v56  ;;  %v7206_v11 = vshll.u32 %v3172_v40, 8  ;;  %v3064_v38 = vshrl.u32 %v3063_v62, 23 }
 0x3fd   : > { %v3044_v35 = vsel %vm7119_vm3, %v6922_v21, %v3041_v6  ;;  %v4346_v34 = vmin.u32 %v2918_v55, %v7186_v4  ;;  %v2939_v60 = vsel %vm2854_vm0, %v2938_v57, %v2914_v58  ;;  %v3180_v19 = vshrl.u32 %v4923_v59, %v3179_v8 }
 0x3fe   : > { %4711 = vcosq.f32 %v3044_v35  ;;  %v3195_v42 = vor.u32 %v3194_v10, %v3193_v33  ;;  %vm3196_vm1 = vcmp.lt.s32.totalorder %v3177_v52, 1  ;;  %vm3197_vm2 = vcmp.lt.s32.totalorder %v3177_v52, 2 }
 0x3ff   : > { %4713 = vsinq.f32 %v3044_v35  ;;  %v2920_v32 = vclz %v4346_v34  ;;  %vm3199_vm4 = vcmp.lt.s32.totalorder %v3177_v52, 4  ;;  %vm3198_vm5 = vcmp.lt.s32.totalorder %v3177_v52, 3 }
 0x400   : > { %v3201_v15 = vsel %vm3199_vm4, %v3189_v46, 2102212464  ;;  %v3204_v27 = vsel %vm3196_vm1, %v3183_v1, %v3186_v47  ;;  %v3205_v61 = vsel %vm3199_vm4, %v3192_v5, 920167782  ;;  %vm3055_vm3 = vcmp.eq.s32.totalorder %v7174_v13, 2 }
 0x401   : > { %v4347_v23 = vadd.s32 4294967294, %v2920_v32  ;;  %v3200_v40 = vsel %vm3196_vm1, %v3180_v19, %v3183_v1  ;;  %v3206_v53 = vsel %vm3198_vm5, %v3189_v46, %v3205_v61  ;;  %v3208_v18 = vsel %vm3196_vm1, %v3186_v47, %v3189_v46 }
 0x402   : > { %vm3052_vm9 = vcmp.eq.s32.totalorder %v7174_v13, 0  ;;  %v3202_v58 = vsel %vm3198_vm5, %v3186_v47, %v3201_v15  ;;  %v3207_v8 = vsel %vm3197_vm2, %v3204_v27, %v3206_v53  ;;  %v3209_v2 = vsel %vm3199_vm4, %v3195_v42, 1326507024 }
 0x403   : > { %v4353_v62 = vadd.s32 4294967169, %v3064_v38  ;;  %vm4348_vm7 = vcmp.lt.s32.totalorder %v4347_v23, 0  ;;  %v3210_v39 = vsel %vm3198_vm5, %v3192_v5, %v3209_v2  ;;  %vm3048_vm10 = vweird.f32 %v6922_v21 }
 0x404   : > { %v7215_v48 = vmul.u32.u64.low %v7206_v11, %v3207_v8  ;;  %v7216_v3 = vmul.u32.u64.high %v7206_v11, %v3207_v8, %v7215_v48  ;;  %v2908_v50 = vadd.s32 %v7129_v31, %v7126_v36  ;;  %v2923_v28 = vsel %vm4348_vm7, 0, %v4347_v23 }
 0x405   : > { %v3211_v45 = vsel %vm3197_vm2, %v3208_v18, %v3210_v39  ;;  %v3060_v41 = vand.u32 2147483647, %v7169_v49  ;;  %v2924_v57 = vsub.s32 32, %v2923_v28  ;;  %v2928_v1 = vsub.s32 4294967266, %v2923_v28 }
 0x406   : > { %v2941_v56 = vsel %vm7199_vm14, 0, %v2939_v60  ;;  %v3070_v6 = vadd.s32 1, %v4353_v62  ;;  %v2925_v55 = vshll.u32 %v7186_v4, %v2923_v28  ;;  %v3203_v47 = vsel %vm3197_vm2, %v3200_v40, %v3202_v58 }
 0x407   : > { %v7229_v46 = vmul.u32.u64.low %v7206_v11, %v3211_v45  ;;  %v7230_v35 = vmul.u32.u64.high %v7206_v11, %v3211_v45, %v7229_v46  ;;  %v2926_v31 = vshrl.u32 %v2908_v50, %v2924_v57  ;;  %v2929_v5 = vadd.s32 127, %v2928_v1 }
 0x408   : > { %v4712_v36 = vpop.eup %4711  ;;  %v3222_v33 = vadd.s32 1, %v7216_v3  ;;  %vm3071_vm6 = vcmp.gt.s32.totalorder %v3070_v6, 0  ;;  %v3067_v38 = vand.u32 8388607, %v3060_v41  ;;  %v729_v4 = vmul.f32 %v7153_v22, %v693_v26 }
 0x409   : > { %v4714_v10 = vpop.eup %4713  ;;  %v3056_v34 = vxor.u32 2147483648, %v4712_v36  ;;  %v3072_v60 = vsel %vm3071_vm6, %v3070_v6, 0  ;;  %v2927_v19 = vor.u32 %v2926_v31, %v2925_v55  ;;  %v2930_v42 = vshll.u32 %v2929_v5, 23 }
 0x40a   : > { %v3053_v52 = vxor.u32 2147483648, %v4714_v10  ;;  %v2945_v32 = vadd.s32 3, %v2941_v56  ;;  %v3219_v27 = vmul.u32 %v7206_v11, %v3203_v47  ;;  %vm3221_vm11 = vc.u32 %v7230_v35, %v7215_v48 }
 0x40b   : > { %v3057_v15 = vsel %vm3055_vm3, %v3056_v34, %v4714_v10  ;;  %v3074_v61 = vand.u32 31, %v3072_v60  ;;  %vm3051_vm12 = vcmp.lt.s32.totalorder %v7174_v13, 2  ;;  %v2931_v16 = vor.u32 4788187, %v2930_v42 }
 0x40c   : > { %v3054_v44 = vsel %vm3052_vm9, %v4712_v36, %v3053_v52  ;;  %v3223_v26 = vsel %vm3221_vm11, %v3222_v33, %v7216_v3  ;;  %v7251_v18 = vadd.f32 %v7166_v54, %v729_v4  ;;  %v2934_v8 = vcvt.s32.f32 %v2927_v19 }
 0x40d   : > { %v3058_v23 = vsel %vm3051_vm12, %v3054_v44, %v3057_v15  ;;  %v3224_v40 = vadd.s32 %v3223_v26, %v3219_v27  ;;  %v3075_v53 = vsub.s32 32, %v3074_v61  ;;  %v2932_v58 = vand.u32 2147483647, %v2931_v16 }
 0x40e   : > { %v3059_v11 = vsel %vm3048_vm10, nan, %v3058_v23  ;;  %v7255_v2 = vand.u32 3, %v2945_v32  ;;  %v3068_v13 = vor.u32 8388608, %v3067_v38  ;;  %v3073_v28 = vshrl.u32 %v3072_v60, 5 }
 0x40f   : > { %4121 = vst [vmem:[%s5525_s20 + $0xa8] sm:$0xff] %v3059_v11  ;;  %v3225_v62 = vadd.s32 536870912, %v3224_v40  ;;  %v3078_v39 = vshrl.u32 %v4924_v63, %v3075_v53  ;;  %v3081_v3 = vshrl.u32 %v4925_v9, %v3075_v53  ;;  %v2935_v50 = vmul.f32 %v2934_v8, %v2932_v58 }
 0x410   : > { %v3084_v45 = vshrl.u32 %v4926_v14, %v3075_v53  ;;  %v3087_v57 = vshrl.u32 %v4927_v20, %v3075_v53  ;;  %v3077_v21 = vshll.u32 %v4923_v59, %v3074_v61  ;;  %v3080_v56 = vshll.u32 %v4924_v63, %v3074_v61 }
 0x411   : > { %v3226_v1 = vshrl.u32 %v3225_v62, 30  ;;  %v3083_v6 = vshll.u32 %v4925_v9, %v3074_v61  ;;  %v2936_v55 = vxor.u32 2147483648, %v2935_v50  ;;  %vm3166_vm15 = vcmp.lt.s32.totalorder %v7112_v29, 0 }
 0x412   : > { %v3086_v47 = vshll.u32 %v4926_v14, %v3074_v61  ;;  %v3089_v46 = vshll.u32 %v4927_v20, %v3074_v61  ;;  %v3090_v36 = vshrl.u32 %v4928_v30, %v3075_v53  ;;  %v3079_v5 = vor.u32 %v3078_v39, %v3077_v21 }
 0x413   : > { %v3227_v31 = vshll.u32 %v3226_v1, 30  ;;  %v3082_v33 = vor.u32 %v3081_v3, %v3080_v56  ;;  %v3085_v10 = vor.u32 %v3084_v45, %v3083_v6  ;;  %v2937_v34 = vsel %vm2854_vm0, %v2936_v55, %v2935_v50  ;;  %v448_v3 = vpop.permute.xlu0 %447 }
 0x414   : > { %v3088_v38 = vor.u32 %v3087_v57, %v3086_v47  ;;  %v3091_v60 = vor.u32 %v3090_v36, %v3089_v46  ;;  %v7271_v4 = vshll.u32 %v3068_v13, 8  ;;  %v2940_v52 = vsel %vm7199_vm14, %v6980_v24, %v2937_v34 }
 0x415   : > { %v7276_v19 = vsub.s32 %v3224_v40, %v3227_v31  ;;  %v3250_v42 = vsub.s32 4, %v3226_v1  ;;  %v3076_v32 = vshrl.u32 %v4923_v59, %v3075_v53  ;;  %4715 = vcosq.f32 %v2940_v52 }
 0x416   : > { %vm3092_vm13 = vcmp.lt.s32.totalorder %v3073_v28, 1  ;;  %vm3093_vm1 = vcmp.lt.s32.totalorder %v3073_v28, 2  ;;  %vm3095_vm2 = vcmp.lt.s32.totalorder %v3073_v28, 4  ;;  %4717 = vsinq.f32 %v2940_v52 }
 0x417   : > { %v3230_v15 = vsub.s32 0, %v7276_v19  ;;  %v3097_v27 = vsel %vm3095_vm2, %v3085_v10, 2102212464  ;;  %v3100_v61 = vsel %vm3092_vm13, %v3079_v5, %v3082_v33  ;;  %vm3094_vm0 = vcmp.lt.s32.totalorder %v3073_v28, 3 }
 0x418   : > { %v3101_v44 = vsel %vm3095_vm2, %v3088_v38, 920167782  ;;  %v3104_v16 = vsel %vm3092_vm13, %v3082_v33, %v3085_v10  ;;  %v3105_v26 = vsel %vm3095_vm2, %v3091_v60, 1326507024  ;;  %v3096_v23 = vsel %vm3092_vm13, %v3076_v32, %v3079_v5 }
 0x419   : > { %v4358_v43 = vmin.u32 %v3230_v15, %v7276_v19  ;;  %v3102_v40 = vsel %vm3094_vm0, %v3085_v10, %v3101_v44  ;;  %v3106_v11 = vsel %vm3094_vm0, %v3088_v38, %v3105_v26  ;;  %v3098_v58 = vsel %vm3094_vm0, %v3082_v33, %v3097_v27 }
 0x41a   : > { %v3103_v53 = vsel %vm3093_vm1, %v3100_v61, %v3102_v40  ;;  %v3107_v8 = vsel %vm3093_vm1, %v3104_v16, %v3106_v11  ;;  %v3375_v62 = vand.u32 2139095040, %v7251_v18  ;;  %v3251_v39 = vsel %vm3166_vm15, %v3250_v42, %v3226_v1 }
 0x41b   : > { %v3232_v13 = vclz %v4358_v43  ;;  %v7287_v50 = vmul.u32.u64.low %v7271_v4, %v3107_v8  ;;  %v7288_v45 = vmul.u32.u64.high %v7271_v4, %v3107_v8, %v7287_v50  ;;  %vm2944_vm14 = vweird.f32 %v6980_v24 }
 0x41c   : > { %v7291_v57 = vmul.u32.u64.low %v7271_v4, %v3103_v53  ;;  %v7292_v21 = vmul.u32.u64.high %v7271_v4, %v3103_v53, %v7291_v57  ;;  %v3099_v6 = vsel %vm3093_vm1, %v3096_v23, %v3098_v58  ;;  %v3372_v55 = vand.u32 2147483647, %v7251_v18 }
 0x41d   : > { %v4359_v56 = vadd.s32 4294967294, %v3232_v13  ;;  %v3376_v47 = vshrl.u32 %v3375_v62, 23  ;;  %vm2948_vm4 = vcmp.eq.s32.totalorder %v7255_v2, 0  ;;  %vm2951_vm5 = vcmp.eq.s32.totalorder %v7255_v2, 2 }
 0x41e   : > { %vm7301_vm3 = vcmp.le.f32.partialorder %v3164_v12, 0.7853982  ;;  %v692_v46 = vsel %vm5228_vm8, %v448_v3, %v6531_v7  ;;  %v3220_v28 = vadd.s32 %v7215_v48, %v7230_v35  ;;  %v3115_v10 = vmul.u32 %v7271_v4, %v3099_v6  ;;  %v463_v35 = vpop.permute.xlu1 %462 }
 0x41f   : > { %vm4360_vm9 = vcmp.lt.s32.totalorder %v4359_v56, 0  ;;  %v3253_v36 = vsel %vm7301_vm3, 0, %v3251_v39  ;;  %v4365_v31 = vadd.s32 4294967169, %v3376_v47  ;;  %v4716_v5 = vpop.eup %4715  ;;  %vm3117_vm7 = vc.u32 %v7288_v45, %v7291_v57 }
 0x420   : > { %v3235_v33 = vsel %vm4360_vm9, 0, %v4359_v56  ;;  %v3118_v12 = vadd.s32 1, %v7292_v21  ;;  %v4718_v34 = vpop.eup %4717  ;;  %v2952_v38 = vxor.u32 2147483648, %v4716_v5  ;;  %v3379_v48 = vand.u32 8388607, %v3372_v55 }
 0x421   : > { %v3236_v60 = vsub.s32 32, %v3235_v33  ;;  %v3240_v7 = vsub.s32 4294967266, %v3235_v33  ;;  %v2949_v52 = vxor.u32 2147483648, %v4718_v34  ;;  %v3237_v42 = vshll.u32 %v7276_v19, %v3235_v33 }
 0x422   : > { %v3119_v32 = vsel %vm3117_vm7, %v3118_v12, %v7292_v21  ;;  %v3382_v15 = vadd.s32 1, %v4365_v31  ;;  %v2953_v4 = vsel %vm2951_vm5, %v2952_v38, %v4718_v34  ;;  %vm2947_vm10 = vcmp.lt.s32.totalorder %v7255_v2, 2 }
 0x423   : > { %v3238_v27 = vshrl.u32 %v3220_v28, %v3236_v60  ;;  %v3241_v61 = vadd.s32 127, %v3240_v7  ;;  %v3120_v44 = vadd.s32 %v3119_v32, %v3115_v10  ;;  %v2950_v16 = vsel %vm2948_vm4, %v4716_v5, %v2949_v52 }
 0x424   : > { %vm3383_vm6 = vcmp.gt.s32.totalorder %v3382_v15, 0  ;;  %v695_v19 = vsel %vm5228_vm8, %v463_v35, %v6450_v37  ;;  %v2954_v26 = vsel %vm2947_vm10, %v2950_v16, %v2953_v4  ;;  %v3257_v58 = vadd.s32 3, %v3253_v36 }
 0x425   : > { %v3239_v43 = vor.u32 %v3238_v27, %v3237_v42  ;;  %v3242_v23 = vshll.u32 %v3241_v61, 23  ;;  %v3121_v40 = vadd.s32 536870912, %v3120_v44  ;;  %v2955_v11 = vsel %vm2944_vm14, nan, %v2954_v26 }
 0x426   : > { %v3380_v53 = vor.u32 8388608, %v3379_v48  ;;  %v3384_v8 = vsel %vm3383_vm6, %v3382_v15, 0  ;;  %4120 = vst [vmem:[%s5525_s20 + $0xa0] sm:$0xff] %v2955_v11  ;;  %v728_v2 = vmul.f32 %v7153_v22, %v692_v46  ;;  %v731_v39 = vmul.f32 %v7153_v22, %v695_v19 }
 0x427   : > { %v3243_v62 = vor.u32 4788187, %v3242_v23  ;;  %v3122_v13 = vshrl.u32 %v3121_v40, 30  ;;  %v3386_v3 = vand.u32 31, %v3384_v8  ;;  %v3246_v37 = vcvt.s32.f32 %v3239_v43 }
 0x428   : > { %v7332_v56 = vand.u32 3, %v3257_v58  ;;  %v3116_v6 = vadd.s32 %v7291_v57, %v7288_v45  ;;  %v7335_v47 = vshll.u32 %v3380_v53, 8  ;;  %v7340_v31 = vadd.f32 %v7166_v54, %v728_v2 }
 0x429   : > { %v3244_v50 = vand.u32 2147483647, %v3243_v62  ;;  %v3123_v21 = vshll.u32 %v3122_v13, 30  ;;  %v3387_v24 = vsub.s32 32, %v3386_v3  ;;  %v7343_v46 = vadd.f32 %v7166_v54, %v731_v39 }
 0x42a   : > { %v3385_v5 = vshrl.u32 %v3384_v8, 5  ;;  %v3389_v33 = vshll.u32 %v4923_v59, %v3386_v3  ;;  %vm3062_vm11 = vcmp.lt.s32.totalorder %v7169_v49, 0  ;;  %v3392_v34 = vshll.u32 %v4924_v63, %v3386_v3 }
 0x42b   : > { %v3247_v28 = vmul.f32 %v3246_v37, %v3244_v50  ;;  %v7337_v36 = vsub.s32 %v3120_v44, %v3123_v21  ;;  %v3390_v10 = vshrl.u32 %v4924_v63, %v3387_v24  ;;  %v3393_v12 = vshrl.u32 %v4925_v9, %v3387_v24 }
 0x42c   : > { %v3396_v38 = vshrl.u32 %v4926_v14, %v3387_v24  ;;  %v3395_v7 = vshll.u32 %v4925_v9, %v3386_v3  ;;  %v3398_v48 = vshll.u32 %v4926_v14, %v3386_v3  ;;  %v3399_v35 = vshrl.u32 %v4927_v20, %v3387_v24 }
 0x42d   : > { %v3248_v45 = vxor.u32 2147483648, %v3247_v28  ;;  %v3126_v57 = vsub.s32 0, %v7337_v36  ;;  %v3391_v60 = vor.u32 %v3390_v10, %v3389_v33  ;;  %v3394_v32 = vor.u32 %v3393_v12, %v3392_v34 }
 0x42e   : > { %v3401_v15 = vshll.u32 %v4927_v20, %v3386_v3  ;;  %v3397_v27 = vor.u32 %v3396_v38, %v3395_v7  ;;  %v3400_v61 = vor.u32 %v3399_v35, %v3398_v48  ;;  %v3402_v44 = vshrl.u32 %v4928_v30, %v3387_v24 }
 0x42f   : > { %v3249_v52 = vsel %vm3166_vm15, %v3248_v45, %v3247_v28  ;;  %v4354_v42 = vmin.u32 %v3126_v57, %v7337_v36  ;;  %v3146_v19 = vsub.s32 4, %v3122_v13  ;;  %v3271_v26 = vand.u32 2139095040, %v7340_v31 }
 0x430   : > { %v3252_v4 = vsel %vm7301_vm3, %v7112_v29, %v3249_v52  ;;  %vm7366_vm12 = vcmp.le.f32.partialorder %v3060_v41, 0.7853982  ;;  %v3388_v23 = vshrl.u32 %v4923_v59, %v3387_v24  ;;  %v3403_v1 = vor.u32 %v3402_v44, %v3401_v15 }
 0x431   : > { %4719 = vcosq.f32 %v3252_v4  ;;  %v3128_v16 = vclz %v4354_v42  ;;  %vm3404_vm15 = vcmp.lt.s32.totalorder %v3385_v5, 1  ;;  %vm3406_vm13 = vcmp.lt.s32.totalorder %v3385_v5, 3 }
 0x432   : > { %4721 = vsinq.f32 %v3252_v4  ;;  %vm3407_vm1 = vcmp.lt.s32.totalorder %v3385_v5, 4  ;;  %v3412_v11 = vsel %vm3404_vm15, %v3391_v60, %v3394_v32  ;;  %v3416_v8 = vsel %vm3404_vm15, %v3394_v32, %v3397_v27 }
 0x433   : > { %v4355_v40 = vadd.s32 4294967294, %v3128_v16  ;;  %v3409_v58 = vsel %vm3407_vm1, %v3397_v27, 2102212464  ;;  %v3413_v53 = vsel %vm3407_vm1, %v3400_v61, 920167782  ;;  %vm3405_vm0 = vcmp.lt.s32.totalorder %v3385_v5, 2 }
 0x434   : > { %v3417_v62 = vsel %vm3407_vm1, %v3403_v1, 1326507024  ;;  %v3414_v41 = vsel %vm3406_vm13, %v3397_v27, %v3413_v53  ;;  %v3147_v3 = vsel %vm3062_vm11, %v3146_v19, %v3122_v13  ;;  %vm3259_vm14 = vcmp.lt.s32.totalorder %v7332_v56, 2 }
 0x435   : > { %vm4356_vm2 = vcmp.lt.s32.totalorder %v4355_v40, 0  ;;  %v3418_v2 = vsel %vm3406_vm13, %v3400_v61, %v3417_v62  ;;  %v3415_v50 = vsel %vm3405_vm0, %v3412_v11, %v3414_v41  ;;  %v3408_v28 = vsel %vm3404_vm15, %v3388_v23, %v3391_v60 }
 0x436   : > { %v3131_v39 = vsel %vm4356_vm2, 0, %v4355_v40  ;;  %v3419_v37 = vsel %vm3405_vm0, %v3416_v8, %v3418_v2  ;;  %v3410_v33 = vsel %vm3406_vm13, %v3394_v32, %v3409_v58  ;;  %vm3256_vm4 = vweird.f32 %v7112_v29 }
 0x437   : > { %v3132_v21 = vsub.s32 32, %v3131_v39  ;;  %v3136_v24 = vsub.s32 4294967266, %v3131_v39  ;;  %v7384_v10 = vmul.u32.u64.low %v7335_v47, %v3419_v37  ;;  %v7385_v12 = vmul.u32.u64.high %v7335_v47, %v3419_v37, %v7384_v10 }
 0x438   : > { %v7388_v13 = vmul.u32.u64.low %v7335_v47, %v3415_v50  ;;  %v7389_v45 = vmul.u32.u64.high %v7335_v47, %v3415_v50, %v7388_v13  ;;  %v3133_v57 = vshll.u32 %v7337_v36, %v3131_v39  ;;  %v3272_v7 = vshrl.u32 %v3271_v26, 23 }
 0x439   : > { %v3134_v34 = vshrl.u32 %v3116_v6, %v3132_v21  ;;  %v3137_v38 = vadd.s32 127, %v3136_v24  ;;  %vm3260_vm5 = vcmp.eq.s32.totalorder %v7332_v56, 0  ;;  %vm3263_vm3 = vcmp.eq.s32.totalorder %v7332_v56, 2 }
 0x43a   : > { %v3411_v60 = vsel %vm3405_vm0, %v3408_v28, %v3410_v33  ;;  %v3268_v48 = vand.u32 2147483647, %v7340_v31  ;;  %v3149_v32 = vsel %vm7366_vm12, 0, %v3147_v3  ;;  %v4361_v15 = vadd.s32 4294967169, %v3272_v7 }
 0x43b   : > { %v4720_v35 = vpop.eup %4719  ;;  %v3135_v52 = vor.u32 %v3134_v34, %v3133_v57  ;;  %v3138_v42 = vshll.u32 %v3137_v38, 23  ;;  %vm3429_vm9 = vc.u32 %v7385_v12, %v7388_v13  ;;  %v3430_v6 = vadd.s32 1, %v7389_v45 }
 0x43c   : > { %v4722_v4 = vpop.eup %4721  ;;  %v3264_v36 = vxor.u32 2147483648, %v4720_v35  ;;  %v3583_v27 = vand.u32 2139095040, %v7343_v46  ;;  %v3427_v44 = vmul.u32 %v7335_v47, %v3411_v60  ;;  %v3278_v16 = vadd.s32 1, %v4361_v15 }
 0x43d   : > { %v3261_v5 = vxor.u32 2147483648, %v4722_v4  ;;  %v3139_v61 = vor.u32 4788187, %v3138_v42  ;;  %v3142_v26 = vcvt.s32.f32 %v3135_v52  ;;  %v3153_v23 = vadd.s32 3, %v3149_v32 }
 0x43e   : > { %v3265_v19 = vsel %vm3263_vm3, %v3264_v36, %v4722_v4  ;;  %v3431_v1 = vsel %vm3429_vm9, %v3430_v6, %v7389_v45  ;;  %vm3279_vm7 = vcmp.gt.s32.totalorder %v3278_v16, 0  ;;  %v3275_v47 = vand.u32 8388607, %v3268_v48 }
 0x43f   : > { %v3262_v40 = vsel %vm3260_vm5, %v4720_v35, %v3261_v5  ;;  %v3140_v11 = vand.u32 2147483647, %v3139_v61  ;;  %v3432_v58 = vadd.s32 %v3431_v1, %v3427_v44  ;;  %v3280_v8 = vsel %vm3279_vm7, %v3278_v16, 0 }
 0x440   : > { %v3266_v53 = vsel %vm3259_vm14, %v3262_v40, %v3265_v19  ;;  %v3584_v62 = vshrl.u32 %v3583_v27, 23  ;;  %v3282_v3 = vand.u32 31, %v3280_v8  ;;  %v7416_v37 = vand.u32 3, %v3153_v23 }
 0x441   : > { %v3267_v41 = vsel %vm3256_vm4, nan, %v3266_v53  ;;  %v3143_v2 = vmul.f32 %v3142_v26, %v3140_v11  ;;  %v3433_v39 = vadd.s32 536870912, %v3432_v58  ;;  %v3276_v24 = vor.u32 8388608, %v3275_v47 }
 0x442   : > { %4123 = vst [vmem:[%s5525_s20 + $0xb8] sm:$0xff] %v3267_v41  ;;  %v3283_v28 = vsub.s32 32, %v3282_v3  ;;  %v3580_v56 = vand.u32 2147483647, %v7343_v46  ;;  %v4373_v33 = vadd.s32 4294967169, %v3584_v62  ;;  %v7421_v57 = vshrl.u32 %v3280_v8, 5 }
 0x443   : > { %v3144_v50 = vxor.u32 2147483648, %v3143_v2  ;;  %v3434_v21 = vshrl.u32 %v3433_v39, 30  ;;  %v3285_v29 = vshll.u32 %v4923_v59, %v3282_v3  ;;  %vm3374_vm10 = vcmp.lt.s32.totalorder %v7251_v18, 0 }
 0x444   : > { %v3286_v38 = vshrl.u32 %v4924_v63, %v3283_v28  ;;  %v3288_v7 = vshll.u32 %v4924_v63, %v3282_v3  ;;  %v3289_v60 = vshrl.u32 %v4925_v9, %v3283_v28  ;;  %v3291_v52 = vshll.u32 %v4925_v9, %v3282_v3 }
 0x445   : > { %v3145_v10 = vsel %vm3062_vm11, %v3144_v50, %v3143_v2  ;;  %v3435_v45 = vshll.u32 %v3434_v21, 30  ;;  %v3292_v42 = vshrl.u32 %v4926_v14, %v3283_v28  ;;  %v3294_v43 = vshll.u32 %v4926_v14, %v3282_v3 }
 0x446   : > { %v3148_v34 = vsel %vm7366_vm12, %v7169_v49, %v3145_v10  ;;  %v3287_v32 = vor.u32 %v3286_v38, %v3285_v29  ;;  %v7436_v15 = vshll.u32 %v3276_v24, 8  ;;  %v3290_v36 = vor.u32 %v3289_v60, %v3288_v7 }
 0x447   : > { %4723 = vcosq.f32 %v3148_v34  ;;  %v7431_v35 = vsub.s32 %v3432_v58, %v3435_v45  ;;  %v3293_v6 = vor.u32 %v3292_v42, %v3291_v52  ;;  %v3295_v27 = vshrl.u32 %v4927_v20, %v3283_v28 }
 0x448   : > { %4725 = vsinq.f32 %v3148_v34  ;;  %v3428_v5 = vadd.s32 %v7388_v13, %v7385_v12  ;;  %v3297_v61 = vshll.u32 %v4927_v20, %v3282_v3  ;;  %v3298_v44 = vshrl.u32 %v4928_v30, %v3283_v28 }
 0x449   : > { %v3438_v4 = vsub.s32 0, %v7431_v35  ;;  %v3590_v16 = vadd.s32 1, %v4373_v33  ;;  %vm3159_vm6 = vcmp.eq.s32.totalorder %v7416_v37, 2  ;;  %vm7447_vm11 = vcmp.le.f32.partialorder %v3372_v55, 0.7853982 }
 0x44a   : > { %v3458_v23 = vsub.s32 4, %v3434_v21  ;;  %v3296_v1 = vor.u32 %v3295_v27, %v3294_v43  ;;  %vm3300_vm12 = vcmp.lt.s32.totalorder %v7421_v57, 1  ;;  %vm3156_vm15 = vcmp.eq.s32.totalorder %v7416_v37, 0 }
 0x44b   : > { %v4366_v26 = vmin.u32 %v3438_v4, %v7431_v35  ;;  %v3284_v12 = vshrl.u32 %v4923_v59, %v3283_v28  ;;  %v3299_v13 = vor.u32 %v3298_v44, %v3297_v61  ;;  %vm3301_vm13 = vcmp.lt.s32.totalorder %v7421_v57, 2 }
 0x44c   : > { %vm3303_vm1 = vcmp.lt.s32.totalorder %v7421_v57, 4  ;;  %vm3155_vm2 = vcmp.lt.s32.totalorder %v7416_v37, 2  ;;  %v3308_v11 = vsel %vm3300_vm12, %v3287_v32, %v3290_v36  ;;  %v3312_v58 = vsel %vm3300_vm12, %v3290_v36, %v3293_v6 }
 0x44d   : > { %v3440_v55 = vclz %v4366_v26  ;;  %v3305_v40 = vsel %vm3303_vm1, %v3293_v6, 2102212464  ;;  %vm3152_vm0 = vweird.f32 %v7169_v49  ;;  %vm3302_vm14 = vcmp.lt.s32.totalorder %v7421_v57, 3 }
 0x44e   : > { %v3309_v53 = vsel %vm3303_vm1, %v3296_v1, 920167782  ;;  %v3313_v47 = vsel %vm3303_vm1, %v3299_v13, 1326507024  ;;  %vm3591_vm4 = vcmp.gt.s32.totalorder %v3590_v16, 0  ;;  %v7466_v62 = vsel %vm3374_vm10, %v3458_v23, %v3434_v21 }
 0x44f   : > { %v4367_v8 = vadd.s32 4294967294, %v3440_v55  ;;  %v3310_v41 = vsel %vm3302_vm14, %v3293_v6, %v3309_v53  ;;  %v3314_v2 = vsel %vm3302_vm14, %v3296_v1, %v3313_v47  ;;  %v3304_v39 = vsel %vm3300_vm12, %v3284_v12, %v3287_v32 }
 0x450   : > { %v3306_v3 = vsel %vm3302_vm14, %v3290_v36, %v3305_v40  ;;  %v3311_v50 = vsel %vm3301_vm13, %v3308_v11, %v3310_v41  ;;  %v3315_v24 = vsel %vm3301_vm13, %v3312_v58, %v3314_v2  ;;  %v3592_v21 = vsel %vm3591_vm4, %v3590_v16, 0  ;;  %v459_v41 = vpop.permute.xlu0 %458 }
 0x451   : > { %v4724_v28 = vpop.eup %4723  ;;  %vm4368_vm5 = vcmp.lt.s32.totalorder %v4367_v8, 0  ;;  %v7475_v33 = vmul.u32.u64.low %v7436_v15, %v3315_v24  ;;  %v7476_v10 = vmul.u32.u64.high %v7436_v15, %v3315_v24, %v7475_v33  ;;  %v7485_v32 = vand.u32 8388607, %v3580_v56 }
 0x452   : > { %v4726_v45 = vpop.eup %4725  ;;  %v3160_v29 = vxor.u32 2147483648, %v4724_v28  ;;  %v3443_v34 = vsel %vm4368_vm5, 0, %v4367_v8  ;;  %v7479_v38 = vmul.u32.u64.low %v7436_v15, %v3311_v50  ;;  %v7480_v7 = vmul.u32.u64.high %v7436_v15, %v3311_v50, %v7479_v38 }
 0x453   : > { %v3157_v60 = vxor.u32 2147483648, %v4726_v45  ;;  %v3444_v52 = vsub.s32 32, %v3443_v34  ;;  %v3448_v42 = vsub.s32 4294967266, %v3443_v34  ;;  %v3461_v4 = vsel %vm7447_vm11, 0, %v7466_v62 }
 0x454   : > { %v3161_v43 = vsel %vm3159_vm6, %v3160_v29, %v4726_v45  ;;  %v3307_v36 = vsel %vm3301_vm13, %v3304_v39, %v3306_v3  ;;  %v3594_v6 = vand.u32 31, %v3592_v21  ;;  %v3445_v61 = vshll.u32 %v7431_v35, %v3443_v34 }
 0x455   : > { %v3158_v27 = vsel %vm3156_vm15, %v4724_v28, %v3157_v60  ;;  %v3446_v44 = vshrl.u32 %v3428_v5, %v3444_v52  ;;  %v3449_v16 = vadd.s32 127, %v3448_v42  ;;  %vm3325_vm3 = vc.u32 %v7476_v10, %v7479_v38 }
 0x456   : > { %v3162_v26 = vsel %vm3155_vm2, %v3158_v27, %v3161_v43  ;;  %v3326_v23 = vadd.s32 1, %v7480_v7  ;;  %v3595_v1 = vsub.s32 32, %v3594_v6  ;;  %v3323_v55 = vmul.u32 %v7436_v15, %v3307_v36 }
 0x457   : > { %v3163_v57 = vsel %vm3152_vm0, nan, %v3162_v26  ;;  %v3447_v12 = vor.u32 %v3446_v44, %v3445_v61  ;;  %v3450_v13 = vshll.u32 %v3449_v16, 23  ;;  %v3593_v5 = vshrl.u32 %v3592_v21, 5 }
 0x458   : > { %4122 = vst [vmem:[%s5525_s20 + $0xb0] sm:$0xff] %v3163_v57  ;;  %v3327_v35 = vsel %vm3325_vm3, %v3326_v23, %v7480_v7  ;;  %v3597_v37 = vshll.u32 %v4923_v59, %v3594_v6  ;;  %v3598_v40 = vshrl.u32 %v4924_v63, %v3595_v1  ;;  %v3600_v53 = vshll.u32 %v4924_v63, %v3594_v6 }
 0x459   : > { %v3451_v11 = vor.u32 4788187, %v3450_v13  ;;  %v3328_v58 = vadd.s32 %v3327_v35, %v3323_v55  ;;  %v3601_v47 = vshrl.u32 %v4925_v9, %v3595_v1  ;;  %v3454_v49 = vcvt.s32.f32 %v3447_v12 }
 0x45a   : > { %v3599_v8 = vor.u32 %v3598_v40, %v3597_v37  ;;  %v3603_v62 = vshll.u32 %v4925_v9, %v3594_v6  ;;  %v3604_v15 = vshrl.u32 %v4926_v14, %v3595_v1  ;;  %v3606_v3 = vshll.u32 %v4926_v14, %v3594_v6 }
 0x45b   : > { %v3452_v2 = vand.u32 2147483647, %v3451_v11  ;;  %v3329_v39 = vadd.s32 536870912, %v3328_v58  ;;  %v3607_v50 = vshrl.u32 %v4927_v20, %v3595_v1  ;;  %v3602_v24 = vor.u32 %v3601_v47, %v3600_v53 }
 0x45c   : > { %v3605_v28 = vor.u32 %v3604_v15, %v3603_v62  ;;  %v3609_v33 = vshll.u32 %v4927_v20, %v3594_v6  ;;  %v3610_v21 = vshrl.u32 %v4928_v30, %v3595_v1  ;;  %v694_v7 = vsel %vm5228_vm8, %v459_v41, %v6549_v25 }
 0x45d   : > { %v3455_v45 = vmul.f32 %v3454_v49, %v3452_v2  ;;  %v3330_v29 = vshrl.u32 %v3329_v39, 30  ;;  %v3608_v34 = vor.u32 %v3607_v50, %v3606_v3  ;;  %v3465_v60 = vadd.s32 3, %v3461_v4 }
 0x45e   : > { %v3588_v52 = vor.u32 8388608, %v7485_v32  ;;  %v3611_v42 = vor.u32 %v3610_v21, %v3609_v33  ;;  %vm3612_vm9 = vcmp.lt.s32.totalorder %v3593_v5, 1  ;;  %vm3614_vm7 = vcmp.lt.s32.totalorder %v3593_v5, 3  ;;  %v7569_v33 = vld [vmem:[#allocation5] ss:$0 sm:$0xff] }
 0x45f   : > { %v3456_v43 = vxor.u32 2147483648, %v3455_v45  ;;  %v3331_v36 = vshll.u32 %v3330_v29, 30  ;;  %vm3615_vm6 = vcmp.lt.s32.totalorder %v3593_v5, 4  ;;  %v3620_v6 = vsel %vm3612_vm9, %v3599_v8, %v3602_v24 }
 0x460   : > { %v3621_v27 = vsel %vm3615_vm6, %v3608_v34, 920167782  ;;  %v3624_v61 = vsel %vm3612_vm9, %v3602_v24, %v3605_v28  ;;  %v3625_v44 = vsel %vm3615_vm6, %v3611_v42, 1326507024  ;;  %vm3613_vm12 = vcmp.lt.s32.totalorder %v3593_v5, 2 }
 0x461   : > { %v3457_v16 = vsel %vm3374_vm10, %v3456_v43, %v3455_v45  ;;  %v7525_v26 = vsub.s32 %v3328_v58, %v3331_v36  ;;  %v3622_v25 = vsel %vm3614_vm7, %v3605_v28, %v3621_v27  ;;  %v3596_v4 = vshrl.u32 %v4923_v59, %v3595_v1  ;;  %v474_v58 = vpop.permute.xlu1 %473 }
 0x462   : > { %v3460_v32 = vsel %vm7447_vm11, %v7251_v18, %v3457_v16  ;;  %v3617_v23 = vsel %vm3615_vm6, %v3605_v28, 2102212464  ;;  %v3626_v57 = vsel %vm3614_vm7, %v3608_v34, %v3625_v44  ;;  %v3623_v13 = vsel %vm3613_vm12, %v3620_v6, %v3622_v25 }
 0x463   : > { %4727 = vcosq.f32 %v3460_v32  ;;  %v3334_v12 = vsub.s32 0, %v7525_v26  ;;  %v3627_v55 = vsel %vm3613_vm12, %v3624_v61, %v3626_v57  ;;  %v3628_v35 = vshll.u32 %v3588_v52, 8 }
 0x464   : > { %4729 = vsinq.f32 %v3460_v32  ;;  %v730_v37 = vmul.f32 %v7153_v22, %v694_v7  ;;  %v3466_v40 = vand.u32 3, %v3465_v60  ;;  %v3616_v11 = vsel %vm3612_vm9, %v3596_v4, %v3599_v8 }
 0x465   : > { %v4362_v19 = vmin.u32 %v3334_v12, %v7525_v26  ;;  %v3618_v1 = vsel %vm3614_vm7, %v3602_v24, %v3617_v23  ;;  %v7540_v53 = vmul.u32.u64.low %v3628_v35, %v3627_v55  ;;  %v7541_v47 = vmul.u32.u64.high %v3628_v35, %v3627_v55, %v7540_v53 }
 0x466   : > { %v7543_v49 = vmul.u32.u64.low %v3628_v35, %v3623_v13  ;;  %v7544_v62 = vmul.u32.u64.high %v3628_v35, %v3623_v13, %v7543_v49  ;;  %v3354_v41 = vsub.s32 4, %v3330_v29  ;;  %v3619_v2 = vsel %vm3613_vm12, %v3616_v11, %v3618_v1 }
 0x467   : > { %v3336_v15 = vclz %v4362_v19  ;;  %v7549_v22 = vadd.f32 %v7166_v54, %v730_v37  ;;  %v697_v8 = vsel %vm5228_vm8, %v474_v58, %v6475_v0  ;;  %vm3467_vm10 = vcmp.lt.s32.totalorder %v3466_v40, 2 }
 0x468   : > { %vm7556_vm11 = vcmp.le.f32.partialorder %v3268_v48, 0.7853982  ;;  %vm3270_vm15 = vcmp.lt.s32.totalorder %v7340_v31, 0  ;;  %vm3468_vm13 = vcmp.eq.s32.totalorder %v3466_v40, 0  ;;  %vm3471_vm1 = vcmp.eq.s32.totalorder %v3466_v40, 2 }
 0x469   : > { %v4363_v3 = vadd.s32 4294967294, %v3336_v15  ;;  %vm3637_vm2 = vc.u32 %v7541_v47, %v7543_v49  ;;  %v3638_v54 = vadd.s32 1, %v7544_v62  ;;  %v3355_v0 = vsel %vm3270_vm15, %v3354_v41, %v3330_v29 }
 0x46a   : > { %v3635_v5 = vmul.u32 %v3628_v35, %v3619_v2  ;;  %v3479_v48 = vand.u32 2139095040, %v7549_v22  ;;  %v3476_v28 = vand.u32 2147483647, %v7549_v22  ;;  %v733_v21 = vmul.f32 %v7569_v33, %v697_v8 }
 0x46b   : > { %vm4364_vm0 = vcmp.lt.s32.totalorder %v4363_v3, 0  ;;  %v3639_v24 = vsel %vm3637_vm2, %v3638_v54, %v7544_v62  ;;  %v3324_v34 = vadd.s32 %v7479_v38, %v7476_v10  ;;  %v3357_v36 = vsel %vm7556_vm11, 0, %v3355_v0  ;;  %v7580_v38 = vld [vmem:[#allocation5 + $0x2] ss:$0 sm:$0xff]  ;;  %v7594_v62 = vpop.permute.xlu0 %469 }
 0x46c   : > { %v3339_v50 = vsel %vm4364_vm0, 0, %v4363_v3  ;;  %v3640_v52 = vadd.s32 %v3639_v24, %v3635_v5  ;;  %v3480_v6 = vshrl.u32 %v3479_v48, 23  ;;  %v3483_v10 = vand.u32 8388607, %v3476_v28 }
 0x46d   : > { %v4728_v45 = vpop.eup %4727  ;;  %v3340_v7 = vsub.s32 32, %v3339_v50  ;;  %v3344_v60 = vsub.s32 4294967266, %v3339_v50  ;;  %v3341_v43 = vshll.u32 %v7525_v26, %v3339_v50  ;;  %v7583_v4 = vadd.f32 %v7580_v38, %v733_v21 }
 0x46e   : > { %v4730_v29 = vpop.eup %4729  ;;  %v3472_v42 = vxor.u32 2147483648, %v4728_v45  ;;  %v3641_v16 = vadd.s32 536870912, %v3640_v52  ;;  %v4369_v32 = vadd.s32 4294967169, %v3480_v6  ;;  %vm3464_vm14 = vweird.f32 %v7251_v18 }
 0x46f   : > { %v3469_v27 = vxor.u32 2147483648, %v4730_v29  ;;  %v3342_v61 = vshrl.u32 %v3324_v34, %v3340_v7  ;;  %v3345_v44 = vadd.s32 127, %v3344_v60  ;;  %v3361_v19 = vadd.s32 3, %v3357_v36 }
 0x470   : > { %v3473_v25 = vsel %vm3471_vm1, %v3472_v42, %v4730_v29  ;;  %v7586_v12 = vshrl.u32 %v3641_v16, 30  ;;  %v3486_v55 = vadd.s32 1, %v4369_v32  ;;  %v3484_v1 = vor.u32 8388608, %v3483_v10 }
 0x471   : > { %v3470_v26 = vsel %vm3468_vm13, %v4728_v45, %v3469_v27  ;;  %v3343_v23 = vor.u32 %v3342_v61, %v3341_v43  ;;  %v3346_v57 = vshll.u32 %v3345_v44, 23  ;;  %v3788_v58 = vand.u32 2147483647, %v7583_v4 }
 0x472   : > { %v3474_v13 = vsel %vm3467_vm10, %v3470_v26, %v3473_v25  ;;  %v3643_v11 = vshll.u32 %v7586_v12, 30  ;;  %vm3487_vm4 = vcmp.gt.s32.totalorder %v3486_v55, 0  ;;  %v3791_v53 = vand.u32 2139095040, %v7583_v4 }
 0x473   : > { %v3475_v35 = vsel %vm3464_vm14, nan, %v3474_v13  ;;  %v3347_v37 = vor.u32 4788187, %v3346_v57  ;;  %v3350_v41 = vcvt.s32.f32 %v3343_v23  ;;  %v3488_v40 = vsel %vm3487_vm4, %v3486_v55, 0 }
 0x474   : > { %4125 = vst [vmem:[%s5525_s20 + $0xc8] sm:$0xff] %v3475_v35  ;;  %v7596_v18 = vsub.s32 %v3640_v52, %v3643_v11  ;;  %v3490_v2 = vand.u32 31, %v3488_v40  ;;  %v7598_v3 = vand.u32 3, %v3361_v19  ;;  %v696_v0 = vsel %vm5228_vm8, %v7594_v62, %v6575_v51 }
 0x475   : > { %v3348_v15 = vand.u32 2147483647, %v3347_v37  ;;  %v3636_v5 = vadd.s32 %v7543_v49, %v7541_v47  ;;  %v3666_v48 = vsub.s32 4, %v7586_v12  ;;  %v7608_v24 = vshll.u32 %v3484_v1, 8 }
 0x476   : > { %v3646_v54 = vsub.s32 0, %v7596_v18  ;;  %v3491_v50 = vsub.s32 32, %v3490_v2  ;;  %v3792_v34 = vshrl.u32 %v3791_v53, 23  ;;  %v7613_v7 = vand.u32 8388607, %v3788_v58 }
 0x477   : > { %v3351_v8 = vmul.f32 %v3350_v41, %v3348_v15  ;;  %v7615_v60 = vshrl.u32 %v3488_v40, 5  ;;  %v3493_v52 = vshll.u32 %v4923_v59, %v3490_v2  ;;  %v3496_v27 = vshll.u32 %v4924_v63, %v3490_v2 }
 0x478   : > { %v4374_v45 = vmin.u32 %v3646_v54, %v7596_v18  ;;  %v3494_v29 = vshrl.u32 %v4924_v63, %v3491_v50  ;;  %v3497_v47 = vshrl.u32 %v4925_v9, %v3491_v50  ;;  %v3500_v43 = vshrl.u32 %v4926_v14, %v3491_v50 }
 0x479   : > { %v3352_v21 = vxor.u32 2147483648, %v3351_v8  ;;  %v3503_v36 = vshrl.u32 %v4927_v20, %v3491_v50  ;;  %v3499_v61 = vshll.u32 %v4925_v9, %v3490_v2  ;;  %v3502_v44 = vshll.u32 %v4926_v14, %v3490_v2 }
 0x47a   : > { %v3648_v42 = vclz %v4374_v45  ;;  %v3495_v25 = vor.u32 %v3494_v29, %v3493_v52  ;;  %v4381_v32 = vadd.s32 4294967169, %v3792_v34  ;;  %vm3582_vm5 = vcmp.lt.s32.totalorder %v7343_v46, 0 }
 0x47b   : > { %v3353_v49 = vsel %vm3270_vm15, %v3352_v21, %v3351_v8  ;;  %v3498_v10 = vor.u32 %v3497_v47, %v3496_v27  ;;  %v3501_v26 = vor.u32 %v3500_v43, %v3499_v61  ;;  %v3504_v23 = vor.u32 %v3503_v36, %v3502_v44 }
 0x47c   : > { %v3356_v6 = vsel %vm7556_vm11, %v7340_v31, %v3353_v49  ;;  %v4375_v16 = vadd.s32 4294967294, %v3648_v42  ;;  %v3492_v39 = vshrl.u32 %v4923_v59, %v3491_v50  ;;  %v3505_v57 = vshll.u32 %v4927_v20, %v3490_v2 }
 0x47d   : > { %4731 = vcosq.f32 %v3356_v6  ;;  %v3506_v13 = vshrl.u32 %v4928_v30, %v3491_v50  ;;  %vm3508_vm9 = vcmp.lt.s32.totalorder %v7615_v60, 1  ;;  %vm3509_vm7 = vcmp.lt.s32.totalorder %v7615_v60, 2 }
 0x47e   : > { %4733 = vsinq.f32 %v3356_v6  ;;  %vm4376_vm3 = vcmp.lt.s32.totalorder %v4375_v16, 0  ;;  %vm3510_vm6 = vcmp.lt.s32.totalorder %v7615_v60, 3  ;;  %vm3367_vm12 = vcmp.eq.s32.totalorder %v7598_v3, 2 }
 0x47f   : > { %v3651_v55 = vsel %vm4376_vm3, 0, %v4375_v16  ;;  %vm7640_vm10 = vcmp.le.f32.partialorder %v3580_v56, 0.7853982  ;;  %v3507_v11 = vor.u32 %v3506_v13, %v3505_v57  ;;  %vm3511_vm11 = vcmp.lt.s32.totalorder %v7615_v60, 4  ;;  %v7693_v13 = vpop.permute.xlu1 %484 }
 0x480   : > { %v3652_v37 = vsub.s32 32, %v3651_v55  ;;  %v3656_v19 = vsub.s32 4294967266, %v3651_v55  ;;  %vm3364_vm15 = vcmp.eq.s32.totalorder %v7598_v3, 0  ;;  %v3653_v1 = vshll.u32 %v7596_v18, %v3651_v55 }
 0x481   : > { %v3513_v53 = vsel %vm3511_vm11, %v3501_v26, 2102212464  ;;  %v3516_v15 = vsel %vm3508_vm9, %v3495_v25, %v3498_v10  ;;  %v3517_v41 = vsel %vm3511_vm11, %v3504_v23, 920167782  ;;  %vm3363_vm13 = vcmp.lt.s32.totalorder %v7598_v3, 2 }
 0x482   : > { %v3654_v56 = vshrl.u32 %v3636_v5, %v3652_v37  ;;  %v3657_v40 = vadd.s32 127, %v3656_v19  ;;  %v3518_v2 = vsel %vm3510_vm6, %v3501_v26, %v3517_v41  ;;  %v3520_v8 = vsel %vm3508_vm9, %v3498_v10, %v3501_v26 }
 0x483   : > { %vm3360_vm1 = vweird.f32 %v7340_v31  ;;  %v3512_v18 = vsel %vm3508_vm9, %v3492_v39, %v3495_v25  ;;  %v3519_v54 = vsel %vm3509_vm7, %v3516_v15, %v3518_v2  ;;  %v3521_v50 = vsel %vm3511_vm11, %v3507_v11, 1326507024 }
 0x484   : > { %v3798_v21 = vadd.s32 1, %v4381_v32  ;;  %v3655_v45 = vor.u32 %v3654_v56, %v3653_v1  ;;  %v3658_v34 = vshll.u32 %v3657_v40, 23  ;;  %v3514_v5 = vsel %vm3510_vm6, %v3498_v10, %v3513_v53 }
 0x485   : > { %v3522_v52 = vsel %vm3510_vm6, %v3504_v23, %v3521_v50  ;;  %v7666_v47 = vmul.u32.u64.low %v7608_v24, %v3519_v54  ;;  %v7667_v49 = vmul.u32.u64.high %v7608_v24, %v3519_v54, %v7666_v47  ;;  %v3667_v36 = vsel %vm3582_vm5, %v3666_v48, %v7586_v12 }
 0x486   : > { %v3523_v29 = vsel %vm3509_vm7, %v3520_v8, %v3522_v52  ;;  %vm3799_vm2 = vcmp.gt.s32.totalorder %v3798_v21, 0  ;;  %v3659_v43 = vor.u32 4788187, %v3658_v34  ;;  %v3515_v16 = vsel %vm3509_vm7, %v3512_v18, %v3514_v5 }
 0x487   : > { %v4732_v42 = vpop.eup %4731  ;;  %v7676_v6 = vmul.u32.u64.low %v7608_v24, %v3523_v29  ;;  %v7677_v27 = vmul.u32.u64.high %v7608_v24, %v3523_v29, %v7676_v6  ;;  %v3800_v25 = vsel %vm3799_vm2, %v3798_v21, 0  ;;  %v732_v32 = vmul.f32 %v7569_v33, %v696_v0 }
 0x488   : > { %v4734_v61 = vpop.eup %4733  ;;  %v3368_v44 = vxor.u32 2147483648, %v4732_v42  ;;  %v3660_v26 = vand.u32 2147483647, %v3659_v43  ;;  %v3662_v12 = vcvt.s32.f32 %v3655_v45  ;;  %v3802_v48 = vand.u32 31, %v3800_v25  ;;  %v7721_v45 = vpop.permute.xlu1 %660 }
 0x489   : > { %v3365_v10 = vxor.u32 2147483648, %v4734_v61  ;;  %v3669_v39 = vsel %vm7640_vm10, 0, %v3667_v36  ;;  %v3534_v60 = vadd.s32 1, %v7667_v49  ;;  %v3796_v57 = vor.u32 8388608, %v7613_v7 }
 0x48a   : > { %v3369_v23 = vsel %vm3367_vm12, %v3368_v44, %v4734_v61  ;;  %v3663_v62 = vmul.f32 %v3662_v12, %v3660_v26  ;;  %v3531_v0 = vmul.u32 %v7608_v24, %v3515_v16  ;;  %vm3533_vm0 = vc.u32 %v7677_v27, %v7666_v47 }
 0x48b   : > { %v3366_v51 = vsel %vm3364_vm15, %v4732_v42, %v3365_v10  ;;  %v3535_v37 = vsel %vm3533_vm0, %v3534_v60, %v7667_v49  ;;  %v7703_v19 = vshrl.u32 %v3800_v25, 5  ;;  %v3803_v11 = vsub.s32 32, %v3802_v48 }
 0x48c   : > { %v3370_v55 = vsel %vm3363_vm13, %v3366_v51, %v3369_v23  ;;  %v3664_v1 = vxor.u32 2147483648, %v3663_v62  ;;  %v3536_v53 = vadd.s32 %v3535_v37, %v3531_v0  ;;  %v3805_v15 = vshll.u32 %v4923_v59, %v3802_v48 }
 0x48d   : > { %v3371_v7 = vsel %vm3360_vm1, nan, %v3370_v55  ;;  %v3806_v24 = vshrl.u32 %v4924_v63, %v3803_v11  ;;  %v3808_v41 = vshll.u32 %v4924_v63, %v3802_v48  ;;  %v3809_v3 = vshrl.u32 %v4925_v9, %v3803_v11 }
 0x48e   : > { %4124 = vst [vmem:[%s5525_s20 + $0xc0] sm:$0xff] %v3371_v7  ;;  %v3811_v56 = vshll.u32 %v4925_v9, %v3802_v48  ;;  %v3665_v40 = vsel %vm3582_vm5, %v3664_v1, %v3663_v62  ;;  %v3537_v2 = vadd.s32 536870912, %v3536_v53  ;;  %v3812_v31 = vshrl.u32 %v4926_v14, %v3803_v11 }
 0x48f   : > { %v3814_v8 = vshll.u32 %v4926_v14, %v3802_v48  ;;  %v3668_v18 = vsel %vm7640_vm10, %v7343_v46, %v3665_v40  ;;  %v3807_v54 = vor.u32 %v3806_v24, %v3805_v15  ;;  %v3810_v50 = vor.u32 %v3809_v3, %v3808_v41 }
 0x490   : > { %v3815_v21 = vshrl.u32 %v4927_v20, %v3803_v11  ;;  %4735 = vcosq.f32 %v3668_v18  ;;  %v3673_v34 = vadd.s32 3, %v3669_v39  ;;  %v3538_v5 = vshrl.u32 %v3537_v2, 30 }
 0x491   : > { %v3813_v52 = vor.u32 %v3812_v31, %v3811_v56  ;;  %4737 = vsinq.f32 %v3668_v18  ;;  %v3817_v49 = vshll.u32 %v4927_v20, %v3802_v48  ;;  %v3818_v42 = vshrl.u32 %v4928_v30, %v3803_v11 }
 0x492   : > { %v3816_v29 = vor.u32 %v3815_v21, %v3814_v8  ;;  %v3539_v43 = vshll.u32 %v3538_v5, 30  ;;  %vm3820_vm14 = vcmp.lt.s32.totalorder %v7703_v19, 1  ;;  %v699_v35 = vsel %vm5228_vm8, %v7693_v13, %v7721_v45 }
 0x493   : > { %vm3478_vm4 = vcmp.lt.s32.totalorder %v7549_v22, 0  ;;  %v3819_v36 = vor.u32 %v3818_v42, %v3817_v49  ;;  %vm3823_vm5 = vcmp.lt.s32.totalorder %v7703_v19, 4  ;;  %v3828_v6 = vsel %vm3820_vm14, %v3807_v54, %v3810_v50  ;;  %v7790_v49 = vpop.permute.xlu0 %480 }
 0x494   : > { %v3674_v61 = vand.u32 3, %v3673_v34  ;;  %v7734_v44 = vsub.s32 %v3536_v53, %v3539_v43  ;;  %vm3822_vm3 = vcmp.lt.s32.totalorder %v7703_v19, 3  ;;  %v3829_v16 = vsel %vm3823_vm5, %v3816_v29, 920167782 }
 0x495   : > { %vm3821_vm9 = vcmp.lt.s32.totalorder %v7703_v19, 2  ;;  %v3830_v25 = vsel %vm3822_vm3, %v3813_v52, %v3829_v16  ;;  %v3836_v10 = vshll.u32 %v3796_v57, 8  ;;  %v7743_v26 = vadd.f32 %v7580_v38, %v732_v32 }
 0x496   : > { %v3542_v12 = vsub.s32 0, %v7734_v44  ;;  %v3562_v48 = vsub.s32 4, %v3538_v5  ;;  %v3831_v23 = vsel %vm3821_vm9, %v3828_v6, %v3830_v25  ;;  %v3832_v39 = vsel %vm3820_vm14, %v3810_v50, %v3813_v52 }
 0x497   : > { %vm3672_vm7 = vweird.f32 %v7343_v46  ;;  %v3825_v60 = vsel %vm3823_vm5, %v3813_v52, 2102212464  ;;  %v3833_v57 = vsel %vm3823_vm5, %v3819_v36, 1326507024  ;;  %vm7761_vm6 = vcmp.le.f32.partialorder %v3476_v28, 0.7853982 }
 0x498   : > { %v7755_v51 = vmul.u32.u64.low %v3836_v10, %v3831_v23  ;;  %v7756_v32 = vmul.u32.u64.high %v3836_v10, %v3831_v23, %v7755_v51  ;;  %v4370_v0 = vmin.u32 %v3542_v12, %v7734_v44  ;;  %v3804_v55 = vshrl.u32 %v4923_v59, %v3803_v11 }
 0x499   : > { %v3834_v37 = vsel %vm3822_vm3, %v3816_v29, %v3833_v57  ;;  %vm3675_vm12 = vcmp.lt.s32.totalorder %v3674_v61, 2  ;;  %vm3676_vm10 = vcmp.eq.s32.totalorder %v3674_v61, 0  ;;  %v3687_v1 = vand.u32 2139095040, %v7743_v26 }
 0x49a   : > { %v3835_v7 = vsel %vm3821_vm9, %v3832_v39, %v3834_v37  ;;  %v4736_v53 = vpop.eup %4735  ;;  %v3544_v15 = vclz %v4370_v0  ;;  %v3824_v28 = vsel %vm3820_vm14, %v3804_v55, %v3807_v54  ;;  %v3826_v24 = vsel %vm3822_vm3, %v3810_v50, %v3825_v60  ;;  %v7808_v55 = vpop.permute.xlu0 %656 }
 0x49b   : > { %v3684_v11 = vand.u32 2147483647, %v7743_v26  ;;  %v4738_v41 = vpop.eup %4737  ;;  %v3680_v3 = vxor.u32 2147483648, %v4736_v53  ;;  %v3563_v56 = vsel %vm3478_vm4, %v3562_v48, %v3538_v5  ;;  %vm3679_vm11 = vcmp.eq.s32.totalorder %v3674_v61, 2 }
 0x49c   : > { %v7779_v40 = vmul.u32.u64.low %v3836_v10, %v3835_v7  ;;  %v7780_v2 = vmul.u32.u64.high %v3836_v10, %v3835_v7, %v7779_v40  ;;  %v3677_v31 = vxor.u32 2147483648, %v4738_v41  ;;  %v4371_v8 = vadd.s32 4294967294, %v3544_v15 }
 0x49d   : > { %v3688_v18 = vshrl.u32 %v3687_v1, 23  ;;  %v3681_v21 = vsel %vm3679_vm11, %v3680_v3, %v4738_v41  ;;  %v3532_v54 = vadd.s32 %v7666_v47, %v7677_v27  ;;  %v3827_v50 = vsel %vm3821_vm9, %v3824_v28, %v3826_v24 }
 0x49e   : > { %v3846_v34 = vadd.s32 1, %v7756_v32  ;;  %v3678_v52 = vsel %vm3676_vm10, %v4736_v53, %v3677_v31  ;;  %vm4372_vm15 = vcmp.lt.s32.totalorder %v4371_v8, 0  ;;  %v3565_v5 = vsel %vm7761_vm6, 0, %v3563_v56 }
 0x49f   : > { %v4377_v29 = vadd.s32 4294967169, %v3688_v18  ;;  %v3682_v42 = vsel %vm3675_vm12, %v3678_v52, %v3681_v21  ;;  %v3547_v43 = vsel %vm4372_vm15, 0, %v4371_v8  ;;  %vm3845_vm13 = vc.u32 %v7780_v2, %v7755_v51 }
 0x4a0   : > { %v3691_v47 = vand.u32 8388607, %v3684_v11  ;;  %v3683_v27 = vsel %vm3672_vm7, nan, %v3682_v42  ;;  %v3548_v19 = vsub.s32 32, %v3547_v43  ;;  %v3552_v36 = vsub.s32 4294967266, %v3547_v43 }
 0x4a1   : > { %v3843_v6 = vmul.u32 %v3836_v10, %v3827_v50  ;;  %4127 = vst [vmem:[%s5525_s20 + $0xd8] sm:$0xff] %v3683_v27  ;;  %v3847_v16 = vsel %vm3845_vm13, %v3846_v34, %v7756_v32  ;;  %v3694_v25 = vadd.s32 1, %v4377_v29  ;;  %v735_v61 = vmul.f32 %v7569_v33, %v699_v35 }
 0x4a2   : > { %v3549_v12 = vshll.u32 %v7734_v44, %v3547_v43  ;;  %v3550_v48 = vshrl.u32 %v3532_v54, %v3548_v19  ;;  %v3553_v23 = vadd.s32 127, %v3552_v36  ;;  %v3569_v39 = vadd.s32 3, %v3565_v5 }
 0x4a3   : > { %v3848_v46 = vadd.s32 %v3847_v16, %v3843_v6  ;;  %v3692_v60 = vor.u32 8388608, %v3691_v47  ;;  %vm3695_vm1 = vcmp.gt.s32.totalorder %v3694_v25, 0  ;;  %v7811_v7 = vadd.f32 %v7580_v38, %v735_v61 }
 0x4a4   : > { %v3551_v10 = vor.u32 %v3550_v48, %v3549_v12  ;;  %v3554_v57 = vshll.u32 %v3553_v23, 23  ;;  %v3696_v32 = vsel %vm3695_vm1, %v3694_v25, 0  ;;  %v7815_v35 = vand.u32 3, %v3569_v39 }
 0x4a5   : > { %v3849_v0 = vadd.s32 536870912, %v3848_v46  ;;  %v3698_v37 = vand.u32 31, %v3696_v32  ;;  %v698_v1 = vsel %vm5228_vm8, %v7790_v49, %v7808_v55  ;;  %v7822_v24 = vshll.u32 %v3692_v60, 8 }
 0x4a6   : > { %v3555_v13 = vor.u32 4788187, %v3554_v57  ;;  %v3558_v15 = vcvt.s32.f32 %v3551_v10  ;;  %v3999_v40 = vand.u32 2139095040, %v7811_v7  ;;  %v3844_v54 = vadd.s32 %v7755_v51, %v7780_v2 }
 0x4a7   : > { %v7813_v45 = vshrl.u32 %v3849_v0, 30  ;;  %v3699_v44 = vsub.s32 32, %v3698_v37  ;;  %v3701_v18 = vshll.u32 %v4923_v59, %v3698_v37  ;;  %v3697_v50 = vshrl.u32 %v3696_v32, 5 }
 0x4a8   : > { %v3556_v53 = vand.u32 2147483647, %v3555_v13  ;;  %v3704_v34 = vshll.u32 %v4924_v63, %v3698_v37  ;;  %v3707_v52 = vshll.u32 %v4925_v9, %v3698_v37  ;;  %v3710_v43 = vshll.u32 %v4926_v14, %v3698_v37 }
 0x4a9   : > { %v3851_v28 = vshll.u32 %v7813_v45, 30  ;;  %v3702_v41 = vshrl.u32 %v4924_v63, %v3699_v44  ;;  %v3705_v3 = vshrl.u32 %v4925_v9, %v3699_v44  ;;  %v3708_v56 = vshrl.u32 %v4926_v14, %v3699_v44 }
 0x4aa   : > { %v3559_v31 = vmul.f32 %v3558_v15, %v3556_v53  ;;  %v3711_v21 = vshrl.u32 %v4927_v20, %v3699_v44  ;;  %v3713_v19 = vshll.u32 %v4927_v20, %v3698_v37  ;;  %v3714_v36 = vshrl.u32 %v4928_v30, %v3699_v44 }
 0x4ab   : > { %v7828_v8 = vsub.s32 %v3848_v46, %v3851_v28  ;;  %v3703_v42 = vor.u32 %v3702_v41, %v3701_v18  ;;  %v3706_v47 = vor.u32 %v3705_v3, %v3704_v34  ;;  %v3709_v27 = vor.u32 %v3708_v56, %v3707_v52 }
 0x4ac   : > { %v3560_v5 = vxor.u32 2147483648, %v3559_v31  ;;  %v3712_v6 = vor.u32 %v3711_v21, %v3710_v43  ;;  %v4000_v16 = vshrl.u32 %v3999_v40, 23  ;;  %v3874_v61 = vsub.s32 4, %v7813_v45 }
 0x4ad   : > { %v3854_v29 = vsub.s32 0, %v7828_v8  ;;  %v3700_v12 = vshrl.u32 %v4923_v59, %v3699_v44  ;;  %v3715_v48 = vor.u32 %v3714_v36, %v3713_v19  ;;  %vm3790_vm2 = vcmp.lt.s32.totalorder %v7583_v4, 0 }
 0x4ae   : > { %v3561_v51 = vsel %vm3478_vm4, %v3560_v5, %v3559_v31  ;;  %vm3716_vm0 = vcmp.lt.s32.totalorder %v3697_v50, 1  ;;  %vm3719_vm14 = vcmp.lt.s32.totalorder %v3697_v50, 4  ;;  %vm3717_vm4 = vcmp.lt.s32.totalorder %v3697_v50, 2 }
 0x4af   : > { %v4382_v2 = vmin.u32 %v3854_v29, %v7828_v8  ;;  %v3564_v25 = vsel %vm7761_vm6, %v7549_v22, %v3561_v51  ;;  %v3721_v46 = vsel %vm3719_vm14, %v3709_v27, 2102212464  ;;  %v3724_v39 = vsel %vm3716_vm0, %v3703_v42, %v3706_v47 }
 0x4b0   : > { %4739 = vcosq.f32 %v3564_v25  ;;  %vm3718_vm5 = vcmp.lt.s32.totalorder %v3697_v50, 3  ;;  %v3725_v10 = vsel %vm3719_vm14, %v3712_v6, 920167782  ;;  %v3728_v62 = vsel %vm3716_vm0, %v3706_v47, %v3709_v27 }
 0x4b1   : > { %v3856_v23 = vclz %v4382_v2  ;;  %4741 = vsinq.f32 %v3564_v25  ;;  %vm7851_vm3 = vcmp.le.f32.partialorder %v3788_v58, 0.7853982  ;;  %v3720_v0 = vsel %vm3716_vm0, %v3700_v12, %v3703_v42 }
 0x4b2   : > { %v3726_v32 = vsel %vm3718_vm5, %v3709_v27, %v3725_v10  ;;  %v3729_v37 = vsel %vm3719_vm14, %v3715_v48, 1326507024  ;;  %v4389_v13 = vadd.s32 4294967169, %v4000_v16  ;;  %v3722_v44 = vsel %vm3718_vm5, %v3706_v47, %v3721_v46 }
 0x4b3   : > { %v4383_v60 = vadd.s32 4294967294, %v3856_v23  ;;  %v3727_v53 = vsel %vm3717_vm4, %v3724_v39, %v3726_v32  ;;  %v3730_v15 = vsel %vm3718_vm5, %v3712_v6, %v3729_v37  ;;  %vm3571_vm7 = vcmp.lt.s32.totalorder %v7815_v35, 2 }
 0x4b4   : > { %v3731_v41 = vsel %vm3717_vm4, %v3728_v62, %v3730_v15  ;;  %v7858_v3 = vmul.u32.u64.low %v7822_v24, %v3727_v53  ;;  %v7859_v56 = vmul.u32.u64.high %v7822_v24, %v3727_v53, %v7858_v3  ;;  %v3996_v31 = vand.u32 2147483647, %v7811_v7 }
 0x4b5   : > { %vm4384_vm9 = vcmp.lt.s32.totalorder %v4383_v60, 0  ;;  %v4006_v18 = vadd.s32 1, %v4389_v13  ;;  %vm3568_vm6 = vweird.f32 %v7549_v22  ;;  %v3723_v21 = vsel %vm3717_vm4, %v3720_v0, %v3722_v44 }
 0x4b6   : > { %v3859_v28 = vsel %vm4384_vm9, 0, %v4383_v60  ;;  %v7867_v34 = vmul.u32.u64.low %v7822_v24, %v3731_v41  ;;  %v7868_v52 = vmul.u32.u64.high %v7822_v24, %v3731_v41, %v7867_v34  ;;  %v734_v5 = vmul.f32 %v7569_v33, %v698_v1 }
 0x4b7   : > { %v3860_v58 = vsub.s32 32, %v3859_v28  ;;  %v3864_v40 = vsub.s32 4294967266, %v3859_v28  ;;  %v3861_v29 = vshll.u32 %v7828_v8, %v3859_v28  ;;  %vm4007_vm12 = vcmp.gt.s32.totalorder %v4006_v18, 0 }
 0x4b8   : > { %vm3575_vm10 = vcmp.eq.s32.totalorder %v7815_v35, 2  ;;  %v3875_v50 = vsel %vm3790_vm2, %v3874_v61, %v7813_v45  ;;  %v3742_v47 = vadd.s32 1, %v7859_v56  ;;  %v4008_v27 = vsel %vm4007_vm12, %v4006_v18, 0 }
 0x4b9   : > { %v3862_v42 = vshrl.u32 %v3844_v54, %v3860_v58  ;;  %v3865_v43 = vadd.s32 127, %v3864_v40  ;;  %v4003_v33 = vand.u32 8388607, %v3996_v31  ;;  %v4010_v49 = vand.u32 31, %v4008_v27 }
 0x4ba   : > { %v4740_v17 = vpop.eup %4739  ;;  %v3739_v8 = vmul.u32 %v7822_v24, %v3723_v21  ;;  %vm3741_vm8 = vc.u32 %v7868_v52, %v7858_v3  ;;  %v7888_v54 = vadd.f32 %v7580_v38, %v734_v5  ;;  %v3877_v2 = vsel %vm7851_vm3, 0, %v3875_v50 }
 0x4bb   : > { %v3863_v19 = vor.u32 %v3862_v42, %v3861_v29  ;;  %v3866_v36 = vshll.u32 %v3865_v43, 23  ;;  %v4742_v55 = vpop.eup %4741  ;;  %v3576_v1 = vxor.u32 2147483648, %v4740_v17  ;;  %v3743_v6 = vsel %vm3741_vm8, %v3742_v47, %v7859_v56 }
 0x4bc   : > { %v3573_v45 = vxor.u32 2147483648, %v4742_v55  ;;  %vm3572_vm11 = vcmp.eq.s32.totalorder %v7815_v35, 0  ;;  %v3744_v24 = vadd.s32 %v3743_v6, %v3739_v8  ;;  %v4011_v25 = vsub.s32 32, %v4010_v49 }
 0x4bd   : > { %v3867_v51 = vor.u32 4788187, %v3866_v36  ;;  %v3577_v16 = vsel %vm3575_vm10, %v3576_v1, %v4742_v55  ;;  %v3870_v48 = vcvt.s32.f32 %v3863_v19  ;;  %v4004_v38 = vor.u32 8388608, %v4003_v33 }
 0x4be   : > { %v3574_v61 = vsel %vm3572_vm11, %v4740_v17, %v3573_v45  ;;  %v3881_v46 = vadd.s32 3, %v3877_v2  ;;  %v3745_v39 = vadd.s32 536870912, %v3744_v24  ;;  %v4014_v60 = vshrl.u32 %v4924_v63, %v4011_v25 }
 0x4bf   : > { %v3868_v12 = vand.u32 2147483647, %v3867_v51  ;;  %v3578_v23 = vsel %vm3571_vm7, %v3574_v61, %v3577_v16  ;;  %v4017_v0 = vshrl.u32 %v4925_v9, %v4011_v25  ;;  %v3895_v32 = vand.u32 2139095040, %v7888_v54 }
 0x4c0   : > { %v3579_v10 = vsel %vm3568_vm6, nan, %v3578_v23  ;;  %v7904_v37 = vshrl.u32 %v3745_v39, 30  ;;  %v4013_v13 = vshll.u32 %v4923_v59, %v4010_v49  ;;  %v4020_v35 = vshrl.u32 %v4926_v14, %v4011_v25 }
 0x4c1   : > { %v3871_v62 = vmul.f32 %v3870_v48, %v3868_v12  ;;  %4126 = vst [vmem:[%s5525_s20 + $0xd0] sm:$0xff] %v3579_v10  ;;  %v4023_v44 = vshrl.u32 %v4927_v20, %v4011_v25  ;;  %v4009_v15 = vshrl.u32 %v4008_v27, 5  ;;  %v4016_v28 = vshll.u32 %v4924_v63, %v4010_v49 }
 0x4c2   : > { %v4022_v22 = vshll.u32 %v4926_v14, %v4010_v49  ;;  %v3747_v41 = vshll.u32 %v7904_v37, 30  ;;  %v4015_v56 = vor.u32 %v4014_v60, %v4013_v13  ;;  %v4019_v58 = vshll.u32 %v4925_v9, %v4010_v49 }
 0x4c3   : > { %v3872_v53 = vxor.u32 2147483648, %v3871_v62  ;;  %v4026_v40 = vshrl.u32 %v4928_v30, %v4011_v25  ;;  %v4018_v21 = vor.u32 %v4017_v0, %v4016_v28  ;;  %v4025_v5 = vshll.u32 %v4927_v20, %v4010_v49 }
 0x4c4   : > { %v4024_v34 = vor.u32 %v4023_v44, %v4022_v22  ;;  %v7920_v42 = vand.u32 3, %v3881_v46  ;;  %v7922_v43 = vsub.s32 %v3744_v24, %v3747_v41  ;;  %v4021_v50 = vor.u32 %v4020_v35, %v4019_v58 }
 0x4c5   : > { %v3873_v18 = vsel %vm3790_vm2, %v3872_v53, %v3871_v62  ;;  %v4027_v47 = vor.u32 %v4026_v40, %v4025_v5  ;;  %v4044_v27 = vshll.u32 %v4004_v38, 8  ;;  %v3896_v17 = vshrl.u32 %v3895_v32, 23 }
 0x4c6   : > { %v3876_v29 = vsel %vm7851_vm3, %v7583_v4, %v3873_v18  ;;  %v3750_v19 = vsub.s32 0, %v7922_v43  ;;  %vm4028_vm15 = vcmp.lt.s32.totalorder %v4009_v15, 1  ;;  %vm4031_vm13 = vcmp.lt.s32.totalorder %v4009_v15, 4 }
 0x4c7   : > { %4743 = vcosq.f32 %v3876_v29  ;;  %v4012_v36 = vshrl.u32 %v4923_v59, %v4011_v25  ;;  %vm4030_vm1 = vcmp.lt.s32.totalorder %v4009_v15, 3  ;;  %v4036_v33 = vsel %vm4028_vm15, %v4015_v56, %v4018_v21 }
 0x4c8   : > { %4745 = vsinq.f32 %v3876_v29  ;;  %v4037_v57 = vsel %vm4031_vm13, %v4024_v34, 920167782  ;;  %v4378_v49 = vmin.u32 %v3750_v19, %v7922_v43  ;;  %vm4029_vm2 = vcmp.lt.s32.totalorder %v4009_v15, 2 }
 0x4c9   : > { %v4033_v55 = vsel %vm4031_vm13, %v4021_v50, 2102212464  ;;  %v4038_v1 = vsel %vm4030_vm1, %v4021_v50, %v4037_v57  ;;  %v4040_v45 = vsel %vm4028_vm15, %v4018_v21, %v4021_v50  ;;  %v4041_v51 = vsel %vm4031_vm13, %v4027_v47, 1326507024 }
 0x4ca   : > { %v4039_v8 = vsel %vm4029_vm2, %v4036_v33, %v4038_v1  ;;  %v4385_v2 = vadd.s32 4294967169, %v3896_v17  ;;  %v3752_v6 = vclz %v4378_v49  ;;  %v4032_v16 = vsel %vm4028_vm15, %v4012_v36, %v4015_v56 }
 0x4cb   : > { %v4034_v24 = vsel %vm4030_vm1, %v4018_v21, %v4033_v55  ;;  %v4042_v61 = vsel %vm4030_vm1, %v4024_v34, %v4041_v51  ;;  %v7928_v12 = vmul.u32.u64.low %v4044_v27, %v4039_v8  ;;  %v7929_v48 = vmul.u32.u64.high %v4044_v27, %v4039_v8, %v7928_v12 }
 0x4cc   : > { %v4379_v25 = vadd.s32 4294967294, %v3752_v6  ;;  %v4043_v38 = vsel %vm4029_vm2, %v4040_v45, %v4042_v61  ;;  %v3902_v23 = vadd.s32 1, %v4385_v2  ;;  %vm3880_vm0 = vweird.f32 %v7583_v4 }
 0x4cd   : > { %vm3884_vm14 = vcmp.eq.s32.totalorder %v7920_v42, 0  ;;  %v7935_v46 = vmul.u32.u64.low %v4044_v27, %v4043_v38  ;;  %v7936_v39 = vmul.u32.u64.high %v4044_v27, %v4043_v38, %v7935_v46  ;;  %vm3887_vm4 = vcmp.eq.s32.totalorder %v7920_v42, 2 }
 0x4ce   : > { %vm4380_vm5 = vcmp.lt.s32.totalorder %v4379_v25, 0  ;;  %v4035_v60 = vsel %vm4029_vm2, %v4032_v16, %v4034_v24  ;;  %vm3903_vm3 = vcmp.gt.s32.totalorder %v3902_v23, 0  ;;  %v3740_v62 = vadd.s32 %v7858_v3, %v7868_v52 }
 0x4cf   : > { %v3755_v0 = vsel %vm4380_vm5, 0, %v4379_v25  ;;  %v4054_v32 = vadd.s32 1, %v7929_v48  ;;  %v3892_v13 = vand.u32 2147483647, %v7888_v54  ;;  %vm3686_vm9 = vcmp.lt.s32.totalorder %v7743_v26, 0 }
 0x4d0   : > { %v3756_v53 = vsub.s32 32, %v3755_v0  ;;  %v3760_v28 = vsub.s32 4294967266, %v3755_v0  ;;  %v3904_v22 = vsel %vm3903_vm3, %v3902_v23, 0  ;;  %v3757_v15 = vshll.u32 %v7922_v43, %v3755_v0 }
 0x4d1   : > { %v4744_v10 = vpop.eup %4743  ;;  %v4051_v56 = vmul.u32 %v4044_v27, %v4035_v60  ;;  %vm4053_vm7 = vc.u32 %v7936_v39, %v7928_v12  ;;  %vm3883_vm6 = vcmp.lt.s32.totalorder %v7920_v42, 2  ;;  %v3906_v34 = vand.u32 31, %v3904_v22 }
 0x4d2   : > { %v4746_v35 = vpop.eup %4745  ;;  %v3888_v44 = vxor.u32 2147483648, %v4744_v10  ;;  %v3758_v52 = vshrl.u32 %v3740_v62, %v3756_v53  ;;  %v3761_v58 = vadd.s32 127, %v3760_v28  ;;  %v4055_v40 = vsel %vm4053_vm7, %v4054_v32, %v7929_v48 }
 0x4d3   : > { %v3885_v41 = vxor.u32 2147483648, %v4746_v35  ;;  %v4056_v21 = vadd.s32 %v4055_v40, %v4051_v56  ;;  %vm7956_vm12 = vcmp.le.f32.partialorder %v3684_v11, 0.7853982  ;;  %v3770_v27 = vsub.s32 4, %v7904_v37 }
 0x4d4   : > { %v3889_v3 = vsel %vm3887_vm4, %v3888_v44, %v4746_v35  ;;  %v3759_v43 = vor.u32 %v3758_v52, %v3757_v15  ;;  %v3762_v50 = vshll.u32 %v3761_v58, 23  ;;  %v3907_v19 = vsub.s32 32, %v3906_v34 }
 0x4d5   : > { %v3886_v18 = vsel %vm3884_vm14, %v4744_v10, %v3885_v41  ;;  %v4057_v17 = vadd.s32 536870912, %v4056_v21  ;;  %v3899_v33 = vand.u32 8388607, %v3892_v13  ;;  %v3909_v11 = vshll.u32 %v4923_v59, %v3906_v34 }
 0x4d6   : > { %v3890_v5 = vsel %vm3883_vm6, %v3886_v18, %v3889_v3  ;;  %v3763_v42 = vor.u32 4788187, %v3762_v50  ;;  %v3766_v36 = vcvt.s32.f32 %v3759_v43  ;;  %v3910_v49 = vshrl.u32 %v4924_v63, %v3907_v19 }
 0x4d7   : > { %v3891_v47 = vsel %vm3880_vm0, nan, %v3890_v5  ;;  %v7967_v57 = vshrl.u32 %v4057_v17, 30  ;;  %v3912_v55 = vshll.u32 %v4924_v63, %v3906_v34  ;;  %v3913_v4 = vshrl.u32 %v4925_v9, %v3907_v19 }
 0x4d8   : > { %4129 = vst [vmem:[%s5525_s20 + $0xe8] sm:$0xff] %v3891_v47  ;;  %v3764_v1 = vand.u32 2147483647, %v3763_v42  ;;  %v3916_v8 = vshrl.u32 %v4926_v14, %v3907_v19  ;;  %v3918_v45 = vshll.u32 %v4926_v14, %v3906_v34  ;;  %v3919_v51 = vshrl.u32 %v4927_v20, %v3907_v19 }
 0x4d9   : > { %v3771_v2 = vsel %vm3686_vm9, %v3770_v27, %v7904_v37  ;;  %v4059_v6 = vshll.u32 %v7967_v57, 30  ;;  %v3905_v16 = vshrl.u32 %v3904_v22, 5  ;;  %v3915_v24 = vshll.u32 %v4925_v9, %v3906_v34 }
 0x4da   : > { %v3767_v61 = vmul.f32 %v3766_v36, %v3764_v1  ;;  %v3911_v63 = vor.u32 %v3910_v49, %v3909_v11  ;;  %v3914_v48 = vor.u32 %v3913_v4, %v3912_v55  ;;  %v3920_v25 = vor.u32 %v3919_v51, %v3918_v45 }
 0x4db   : > { %v4060_v38 = vsub.s32 %v4056_v21, %v4059_v6  ;;  %v3917_v23 = vor.u32 %v3916_v8, %v3915_v24  ;;  %v3921_v46 = vshll.u32 %v4927_v20, %v3906_v34  ;;  %v3922_v14 = vshrl.u32 %v4928_v30, %v3907_v19 }
 0x4dc   : > { %v3768_v60 = vxor.u32 2147483648, %v3767_v61  ;;  %v3773_v10 = vsel %vm7956_vm12, 0, %v3771_v2  ;;  %v3900_v37 = vor.u32 8388608, %v3899_v33  ;;  %vm3924_vm10 = vcmp.lt.s32.totalorder %v3905_v16, 1 }
 0x4dd   : > { %v4062_v62 = vsub.s32 0, %v4060_v38  ;;  %v3923_v0 = vor.u32 %v3922_v14, %v3921_v46  ;;  %vm3927_vm8 = vcmp.lt.s32.totalorder %v3905_v16, 4  ;;  %v3908_v32 = vshrl.u32 %v4923_v59, %v3907_v19 }
 0x4de   : > { %v3769_v9 = vsel %vm3686_vm9, %v3768_v60, %v3767_v61  ;;  %vm3926_vm11 = vcmp.lt.s32.totalorder %v3905_v16, 3  ;;  %v3933_v35 = vsel %vm3927_vm8, %v3920_v25, 920167782  ;;  %v3929_v44 = vsel %vm3927_vm8, %v3917_v23, 2102212464 }
 0x4df   : > { %v3772_v20 = vsel %vm7956_vm12, %v7743_v26, %v3769_v9  ;;  %v4390_v30 = vmin.u32 %v4062_v62, %v4060_v38  ;;  %v3932_v53 = vsel %vm3924_vm10, %v3911_v63, %v3914_v48  ;;  %v3934_v28 = vsel %vm3926_vm11, %v3917_v23, %v3933_v35 }
 0x4e0   : > { %4747 = vcosq.f32 %v3772_v20  ;;  %v3936_v22 = vsel %vm3924_vm10, %v3914_v48, %v3917_v23  ;;  %v3937_v41 = vsel %vm3927_vm8, %v3923_v0, 1326507024  ;;  %vm3925_vm15 = vcmp.lt.s32.totalorder %v3905_v16, 2 }
 0x4e1   : > { %4749 = vsinq.f32 %v3772_v20  ;;  %v4064_v15 = vclz %v4390_v30  ;;  %v3940_v59 = vshll.u32 %v3900_v37, 8  ;;  %v3928_v56 = vsel %vm3924_vm10, %v3908_v32, %v3911_v63 }
 0x4e2   : > { %v3930_v3 = vsel %vm3926_vm11, %v3914_v48, %v3929_v44  ;;  %v3935_v52 = vsel %vm3925_vm15, %v3932_v53, %v3934_v28  ;;  %v3938_v58 = vsel %vm3926_vm11, %v3920_v25, %v3937_v41  ;;  %v3777_v5 = vadd.s32 3, %v3773_v10 }
 0x4e3   : > { %v4391_v40 = vadd.s32 4294967294, %v4064_v15  ;;  %v3939_v18 = vsel %vm3925_vm15, %v3936_v22, %v3938_v58  ;;  %v7996_v21 = vmul.u32.u64.low %v3940_v59, %v3935_v52  ;;  %v7997_v34 = vmul.u32.u64.high %v3940_v59, %v3935_v52, %v7996_v21 }
 0x4e4   : > { %v7999_v29 = vmul.u32.u64.low %v3940_v59, %v3939_v18  ;;  %v8000_v43 = vmul.u32.u64.high %v3940_v59, %v3939_v18, %v7999_v29  ;;  %v3931_v50 = vsel %vm3925_vm15, %v3928_v56, %v3930_v3  ;;  %v4052_v27 = vadd.s32 %v7928_v12, %v7936_v39 }
 0x4e5   : > { %vm4392_vm13 = vcmp.lt.s32.totalorder %v4391_v40, 0  ;;  %v3950_v42 = vadd.s32 1, %v7997_v34  ;;  %v3778_v36 = vand.u32 3, %v3777_v5  ;;  %v3947_v33 = vmul.u32 %v3940_v59, %v3931_v50 }
 0x4e6   : > { %v4067_v47 = vsel %vm4392_vm13, 0, %v4391_v40  ;;  %vm3949_vm1 = vc.u32 %v8000_v43, %v7996_v21  ;;  %vm3776_vm4 = vweird.f32 %v7743_v26  ;;  %v4082_v60 = vsub.s32 4, %v7967_v57 }
 0x4e7   : > { %v4068_v17 = vsub.s32 32, %v4067_v47  ;;  %v4072_v19 = vsub.s32 4294967266, %v4067_v47  ;;  %v4069_v11 = vshll.u32 %v4060_v38, %v4067_v47  ;;  %v3951_v4 = vsel %vm3949_vm1, %v3950_v42, %v7997_v34 }
 0x4e8   : > { %v3952_v8 = vadd.s32 %v3951_v4, %v3947_v33  ;;  %vm3783_vm2 = vcmp.eq.s32.totalorder %v3778_v36, 2  ;;  %vm3780_vm0 = vcmp.eq.s32.totalorder %v3778_v36, 0  ;;  %vm3779_vm14 = vcmp.lt.s32.totalorder %v3778_v36, 2 }
 0x4e9   : > { %v4070_v49 = vshrl.u32 %v4052_v27, %v4068_v17  ;;  %v4073_v55 = vadd.s32 127, %v4072_v19  ;;  %vm3998_vm5 = vcmp.lt.s32.totalorder %v7811_v7, 0  ;;  %vm3997_vm3 = vcmp.le.f32.partialorder %v3996_v31, 0.7853982 }
 0x4ea   : > { %v4748_v1 = vpop.eup %4747  ;;  %v3953_v39 = vadd.s32 536870912, %v3952_v8  ;;  %v4083_v26 = vsel %vm3998_vm5, %v4082_v60, %v7967_v57  ;;  %v3948_v28 = vadd.s32 %v7996_v21, %v8000_v43  ;;  %vm4088_vm10 = vweird.f32 %v7811_v7 }
 0x4eb   : > { %v4750_v45 = vpop.eup %4749  ;;  %v3784_v51 = vxor.u32 2147483648, %v4748_v1  ;;  %v4071_v2 = vor.u32 %v4070_v49, %v4069_v11  ;;  %v4074_v6 = vshll.u32 %v4073_v55, 23  ;;  %v4085_v35 = vsel %vm3997_vm3, 0, %v4083_v26 }
 0x4ec   : > { %v3781_v12 = vxor.u32 2147483648, %v4750_v45  ;;  %v3954_v63 = vshrl.u32 %v3953_v39, 30  ;;  %v4089_v44 = vadd.s32 3, %v4085_v35  ;;  %vm3894_vm8 = vcmp.lt.s32.totalorder %v7888_v54, 0 }
 0x4ed   : > { %v3785_v16 = vsel %vm3783_vm2, %v3784_v51, %v4750_v45  ;;  %v4075_v24 = vor.u32 4788187, %v4074_v6  ;;  %v4078_v38 = vcvt.s32.f32 %v4071_v2  ;;  %vm3893_vm11 = vcmp.le.f32.partialorder %v3892_v13, 0.7853982 }
 0x4ee   : > { %v3782_v61 = vsel %vm3780_vm0, %v4748_v1, %v3781_v12  ;;  %v3955_v46 = vshll.u32 %v3954_v63, 30  ;;  %v4090_v15 = vand.u32 3, %v4089_v44  ;;  %v3978_v17 = vsub.s32 4, %v3954_v63 }
 0x4ef   : > { %v3786_v48 = vsel %vm3779_vm14, %v3782_v61, %v3785_v16  ;;  %v4076_v25 = vand.u32 2147483647, %v4075_v24  ;;  %vm3984_vm2 = vweird.f32 %v7888_v54 }
 0x4f0   : > { %v3787_v23 = vsel %vm3776_vm4, nan, %v3786_v48  ;;  %v3956_v10 = vsub.s32 %v3952_v8, %v3955_v46  ;;  %vm4095_vm7 = vcmp.eq.s32.totalorder %v4090_v15, 2  ;;  %vm4092_vm6 = vcmp.eq.s32.totalorder %v4090_v15, 0 }
 0x4f1   : > { %4128 = vst [vmem:[%s5525_s20 + $0xe0] sm:$0xff] %v3787_v23  ;;  %v4079_v14 = vmul.f32 %v4078_v38, %v4076_v25  ;;  %vm4091_vm12 = vcmp.lt.s32.totalorder %v4090_v15, 2  ;;  %v3979_v36 = vsel %vm3894_vm8, %v3978_v17, %v3954_v63 }
 0x4f2   : > { %v3958_v62 = vsub.s32 0, %v3956_v10 }
 0x4f3   : > { %v4080_v37 = vxor.u32 2147483648, %v4079_v14 }
 0x4f4   : > { %v4386_v32 = vmin.u32 %v3958_v62, %v3956_v10 }
 0x4f5   : > { %v4081_v0 = vsel %vm3998_vm5, %v4080_v37, %v4079_v14 }
 0x4f6   : > { %v4084_v9 = vsel %vm3997_vm3, %v7811_v7, %v4081_v0  ;;  %v3960_v20 = vclz %v4386_v32  ;;  %v3981_v7 = vsel %vm3893_vm11, 0, %v3979_v36 }
 0x4f7   : > { %4751 = vcosq.f32 %v4084_v9  ;;  %v3985_v11 = vadd.s32 3, %v3981_v7 }
 0x4f8   : > { %4753 = vsinq.f32 %v4084_v9  ;;  %v4387_v30 = vadd.s32 4294967294, %v3960_v20 }
 0x4f9   : > { %v3986_v49 = vand.u32 3, %v3985_v11 }
 0x4fa   : > { %vm4388_vm9 = vcmp.lt.s32.totalorder %v4387_v30, 0 }
 0x4fb   : > { %v3963_v53 = vsel %vm4388_vm9, 0, %v4387_v30  ;;  %vm3991_vm15 = vcmp.eq.s32.totalorder %v3986_v49, 2  ;;  %vm3988_vm13 = vcmp.eq.s32.totalorder %v3986_v49, 0  ;;  %vm3987_vm1 = vcmp.lt.s32.totalorder %v3986_v49, 2 }
 0x4fc   : > { %v3964_v22 = vsub.s32 32, %v3963_v53  ;;  %v3968_v41 = vsub.s32 4294967266, %v3963_v53  ;;  %v3965_v31 = vshll.u32 %v3956_v10, %v3963_v53 }
 0x4fe   : > { %v3966_v59 = vshrl.u32 %v3948_v28, %v3964_v22  ;;  %v3969_v56 = vadd.s32 127, %v3968_v41 }
 0x500   : > { %v3967_v58 = vor.u32 %v3966_v59, %v3965_v31  ;;  %v3970_v40 = vshll.u32 %v3969_v56, 23 }
 0x501   : > { %v4752_v57 = vpop.eup %4751 }
 0x502   : > { %v4754_v3 = vpop.eup %4753  ;;  %v4096_v52 = vxor.u32 2147483648, %v4752_v57  ;;  %v3971_v5 = vor.u32 4788187, %v3970_v40  ;;  %v3974_v50 = vcvt.s32.f32 %v3967_v58 }
 0x503   : > { %v4093_v18 = vxor.u32 2147483648, %v4754_v3 }
 0x504   : > { %v4097_v34 = vsel %vm4095_vm7, %v4096_v52, %v4754_v3  ;;  %v3972_v43 = vand.u32 2147483647, %v3971_v5 }
 0x505   : > { %v4094_v29 = vsel %vm4092_vm6, %v4752_v57, %v4093_v18 }
 0x506   : > { %v4098_v21 = vsel %vm4091_vm12, %v4094_v29, %v4097_v34  ;;  %v3975_v27 = vmul.f32 %v3974_v50, %v3972_v43 }
 0x507   : > { %v4099_v47 = vsel %vm4088_vm10, nan, %v4098_v21 }
 0x508   : > { %4131 = vst [vmem:[%s5525_s20 + $0xf8] sm:$0xff] %v4099_v47  ;;  %v3976_v19 = vxor.u32 2147483648, %v3975_v27 }
 0x50a   : > { %v3977_v42 = vsel %vm3894_vm8, %v3976_v19, %v3975_v27 }
 0x50b   : > { %v3980_v33 = vsel %vm3893_vm11, %v7888_v54, %v3977_v42 }
 0x50c   : > { %4755 = vcosq.f32 %v3980_v33 }
 0x50d   : > { %4757 = vsinq.f32 %v3980_v33 }
 0x516   : > { %v4756_v55 = vpop.eup %4755 }
 0x517   : > { %v4758_v4 = vpop.eup %4757  ;;  %v3992_v1 = vxor.u32 2147483648, %v4756_v55 }
 0x518   : > { %v3989_v8 = vxor.u32 2147483648, %v4758_v4 }
 0x519   : > { %v3993_v13 = vsel %vm3991_vm15, %v3992_v1, %v4758_v4 }
 0x51a   : > { %v3990_v45 = vsel %vm3988_vm13, %v4756_v55, %v3989_v8 }
 0x51b   : > { %v3994_v51 = vsel %vm3987_vm1, %v3990_v45, %v3993_v13 }
 0x51c   : > { %v3995_v2 = vsel %vm3984_vm2, nan, %v3994_v51 }
 0x51d   : > { %4130 = vst [vmem:[%s5525_s20 + $0xf0] sm:$0xff] %v3995_v2 }
 0x51e   : > { %4840 = shalt.err (!%p4837_p7)
}
 0x51f   : > { %s4841_s6 = scalar_lea.hbm %s8027_s29, 4096  ;;  %s4845_s24 = scalar_lea.hbm %s8082_s2, 8192 }
 0x520   : > { %p4842_p13 = scmp.ne.s32.totalorder %s8027_s29, %s4841_s6  ;;  %p4846_p12 = scmp.lt.u32.totalorder %s8027_s29, %s8082_s2 }
 0x521   : > { %p4847_p4 = scmp.lt.u32.totalorder %s4845_s24, %s4841_s6  ;;  %p4849_p8 = scmp.lt.u32.totalorder %s4841_s6, %s8027_s29 }
 0x522   : > { %p4843_p2 = pnand %p4842_p13, %p8165_p10 }
 0x523   : > { %p4848_p5 = por %p4847_p4, %p4846_p12 }
 0x524   : > { %p4844_p6 = pneg %p4843_p2 }
 0x525   : > { %p4850_p11 = por %p4849_p8, %p4848_p5 }
 0x527   : > { %p4851_p1 = pnand %p4850_p11, %p4844_p6 }
 0x529   : > { %4854 = shalt.err (!%p4851_p1)
}
 0x52a   : > { %s4930_s18 = smov 128   ;;  %s4931_s20 = smov 8  }
 0x52b   : > { %4550 = dma.vmem_to_hbm [thread:$0]  (%p8165_p10), %s8029_s26, 4096, %s8027_s29, %s4133_s12, %s4930_s18, %s4930_s18, %s4931_s20  }
 0x52c PF: > { %s4164_s23 = sand.u32 1, %s4893_s9   ;;  %p8166_p0 = scmp.ne.s32.totalorder %s8093_s22, 0 }
 0x52d   : > { %p8167_p9 = scmp.ge.s32.totalorder %s4913_s14, 2  ;;  %s4165_s7 = scalar_lea.sflag [#allocation4], %s4164_s23 }
 0x52f   : > { %p4561_p3 = pnand %p8167_p9, %p8166_p0 }
 0x531   : > { %4888 = dma.done.wait (!%p4561_p3), %s4165_s7, 4096  }
 0x532   : > { %4890 = vsyncadd (!%p4561_p3), %s4165_s7, 4294963200  ;;  %s19_s14 = sadd.s32 1, %s4913_s14   ;;  %s8168_s9 = smov %s4897_s10 }
 0x533   : > { %p16_p7 = scmp.ge.s32.totalorder %s19_s14, 4   ;;  %s8169_s10 = smov %s4901_s11 }
 0x534   : > { %s8170_s11 = smov %s5066_s25  ;;  %s8171_s12 = smov %s4909_s13 }
 0x535   : > { %s8172_s13 = smov %s8174_s28  ;;  %18 = sbr.rel (!%p16_p7) target bundleno = 7 (0x7), region = 77 }
 0x53c   :  { %4170 = vsyncpa [#allocation3], 1 }
 0x53d   :  { %4172 = vsyncpa [#allocation3 + $0x1], 1 }
 0x53e   :  { %4173 = vsyncpa [#allocation6], 1 }
 0x53f   :  { %4174 = vsyncpa [#allocation4], 1 }
 0x540   :  { %4176 = vsyncpa [#allocation4 + $0x1], 1 }

</bundles_post_ra>
